<compile_context>
chip_gen: v7x
topology: tpu7x:2x2x1
jax: 0.10.0
libtpu: 0.0.40
codegen_flags: <defaults>
</compile_context>

<pallas_src>
import math

import jax
import jax.numpy as jnp
from jax.experimental import pallas as pl
from jax.experimental.pallas import tpu as pltpu

B, T, D, H = 2, 8, 256, 64        # batch, tokens, feat dim (=256 in the module), mlp hidden
N_OPS = 4                          # ['concat', 'add', 'mul', 'modulate']
BT = B * T
P_ATT = 3 * D                      # fused [Q | K | V] projection width (gate moved to VPU)
P_X2 = 2 * D                       # fused [add | concat-x2-half] projection width

_SQRT2_INV = 0.7071067811865476
_INV_SQRT_D = 1.0 / math.sqrt(D)

# SMEM scalar-table layout: [fw0..fw3, bg_x, bg_s, b_mod_alpha, b_mod_beta, b2, pad..]
_SC_BGX, _SC_BGS, _SC_BMA, _SC_BMB, _SC_B2 = 4, 5, 6, 7, 8


def _gelu(v):
    # exact erf-based GELU to match torch.nn.GELU() default
    return 0.5 * v * (1.0 + jax.lax.erf(v * _SQRT2_INV))


def _layernorm(v, g, b, eps=1e-5):
    mu = jnp.mean(v, axis=-1, keepdims=True)
    var = jnp.mean((v - mu) ** 2, axis=-1, keepdims=True)
    return (v - mu) * jax.lax.rsqrt(var + eps) * g + b


def drnet_kernel(sc_ref, x_ref, s_ref, f_ref,
                 wx_ref, ws_ref, wf_ref, bx_ref, bs_ref, gw_ref,
                 wcat1_hbm, wx2_hbm, w1_hbm,
                 bx2_ref, b1_ref, w2_ref,
                 out_ref,
                 wcat1_v, wx2_v, w1_v, dma_sem):
    # ---- start second-stage weight DMAs; they hide behind the attention compute ----
    cp_cat = pltpu.make_async_copy(wcat1_hbm, wcat1_v, dma_sem.at[0])
    cp_x2 = pltpu.make_async_copy(wx2_hbm, wx2_v, dma_sem.at[1])
    cp_w1 = pltpu.make_async_copy(w1_hbm, w1_v, dma_sem.at[2])
    cp_cat.start(); cp_x2.start(); cp_w1.start()

    xf = x_ref[...]                       # (BT, D) f32  feature_extractor1(x)   (identity stub)
    sf = s_ref[...]                       # (BT, D)      feature_extractor2(sal) (identity stub)
    ff = f_ref[...]                       # (BT, D)      fast stream
    xb = xf.astype(jnp.bfloat16)
    sb = sf.astype(jnp.bfloat16)
    fb = ff.astype(jnp.bfloat16)

    # ---- fused Q|K|V projections of BOTH attention blocks (3 MXU pushes) ----
    # cat([sem, temp]) @ W == sem @ W[:D] + temp @ W[D:]; `temp` == fast is shared
    # by both blocks, so both blocks' temp-half weights are stacked inside wf.
    proj_f = jnp.dot(fb, wf_ref[...], preferred_element_type=jnp.float32)        # (BT, 2*P_ATT)
    proj_x = (jnp.dot(xb, wx_ref[...], preferred_element_type=jnp.float32)
              + proj_f[:, :P_ATT] + bx_ref[...])                                  # (BT, P_ATT)
    proj_s = (jnp.dot(sb, ws_ref[...], preferred_element_type=jnp.float32)
              + proj_f[:, P_ATT:] + bs_ref[...])                                  # (BT, P_ATT)

    gw = gw_ref[...]                      # (8, D) small-vector weight slab

    def stream(proj, sem_feat, g_sem, g_tmp, g_bias):
        # gate logit on the VPU: broadcast-multiply + lane reduce (no padded matmul column)
        glog = (jnp.sum(sem_feat * g_sem, axis=-1, keepdims=True)
                + jnp.sum(ff * g_tmp, axis=-1, keepdims=True) + g_bias)           # (BT, 1)
        gate = jax.nn.sigmoid(glog).reshape(B, T, 1)
        Q = proj[:, 0:D].reshape(B, T, D)
        K = proj[:, D:2 * D].reshape(B, T, D)
        V = proj[:, 2 * D:3 * D].reshape(B, T, D)
        scores = jnp.einsum('bqd,bkd->bqk', Q, K,
                            preferred_element_type=jnp.float32) * _INV_SQRT_D     # (B,T,T)
        attn = jax.nn.softmax(scores, axis=-1)
        aw = attn * gate                                  # per-query gate, broadcast over keys
        ctx = jnp.einsum('bqk,bkd->bqd', aw, V, preferred_element_type=jnp.float32)
        fused = (ctx + sem_feat.reshape(B, T, D)).reshape(BT, D)
        return fused, jnp.mean(aw, axis=1)                # fused_feature, attn_weights.mean(1)

    fx, w_x = stream(proj_x, xf, gw[0:1, :], gw[1:2, :], sc_ref[_SC_BGX])   # X stream (= x1)
    fs, w_s = stream(proj_s, sf, gw[2:3, :], gw[3:4, :], sc_ref[_SC_BGS])   # S stream (= x2)

    weight = jax.nn.softmax(0.65 * w_x + 0.35 * w_s, axis=-1)                # (B, T)

    # ---- FusionCell (eval mode; gating weights precomputed into the SMEM table) ----
    cp_cat.wait(); cp_x2.wait(); cp_w1.wait()             # second-stage weights now in VMEM

    x1b = fx.astype(jnp.bfloat16)
    x2b = fs.astype(jnp.bfloat16)
    p2 = jnp.dot(x2b, wx2_v[...], preferred_element_type=jnp.float32) + bx2_ref[...]  # (BT,P_X2)
    o_add = fx + p2[:, :D]                                                    # 'add'
    o_cat = jnp.dot(x1b, wcat1_v[...], preferred_element_type=jnp.float32) + p2[:, D:]  # 'concat'
    o_mul = _layernorm(fx * fs, gw[6:7, :], gw[7:8, :])                       # 'mul'
    # 'modulate': alpha/beta via VPU multiply + lane reduce against x2 (= fs)
    m_a = jnp.sum(fs * gw[4:5, :], axis=-1, keepdims=True) + sc_ref[_SC_BMA]  # (BT, 1)
    m_b = jnp.sum(fs * gw[5:6, :], axis=-1, keepdims=True) + sc_ref[_SC_BMB]
    o_mod = jnp.abs(m_a) * fx + m_b
    feat = (sc_ref[0] * o_cat + sc_ref[1] * o_add
            + sc_ref[2] * o_mul + sc_ref[3] * o_mod)                          # (BT, D)

    # ---- score MLP: Linear(256,64) -> GELU -> Linear(64,1), hidden kept at 64 lanes ----
    hid = _gelu(jnp.dot(feat.astype(jnp.bfloat16), w1_v[...],
                        preferred_element_type=jnp.float32) + b1_ref[...])    # (BT, H)

    # (weight * score).mean over T == ((sum_t weight[t]*hid[t,:]) @ w2 + b2) / T
    # (softmax weights sum to 1, so the head bias folds out of the weighted sum)
    wh = jnp.sum(weight[:, :, None] * hid.reshape(B, T, H), axis=1)           # (B, H)
    res = (jnp.sum(wh * w2_ref[...], axis=-1, keepdims=True)
           + sc_ref[_SC_B2]) * (1.0 / T)                                      # (B, 1)
    out_ref[...] = jnp.broadcast_to(res, (B, 128))


def pack_params(p, fusion_w):
    """Fuse the per-layer f32 params into wide (mostly bf16) kernel operands."""
    bf16 = lambda a: a.astype(jnp.bfloat16)

    def att_block(tag):
        w_full = jnp.concatenate([p[f"wq{tag}"], p[f"wk{tag}"], p[f"wv{tag}"]], axis=1)  # (2D,3D)
        b_full = jnp.concatenate([p[f"bq{tag}"], p[f"bk{tag}"], p[f"bv{tag}"]], axis=1)  # (1, 3D)
        return w_full[:D], w_full[D:], b_full                     # sem half, temp half, bias

    wx_sem, wx_tmp, bx = att_block("x")
    ws_sem, ws_tmp, bs = att_block("s")
    wf = jnp.concatenate([wx_tmp, ws_tmp], axis=1)                # (D, 2*P_ATT)

    # small-vector slab (8, D): gateX sem/tmp, gateS sem/tmp, modulate alpha/beta, LN gamma/beta
    gw = jnp.stack([p["wgx"][:D, 0], p["wgx"][D:, 0],
                    p["wgs"][:D, 0], p["wgs"][D:, 0],
                    p["wma"][:, 0], p["wmb"][:, 0],
                    p["lng"][0], p["lnb"][0]], axis=0).astype(jnp.float32)

    # FusionCell: fused x2 projection = [add | concat-x2-half]; x1 concat-half separate
    wcat1 = p["wc"][:D]                                           # (D, D)
    wx2 = jnp.concatenate([p["wa"], p["wc"][D:]], axis=1)         # (D, 2D)
    bx2 = jnp.concatenate([p["ba"], p["bc"]], axis=1)             # (1, 2D)

    w2row = p["w2"].reshape(1, H)                                 # head weight as a row vector

    scal = jnp.zeros((16,), jnp.float32)
    scal = scal.at[0:4].set(fusion_w)
    scal = scal.at[4].set(p["bgx"][0, 0])
    scal = scal.at[5].set(p["bgs"][0, 0])
    scal = scal.at[6].set(p["bma"][0, 0])
    scal = scal.at[7].set(p["bmb"][0, 0])
    scal = scal.at[8].set(p["b2"][0, 0])

    return dict(
        scal=scal,
        wx=bf16(wx_sem), ws=bf16(ws_sem), wf=bf16(wf), bx=bx, bs=bs, gw=gw,
        wcat1=bf16(wcat1), wx2=bf16(wx2), w1=bf16(p["w1"]),
        bx2=bx2, b1=p["b1"], w2=w2row,
    )


def drnet_forward(x, saliency, fast, params):
    fusion_w = jax.nn.softmax(params["alpha"])          # eval-mode FusionCell gating (4,)
    pk = pack_params(params, fusion_w)

    def full2d(shape):
        return pl.BlockSpec(shape, lambda i: (0, 0))

    feat_spec = full2d((BT, D))
    in_specs = [
        pl.BlockSpec(memory_space=pltpu.MemorySpace.SMEM),        # scalar table
        feat_spec, feat_spec, feat_spec,                          # x, saliency, fast
        full2d((D, P_ATT)),                                       # wx (sem half, X block)
        full2d((D, P_ATT)),                                       # ws (sem half, S block)
        full2d((D, 2 * P_ATT)),                                   # wf (temp halves, both blocks)
        full2d((1, P_ATT)), full2d((1, P_ATT)),                   # bx, bs
        full2d((8, D)),                                           # gate/modulate/LN vector slab
        pl.BlockSpec(memory_space=pl.ANY),                        # wcat1 (HBM, manual DMA)
        pl.BlockSpec(memory_space=pl.ANY),                        # wx2   (HBM, manual DMA)
        pl.BlockSpec(memory_space=pl.ANY),                        # w1    (HBM, manual DMA)
        full2d((1, P_X2)), full2d((1, H)), full2d((1, H)),        # bx2, b1, w2 row
    ]

    out = pl.pallas_call(
        drnet_kernel,
        out_shape=jax.ShapeDtypeStruct((B, 128), jnp.float32),
        grid=(1,),                                      # whole clip in one step
        in_specs=in_specs,
        out_specs=pl.BlockSpec((B, 128), lambda i: (0, 0)),
        scratch_shapes=[
            pltpu.VMEM((D, D), jnp.bfloat16),           # wcat1 landing buffer
            pltpu.VMEM((D, 2 * D), jnp.bfloat16),       # wx2 landing buffer
            pltpu.VMEM((D, H), jnp.bfloat16),           # w1 landing buffer
            pltpu.SemaphoreType.DMA((3,)),
        ],
        compiler_params=pltpu.CompilerParams(
            dimension_semantics=("arbitrary",),
            vmem_limit_bytes=16 << 20),
    )(pk["scal"],
      x.reshape(BT, D), saliency.reshape(BT, D), fast.reshape(BT, D),
      pk["wx"], pk["ws"], pk["wf"], pk["bx"], pk["bs"], pk["gw"],
      pk["wcat1"], pk["wx2"], pk["w1"],
      pk["bx2"], pk["b1"], pk["w2"])

    score = out[:, 0]                  # (B,)  == score.mean(1).squeeze(-1)
    return score, x, saliency          # (score, ori_x, ori_s)


def init_params(key):
    keys = iter(jax.random.split(key, 64))

    def rnd(shape, scale=0.05):
        return jax.random.normal(next(keys), shape, dtype=jnp.float32) * scale

    p = {}
    # two GatedSpatioTempAttention blocks (X and S), hidden_dim = 256
    for tag in ("x", "s"):
        p[f"wq{tag}"] = rnd((2 * D, D)); p[f"bq{tag}"] = rnd((1, D))
        p[f"wk{tag}"] = rnd((2 * D, D)); p[f"bk{tag}"] = rnd((1, D))
        p[f"wv{tag}"] = rnd((2 * D, D)); p[f"bv{tag}"] = rnd((1, D))
        p[f"wg{tag}"] = rnd((2 * D, 1)); p[f"bg{tag}"] = rnd((1, 1))
    # FusionCell ops
    p["wc"] = rnd((2 * D, D)); p["bc"] = rnd((1, D))          # 'concat' Linear(2D, D)
    p["wa"] = rnd((D, D));     p["ba"] = rnd((1, D))          # 'add'    Linear(D, D)
    p["lng"] = jnp.ones((1, D), jnp.float32)                  # 'mul'    LayerNorm(D)
    p["lnb"] = jnp.zeros((1, D), jnp.float32)
    p["wma"] = rnd((D, 1)); p["bma"] = rnd((1, 1))            # 'modulate' Linear(D, 2) split
    p["wmb"] = rnd((D, 1)); p["bmb"] = rnd((1, 1))            #   into its two output columns
    # score MLP
    p["w1"] = rnd((D, H)); p["b1"] = rnd((1, H))
    p["w2"] = rnd((H, 1)); p["b2"] = rnd((1, 1))
    # FusionCell architecture parameter alpha
    p["alpha"] = jax.random.normal(next(keys), (N_OPS,), dtype=jnp.float32)
    return p


if __name__ == "__main__":
    key = jax.random.PRNGKey(0)
    k1, k2, k3, kp = jax.random.split(key, 4)
    x = jax.random.normal(k1, (B, T, D), dtype=jnp.float32)
    saliency = jax.random.normal(k2, (B, T, D), dtype=jnp.float32)
    fast = jax.random.normal(k3, (B, T, D), dtype=jnp.float32)
    params = init_params(kp)

    score, ori_x, ori_s = drnet_forward(x, saliency, fast, params)
    jax.block_until_ready(score)
    assert score.shape == (B,)
    assert bool(jnp.all(jnp.isfinite(score)))
    assert ori_x.shape == (B, T, D) and ori_s.shape == (B, T, D)
    print("KERNEL_OK")
</pallas_src>

<mosaic_0001>
module attributes {stable_mosaic.version = 11 : i64} {
  func.func @drnet_kernel(%arg0: i32, %arg1: memref<16xf32, #tpu.memory_space<smem>>, %arg2: memref<16x256xf32, #tpu.memory_space<vmem>>, %arg3: memref<16x256xf32, #tpu.memory_space<vmem>>, %arg4: memref<16x256xf32, #tpu.memory_space<vmem>>, %arg5: memref<256x768xbf16, #tpu.memory_space<vmem>>, %arg6: memref<256x768xbf16, #tpu.memory_space<vmem>>, %arg7: memref<256x1536xbf16, #tpu.memory_space<vmem>>, %arg8: memref<1x768xf32, #tpu.memory_space<vmem>>, %arg9: memref<1x768xf32, #tpu.memory_space<vmem>>, %arg10: memref<8x256xf32, #tpu.memory_space<vmem>>, %arg11: memref<256x256xbf16, #tpu.memory_space<any>>, %arg12: memref<256x512xbf16, #tpu.memory_space<any>>, %arg13: memref<256x64xbf16, #tpu.memory_space<any>>, %arg14: memref<1x512xf32, #tpu.memory_space<vmem>>, %arg15: memref<1x64xf32, #tpu.memory_space<vmem>>, %arg16: memref<1x64xf32, #tpu.memory_space<vmem>>, %arg17: memref<2x128xf32, #tpu.memory_space<vmem>>, %arg18: memref<256x256xbf16, #tpu.memory_space<vmem>>, %arg19: memref<256x512xbf16, #tpu.memory_space<vmem>>, %arg20: memref<256x64xbf16, #tpu.memory_space<vmem>>, %arg21: memref<3x!tpu.dma_semaphore, #tpu.memory_space<semaphore_mem>>) attributes {dimension_semantics = [#tpu.dimension_semantics<arbitrary>], iteration_bounds = array<i64: 1>, scalar_prefetch = 0 : i64, scratch_operands = 4 : i64, tpu.core_type = #tpu.core_type<tc>, window_params = [{transform_indices = @transform_0, window_bounds = array<i64: 16>}, {pipeline_mode = #tpu.pipeline_mode<synchronous>, transform_indices = @transform_1, window_bounds = array<i64: 16, 256>}, {pipeline_mode = #tpu.pipeline_mode<synchronous>, transform_indices = @transform_2, window_bounds = array<i64: 16, 256>}, {pipeline_mode = #tpu.pipeline_mode<synchronous>, transform_indices = @transform_3, window_bounds = array<i64: 16, 256>}, {pipeline_mode = #tpu.pipeline_mode<synchronous>, transform_indices = @transform_4, window_bounds = array<i64: 256, 768>}, {pipeline_mode = #tpu.pipeline_mode<synchronous>, transform_indices = @transform_5, window_bounds = array<i64: 256, 768>}, {pipeline_mode = #tpu.pipeline_mode<synchronous>, transform_indices = @transform_6, window_bounds = array<i64: 256, 1536>}, {pipeline_mode = #tpu.pipeline_mode<synchronous>, transform_indices = @transform_7, window_bounds = array<i64: 1, 768>}, {pipeline_mode = #tpu.pipeline_mode<synchronous>, transform_indices = @transform_8, window_bounds = array<i64: 1, 768>}, {pipeline_mode = #tpu.pipeline_mode<synchronous>, transform_indices = @transform_9, window_bounds = array<i64: 8, 256>}, {}, {}, {}, {pipeline_mode = #tpu.pipeline_mode<synchronous>, transform_indices = @transform_13, window_bounds = array<i64: 1, 512>}, {pipeline_mode = #tpu.pipeline_mode<synchronous>, transform_indices = @transform_14, window_bounds = array<i64: 1, 64>}, {pipeline_mode = #tpu.pipeline_mode<synchronous>, transform_indices = @transform_15, window_bounds = array<i64: 1, 64>}, {pipeline_mode = #tpu.pipeline_mode<synchronous>, transform_indices = @transform_16, window_bounds = array<i64: 2, 128>}]} {
    %c0_i32 = arith.constant 0 : i32
    %0 = tpu.memref_slice %arg21[%c0_i32] : memref<3x!tpu.dma_semaphore, #tpu.memory_space<semaphore_mem>> -> memref<1x!tpu.dma_semaphore, #tpu.memory_space<semaphore_mem>>
    %1 = tpu.memref_squeeze %0 : memref<1x!tpu.dma_semaphore, #tpu.memory_space<semaphore_mem>> -> memref<!tpu.dma_semaphore, #tpu.memory_space<semaphore_mem>>
    tpu.enqueue_dma source(%arg11 : memref<256x256xbf16, #tpu.memory_space<any>>) target(%arg18 : memref<256x256xbf16, #tpu.memory_space<vmem>>) target_semaphore(%1 : memref<!tpu.dma_semaphore, #tpu.memory_space<semaphore_mem>>)
    %c1_i32 = arith.constant 1 : i32
    %2 = tpu.memref_slice %arg21[%c1_i32] : memref<3x!tpu.dma_semaphore, #tpu.memory_space<semaphore_mem>> -> memref<1x!tpu.dma_semaphore, #tpu.memory_space<semaphore_mem>>
    %3 = tpu.memref_squeeze %2 : memref<1x!tpu.dma_semaphore, #tpu.memory_space<semaphore_mem>> -> memref<!tpu.dma_semaphore, #tpu.memory_space<semaphore_mem>>
    tpu.enqueue_dma source(%arg12 : memref<256x512xbf16, #tpu.memory_space<any>>) target(%arg19 : memref<256x512xbf16, #tpu.memory_space<vmem>>) target_semaphore(%3 : memref<!tpu.dma_semaphore, #tpu.memory_space<semaphore_mem>>)
    %c2_i32 = arith.constant 2 : i32
    %4 = tpu.memref_slice %arg21[%c2_i32] : memref<3x!tpu.dma_semaphore, #tpu.memory_space<semaphore_mem>> -> memref<1x!tpu.dma_semaphore, #tpu.memory_space<semaphore_mem>>
    %5 = tpu.memref_squeeze %4 : memref<1x!tpu.dma_semaphore, #tpu.memory_space<semaphore_mem>> -> memref<!tpu.dma_semaphore, #tpu.memory_space<semaphore_mem>>
    tpu.enqueue_dma source(%arg13 : memref<256x64xbf16, #tpu.memory_space<any>>) target(%arg20 : memref<256x64xbf16, #tpu.memory_space<vmem>>) target_semaphore(%5 : memref<!tpu.dma_semaphore, #tpu.memory_space<semaphore_mem>>)
    %c0 = arith.constant 0 : index
    %c0_0 = arith.constant 0 : index
    %6 = vector.load %arg2[%c0, %c0_0] : memref<16x256xf32, #tpu.memory_space<vmem>>, vector<16x256xf32>
    %c0_1 = arith.constant 0 : index
    %c0_2 = arith.constant 0 : index
    %7 = vector.load %arg3[%c0_1, %c0_2] : memref<16x256xf32, #tpu.memory_space<vmem>>, vector<16x256xf32>
    %c0_3 = arith.constant 0 : index
    %c0_4 = arith.constant 0 : index
    %8 = vector.load %arg4[%c0_3, %c0_4] : memref<16x256xf32, #tpu.memory_space<vmem>>, vector<16x256xf32>
    %9 = arith.truncf %6 : vector<16x256xf32> to vector<16x256xbf16>
    %10 = arith.truncf %7 : vector<16x256xf32> to vector<16x256xbf16>
    %11 = arith.truncf %8 : vector<16x256xf32> to vector<16x256xbf16>
    %c0_5 = arith.constant 0 : index
    %c0_6 = arith.constant 0 : index
    %12 = vector.load %arg7[%c0_5, %c0_6] : memref<256x1536xbf16, #tpu.memory_space<vmem>>, vector<256x1536xbf16>
    %cst = arith.constant dense<0.000000e+00> : vector<16x1536xf32>
    %13 = tpu.matmul %11, %12, %cst {dimension_numbers = #tpu.dot_dimension_numbers<[1], [0], [0], [1], [0, 0, 1, 1], [], []>} : vector<16x256xbf16>, vector<256x1536xbf16>, vector<16x1536xf32> -> vector<16x1536xf32>
    %c0_7 = arith.constant 0 : index
    %c0_8 = arith.constant 0 : index
    %14 = vector.load %arg5[%c0_7, %c0_8] : memref<256x768xbf16, #tpu.memory_space<vmem>>, vector<256x768xbf16>
    %cst_9 = arith.constant dense<0.000000e+00> : vector<16x768xf32>
    %15 = tpu.matmul %9, %14, %cst_9 {dimension_numbers = #tpu.dot_dimension_numbers<[1], [0], [0], [1], [0, 0, 1, 1], [], []>} : vector<16x256xbf16>, vector<256x768xbf16>, vector<16x768xf32> -> vector<16x768xf32>
    %16 = vector.extract_strided_slice %13 {offsets = [0, 0], sizes = [16, 768], strides = [1, 1]} : vector<16x1536xf32> to vector<16x768xf32>
    %17 = arith.addf %15, %16 : vector<16x768xf32>
    %c0_10 = arith.constant 0 : index
    %c0_11 = arith.constant 0 : index
    %18 = vector.load %arg8[%c0_10, %c0_11] : memref<1x768xf32, #tpu.memory_space<vmem>>, vector<1x768xf32>
    %19 = vector.broadcast %18 : vector<1x768xf32> to vector<16x768xf32>
    %20 = arith.addf %17, %19 : vector<16x768xf32>
    %c0_12 = arith.constant 0 : index
    %c0_13 = arith.constant 0 : index
    %21 = vector.load %arg6[%c0_12, %c0_13] : memref<256x768xbf16, #tpu.memory_space<vmem>>, vector<256x768xbf16>
    %cst_14 = arith.constant dense<0.000000e+00> : vector<16x768xf32>
    %22 = tpu.matmul %10, %21, %cst_14 {dimension_numbers = #tpu.dot_dimension_numbers<[1], [0], [0], [1], [0, 0, 1, 1], [], []>} : vector<16x256xbf16>, vector<256x768xbf16>, vector<16x768xf32> -> vector<16x768xf32>
    %23 = vector.extract_strided_slice %13 {offsets = [0, 768], sizes = [16, 768], strides = [1, 1]} : vector<16x1536xf32> to vector<16x768xf32>
    %24 = arith.addf %22, %23 : vector<16x768xf32>
    %c0_15 = arith.constant 0 : index
    %c0_16 = arith.constant 0 : index
    %25 = vector.load %arg9[%c0_15, %c0_16] : memref<1x768xf32, #tpu.memory_space<vmem>>, vector<1x768xf32>
    %26 = vector.broadcast %25 : vector<1x768xf32> to vector<16x768xf32>
    %27 = arith.addf %24, %26 : vector<16x768xf32>
    %c0_17 = arith.constant 0 : index
    %c0_18 = arith.constant 0 : index
    %28 = vector.load %arg10[%c0_17, %c0_18] : memref<8x256xf32, #tpu.memory_space<vmem>>, vector<8x256xf32>
    %29 = vector.extract_strided_slice %28 {offsets = [0, 0], sizes = [1, 256], strides = [1, 1]} : vector<8x256xf32> to vector<1x256xf32>
    %30 = vector.extract_strided_slice %28 {offsets = [1, 0], sizes = [1, 256], strides = [1, 1]} : vector<8x256xf32> to vector<1x256xf32>
    %c4 = arith.constant 4 : index
    %31 = memref.load %arg1[%c4] : memref<16xf32, #tpu.memory_space<smem>>
    %32 = vector.broadcast %29 : vector<1x256xf32> to vector<16x256xf32>
    %33 = arith.mulf %6, %32 : vector<16x256xf32>
    %cst_19 = arith.constant dense<0.000000e+00> : vector<16xf32>
    %34 = vector.multi_reduction <add>, %33, %cst_19 [1] : vector<16x256xf32> to vector<16xf32>
    %35 = vector.shape_cast %34 : vector<16xf32> to vector<16x1xf32>
    %36 = vector.broadcast %30 : vector<1x256xf32> to vector<16x256xf32>
    %37 = arith.mulf %8, %36 : vector<16x256xf32>
    %cst_20 = arith.constant dense<0.000000e+00> : vector<16xf32>
    %38 = vector.multi_reduction <add>, %37, %cst_20 [1] : vector<16x256xf32> to vector<16xf32>
    %39 = vector.shape_cast %38 : vector<16xf32> to vector<16x1xf32>
    %40 = arith.addf %35, %39 : vector<16x1xf32>
    %41 = vector.broadcast %31 : f32 to vector<16x1xf32>
    %42 = arith.addf %40, %41 : vector<16x1xf32>
    %43 = arith.negf %42 : vector<16x1xf32>
    %44 = math.exp %43 : vector<16x1xf32>
    %cst_21 = arith.constant 1.000000e+00 : f32
    %45 = vector.broadcast %cst_21 : f32 to vector<16x1xf32>
    %46 = arith.addf %45, %44 : vector<16x1xf32>
    %47 = arith.divf %45, %46 : vector<16x1xf32>
    %48 = vector.shape_cast %47 : vector<16x1xf32> to vector<2x8x1xf32>
    %49 = vector.extract_strided_slice %20 {offsets = [0, 0], sizes = [16, 256], strides = [1, 1]} : vector<16x768xf32> to vector<16x256xf32>
    %50 = vector.shape_cast %49 : vector<16x256xf32> to vector<2x8x256xf32>
    %51 = vector.extract_strided_slice %20 {offsets = [0, 256], sizes = [16, 256], strides = [1, 1]} : vector<16x768xf32> to vector<16x256xf32>
    %52 = vector.shape_cast %51 : vector<16x256xf32> to vector<2x8x256xf32>
    %53 = vector.extract_strided_slice %20 {offsets = [0, 512], sizes = [16, 256], strides = [1, 1]} : vector<16x768xf32> to vector<16x256xf32>
    %54 = vector.shape_cast %53 : vector<16x256xf32> to vector<2x8x256xf32>
    "tpu.trace_start"() <{level = 10 : i32, message = "bqd,bkd->bqk"}> : () -> ()
    %cst_22 = arith.constant dense<0.000000e+00> : vector<2x8x8xf32>
    %55 = tpu.matmul %50, %52, %cst_22 {dimension_numbers = #tpu.dot_dimension_numbers<[2], [2], [1], [1], [0, 0, 0, 1, 1, 1], [0], [0]>} : vector<2x8x256xf32>, vector<2x8x256xf32>, vector<2x8x8xf32> -> vector<2x8x8xf32>
    "tpu.trace_stop"() : () -> ()
    %cst_23 = arith.constant 6.250000e-02 : f32
    %56 = vector.broadcast %cst_23 : f32 to vector<2x8x8xf32>
    %57 = arith.mulf %55, %56 : vector<2x8x8xf32>
    %cst_24 = arith.constant dense<0xFF800000> : vector<2x8xf32>
    %58 = vector.multi_reduction <maximumf>, %57, %cst_24 [2] : vector<2x8x8xf32> to vector<2x8xf32>
    %cst_25 = arith.constant 0xFF800000 : f32
    %59 = vector.broadcast %cst_25 : f32 to vector<2x8xf32>
    %60 = arith.maximumf %59, %58 : vector<2x8xf32>
    %61 = vector.shape_cast %60 : vector<2x8xf32> to vector<2x8x1xf32>
    %62 = vector.broadcast %61 : vector<2x8x1xf32> to vector<2x8x8xf32>
    %63 = arith.subf %57, %62 : vector<2x8x8xf32>
    %64 = math.exp %63 : vector<2x8x8xf32>
    %cst_26 = arith.constant dense<0.000000e+00> : vector<2x8xf32>
    %65 = vector.multi_reduction <add>, %64, %cst_26 [2] : vector<2x8x8xf32> to vector<2x8xf32>
    %66 = vector.shape_cast %65 : vector<2x8xf32> to vector<2x8x1xf32>
    %67 = vector.broadcast %66 : vector<2x8x1xf32> to vector<2x8x8xf32>
    %68 = arith.divf %64, %67 : vector<2x8x8xf32>
    %69 = vector.broadcast %48 : vector<2x8x1xf32> to vector<2x8x8xf32>
    %70 = arith.mulf %68, %69 : vector<2x8x8xf32>
    "tpu.trace_start"() <{level = 10 : i32, message = "bqk,bkd->bqd"}> : () -> ()
    %cst_27 = arith.constant dense<0.000000e+00> : vector<2x8x256xf32>
    %71 = tpu.matmul %70, %54, %cst_27 {dimension_numbers = #tpu.dot_dimension_numbers<[2], [1], [1], [2], [0, 0, 0, 1, 1, 2], [0], [0]>} : vector<2x8x8xf32>, vector<2x8x256xf32>, vector<2x8x256xf32> -> vector<2x8x256xf32>
    "tpu.trace_stop"() : () -> ()
    %72 = vector.shape_cast %6 : vector<16x256xf32> to vector<2x8x256xf32>
    %73 = arith.addf %71, %72 : vector<2x8x256xf32>
    %74 = vector.shape_cast %73 : vector<2x8x256xf32> to vector<16x256xf32>
    %cst_28 = arith.constant dense<0.000000e+00> : vector<2x8xf32>
    %75 = vector.multi_reduction <add>, %70, %cst_28 [1] : vector<2x8x8xf32> to vector<2x8xf32>
    %cst_29 = arith.constant 8.000000e+00 : f32
    %76 = vector.broadcast %cst_29 : f32 to vector<2x8xf32>
    %77 = arith.divf %75, %76 : vector<2x8xf32>
    %78 = vector.extract_strided_slice %28 {offsets = [2, 0], sizes = [1, 256], strides = [1, 1]} : vector<8x256xf32> to vector<1x256xf32>
    %79 = vector.extract_strided_slice %28 {offsets = [3, 0], sizes = [1, 256], strides = [1, 1]} : vector<8x256xf32> to vector<1x256xf32>
    %c5 = arith.constant 5 : index
    %80 = memref.load %arg1[%c5] : memref<16xf32, #tpu.memory_space<smem>>
    %81 = vector.broadcast %78 : vector<1x256xf32> to vector<16x256xf32>
    %82 = arith.mulf %7, %81 : vector<16x256xf32>
    %cst_30 = arith.constant dense<0.000000e+00> : vector<16xf32>
    %83 = vector.multi_reduction <add>, %82, %cst_30 [1] : vector<16x256xf32> to vector<16xf32>
    %84 = vector.shape_cast %83 : vector<16xf32> to vector<16x1xf32>
    %85 = vector.broadcast %79 : vector<1x256xf32> to vector<16x256xf32>
    %86 = arith.mulf %8, %85 : vector<16x256xf32>
    %cst_31 = arith.constant dense<0.000000e+00> : vector<16xf32>
    %87 = vector.multi_reduction <add>, %86, %cst_31 [1] : vector<16x256xf32> to vector<16xf32>
    %88 = vector.shape_cast %87 : vector<16xf32> to vector<16x1xf32>
    %89 = arith.addf %84, %88 : vector<16x1xf32>
    %90 = vector.broadcast %80 : f32 to vector<16x1xf32>
    %91 = arith.addf %89, %90 : vector<16x1xf32>
    %92 = arith.negf %91 : vector<16x1xf32>
    %93 = math.exp %92 : vector<16x1xf32>
    %cst_32 = arith.constant 1.000000e+00 : f32
    %94 = vector.broadcast %cst_32 : f32 to vector<16x1xf32>
    %95 = arith.addf %94, %93 : vector<16x1xf32>
    %96 = arith.divf %94, %95 : vector<16x1xf32>
    %97 = vector.shape_cast %96 : vector<16x1xf32> to vector<2x8x1xf32>
    %98 = vector.extract_strided_slice %27 {offsets = [0, 0], sizes = [16, 256], strides = [1, 1]} : vector<16x768xf32> to vector<16x256xf32>
    %99 = vector.shape_cast %98 : vector<16x256xf32> to vector<2x8x256xf32>
    %100 = vector.extract_strided_slice %27 {offsets = [0, 256], sizes = [16, 256], strides = [1, 1]} : vector<16x768xf32> to vector<16x256xf32>
    %101 = vector.shape_cast %100 : vector<16x256xf32> to vector<2x8x256xf32>
    %102 = vector.extract_strided_slice %27 {offsets = [0, 512], sizes = [16, 256], strides = [1, 1]} : vector<16x768xf32> to vector<16x256xf32>
    %103 = vector.shape_cast %102 : vector<16x256xf32> to vector<2x8x256xf32>
    "tpu.trace_start"() <{level = 10 : i32, message = "bqd,bkd->bqk"}> : () -> ()
    %cst_33 = arith.constant dense<0.000000e+00> : vector<2x8x8xf32>
    %104 = tpu.matmul %99, %101, %cst_33 {dimension_numbers = #tpu.dot_dimension_numbers<[2], [2], [1], [1], [0, 0, 0, 1, 1, 1], [0], [0]>} : vector<2x8x256xf32>, vector<2x8x256xf32>, vector<2x8x8xf32> -> vector<2x8x8xf32>
    "tpu.trace_stop"() : () -> ()
    %cst_34 = arith.constant 6.250000e-02 : f32
    %105 = vector.broadcast %cst_34 : f32 to vector<2x8x8xf32>
    %106 = arith.mulf %104, %105 : vector<2x8x8xf32>
    %cst_35 = arith.constant dense<0xFF800000> : vector<2x8xf32>
    %107 = vector.multi_reduction <maximumf>, %106, %cst_35 [2] : vector<2x8x8xf32> to vector<2x8xf32>
    %cst_36 = arith.constant 0xFF800000 : f32
    %108 = vector.broadcast %cst_36 : f32 to vector<2x8xf32>
    %109 = arith.maximumf %108, %107 : vector<2x8xf32>
    %110 = vector.shape_cast %109 : vector<2x8xf32> to vector<2x8x1xf32>
    %111 = vector.broadcast %110 : vector<2x8x1xf32> to vector<2x8x8xf32>
    %112 = arith.subf %106, %111 : vector<2x8x8xf32>
    %113 = math.exp %112 : vector<2x8x8xf32>
    %cst_37 = arith.constant dense<0.000000e+00> : vector<2x8xf32>
    %114 = vector.multi_reduction <add>, %113, %cst_37 [2] : vector<2x8x8xf32> to vector<2x8xf32>
    %115 = vector.shape_cast %114 : vector<2x8xf32> to vector<2x8x1xf32>
    %116 = vector.broadcast %115 : vector<2x8x1xf32> to vector<2x8x8xf32>
    %117 = arith.divf %113, %116 : vector<2x8x8xf32>
    %118 = vector.broadcast %97 : vector<2x8x1xf32> to vector<2x8x8xf32>
    %119 = arith.mulf %117, %118 : vector<2x8x8xf32>
    "tpu.trace_start"() <{level = 10 : i32, message = "bqk,bkd->bqd"}> : () -> ()
    %cst_38 = arith.constant dense<0.000000e+00> : vector<2x8x256xf32>
    %120 = tpu.matmul %119, %103, %cst_38 {dimension_numbers = #tpu.dot_dimension_numbers<[2], [1], [1], [2], [0, 0, 0, 1, 1, 2], [0], [0]>} : vector<2x8x8xf32>, vector<2x8x256xf32>, vector<2x8x256xf32> -> vector<2x8x256xf32>
    "tpu.trace_stop"() : () -> ()
    %121 = vector.shape_cast %7 : vector<16x256xf32> to vector<2x8x256xf32>
    %122 = arith.addf %120, %121 : vector<2x8x256xf32>
    %123 = vector.shape_cast %122 : vector<2x8x256xf32> to vector<16x256xf32>
    %cst_39 = arith.constant dense<0.000000e+00> : vector<2x8xf32>
    %124 = vector.multi_reduction <add>, %119, %cst_39 [1] : vector<2x8x8xf32> to vector<2x8xf32>
    %cst_40 = arith.constant 8.000000e+00 : f32
    %125 = vector.broadcast %cst_40 : f32 to vector<2x8xf32>
    %126 = arith.divf %124, %125 : vector<2x8xf32>
    %cst_41 = arith.constant 6.500000e-01 : f32
    %127 = vector.broadcast %cst_41 : f32 to vector<2x8xf32>
    %128 = arith.mulf %127, %77 : vector<2x8xf32>
    %cst_42 = arith.constant 3.500000e-01 : f32
    %129 = vector.broadcast %cst_42 : f32 to vector<2x8xf32>
    %130 = arith.mulf %129, %126 : vector<2x8xf32>
    %131 = arith.addf %128, %130 : vector<2x8xf32>
    %cst_43 = arith.constant dense<0xFF800000> : vector<2xf32>
    %132 = vector.multi_reduction <maximumf>, %131, %cst_43 [1] : vector<2x8xf32> to vector<2xf32>
    %cst_44 = arith.constant 0xFF800000 : f32
    %133 = vector.broadcast %cst_44 : f32 to vector<2xf32>
    %134 = arith.maximumf %133, %132 : vector<2xf32>
    %135 = vector.shape_cast %134 : vector<2xf32> to vector<2x1xf32>
    %136 = vector.broadcast %135 : vector<2x1xf32> to vector<2x8xf32>
    %137 = arith.subf %131, %136 : vector<2x8xf32>
    %138 = math.exp %137 : vector<2x8xf32>
    %cst_45 = arith.constant dense<0.000000e+00> : vector<2xf32>
    %139 = vector.multi_reduction <add>, %138, %cst_45 [1] : vector<2x8xf32> to vector<2xf32>
    %140 = vector.shape_cast %139 : vector<2xf32> to vector<2x1xf32>
    %141 = vector.broadcast %140 : vector<2x1xf32> to vector<2x8xf32>
    %142 = arith.divf %138, %141 : vector<2x8xf32>
    %c0_i32_46 = arith.constant 0 : i32
    %143 = tpu.memref_slice %arg21[%c0_i32_46] : memref<3x!tpu.dma_semaphore, #tpu.memory_space<semaphore_mem>> -> memref<1x!tpu.dma_semaphore, #tpu.memory_space<semaphore_mem>>
    %144 = tpu.memref_squeeze %143 : memref<1x!tpu.dma_semaphore, #tpu.memory_space<semaphore_mem>> -> memref<!tpu.dma_semaphore, #tpu.memory_space<semaphore_mem>>
    tpu.wait_dma2 semaphore(%144 : memref<!tpu.dma_semaphore, #tpu.memory_space<semaphore_mem>>) src(%arg11 : memref<256x256xbf16, #tpu.memory_space<any>>) dst(%arg18 : memref<256x256xbf16, #tpu.memory_space<vmem>>)
    %c1_i32_47 = arith.constant 1 : i32
    %145 = tpu.memref_slice %arg21[%c1_i32_47] : memref<3x!tpu.dma_semaphore, #tpu.memory_space<semaphore_mem>> -> memref<1x!tpu.dma_semaphore, #tpu.memory_space<semaphore_mem>>
    %146 = tpu.memref_squeeze %145 : memref<1x!tpu.dma_semaphore, #tpu.memory_space<semaphore_mem>> -> memref<!tpu.dma_semaphore, #tpu.memory_space<semaphore_mem>>
    tpu.wait_dma2 semaphore(%146 : memref<!tpu.dma_semaphore, #tpu.memory_space<semaphore_mem>>) src(%arg12 : memref<256x512xbf16, #tpu.memory_space<any>>) dst(%arg19 : memref<256x512xbf16, #tpu.memory_space<vmem>>)
    %c2_i32_48 = arith.constant 2 : i32
    %147 = tpu.memref_slice %arg21[%c2_i32_48] : memref<3x!tpu.dma_semaphore, #tpu.memory_space<semaphore_mem>> -> memref<1x!tpu.dma_semaphore, #tpu.memory_space<semaphore_mem>>
    %148 = tpu.memref_squeeze %147 : memref<1x!tpu.dma_semaphore, #tpu.memory_space<semaphore_mem>> -> memref<!tpu.dma_semaphore, #tpu.memory_space<semaphore_mem>>
    tpu.wait_dma2 semaphore(%148 : memref<!tpu.dma_semaphore, #tpu.memory_space<semaphore_mem>>) src(%arg13 : memref<256x64xbf16, #tpu.memory_space<any>>) dst(%arg20 : memref<256x64xbf16, #tpu.memory_space<vmem>>)
    %149 = arith.truncf %74 : vector<16x256xf32> to vector<16x256xbf16>
    %150 = arith.truncf %123 : vector<16x256xf32> to vector<16x256xbf16>
    %c0_49 = arith.constant 0 : index
    %c0_50 = arith.constant 0 : index
    %151 = vector.load %arg19[%c0_49, %c0_50] : memref<256x512xbf16, #tpu.memory_space<vmem>>, vector<256x512xbf16>
    %cst_51 = arith.constant dense<0.000000e+00> : vector<16x512xf32>
    %152 = tpu.matmul %150, %151, %cst_51 {dimension_numbers = #tpu.dot_dimension_numbers<[1], [0], [0], [1], [0, 0, 1, 1], [], []>} : vector<16x256xbf16>, vector<256x512xbf16>, vector<16x512xf32> -> vector<16x512xf32>
    %c0_52 = arith.constant 0 : index
    %c0_53 = arith.constant 0 : index
    %153 = vector.load %arg14[%c0_52, %c0_53] : memref<1x512xf32, #tpu.memory_space<vmem>>, vector<1x512xf32>
    %154 = vector.broadcast %153 : vector<1x512xf32> to vector<16x512xf32>
    %155 = arith.addf %152, %154 : vector<16x512xf32>
    %156 = vector.extract_strided_slice %155 {offsets = [0, 0], sizes = [16, 256], strides = [1, 1]} : vector<16x512xf32> to vector<16x256xf32>
    %157 = arith.addf %74, %156 : vector<16x256xf32>
    %c0_54 = arith.constant 0 : index
    %c0_55 = arith.constant 0 : index
    %158 = vector.load %arg18[%c0_54, %c0_55] : memref<256x256xbf16, #tpu.memory_space<vmem>>, vector<256x256xbf16>
    %cst_56 = arith.constant dense<0.000000e+00> : vector<16x256xf32>
    %159 = tpu.matmul %149, %158, %cst_56 {dimension_numbers = #tpu.dot_dimension_numbers<[1], [0], [0], [1], [0, 0, 1, 1], [], []>} : vector<16x256xbf16>, vector<256x256xbf16>, vector<16x256xf32> -> vector<16x256xf32>
    %160 = vector.extract_strided_slice %155 {offsets = [0, 256], sizes = [16, 256], strides = [1, 1]} : vector<16x512xf32> to vector<16x256xf32>
    %161 = arith.addf %159, %160 : vector<16x256xf32>
    %162 = arith.mulf %74, %123 : vector<16x256xf32>
    %163 = vector.extract_strided_slice %28 {offsets = [6, 0], sizes = [1, 256], strides = [1, 1]} : vector<8x256xf32> to vector<1x256xf32>
    %164 = vector.extract_strided_slice %28 {offsets = [7, 0], sizes = [1, 256], strides = [1, 1]} : vector<8x256xf32> to vector<1x256xf32>
    %cst_57 = arith.constant dense<0.000000e+00> : vector<16xf32>
    %165 = vector.multi_reduction <add>, %162, %cst_57 [1] : vector<16x256xf32> to vector<16xf32>
    %166 = vector.shape_cast %165 : vector<16xf32> to vector<16x1xf32>
    %cst_58 = arith.constant 2.560000e+02 : f32
    %167 = vector.broadcast %cst_58 : f32 to vector<16x1xf32>
    %168 = arith.divf %166, %167 : vector<16x1xf32>
    %169 = vector.broadcast %168 : vector<16x1xf32> to vector<16x256xf32>
    %170 = arith.subf %162, %169 : vector<16x256xf32>
    %171 = arith.mulf %170, %170 : vector<16x256xf32>
    %cst_59 = arith.constant dense<0.000000e+00> : vector<16xf32>
    %172 = vector.multi_reduction <add>, %171, %cst_59 [1] : vector<16x256xf32> to vector<16xf32>
    %173 = vector.shape_cast %172 : vector<16xf32> to vector<16x1xf32>
    %cst_60 = arith.constant 2.560000e+02 : f32
    %174 = vector.broadcast %cst_60 : f32 to vector<16x1xf32>
    %175 = arith.divf %173, %174 : vector<16x1xf32>
    %176 = vector.broadcast %168 : vector<16x1xf32> to vector<16x256xf32>
    %177 = arith.subf %162, %176 : vector<16x256xf32>
    %cst_61 = arith.constant 9.99999974E-6 : f32
    %178 = vector.broadcast %cst_61 : f32 to vector<16x1xf32>
    %179 = arith.addf %175, %178 : vector<16x1xf32>
    %180 = math.rsqrt %179 : vector<16x1xf32>
    %181 = vector.broadcast %180 : vector<16x1xf32> to vector<16x256xf32>
    %182 = arith.mulf %177, %181 : vector<16x256xf32>
    %183 = vector.broadcast %163 : vector<1x256xf32> to vector<16x256xf32>
    %184 = arith.mulf %182, %183 : vector<16x256xf32>
    %185 = vector.broadcast %164 : vector<1x256xf32> to vector<16x256xf32>
    %186 = arith.addf %184, %185 : vector<16x256xf32>
    %187 = vector.extract_strided_slice %28 {offsets = [4, 0], sizes = [1, 256], strides = [1, 1]} : vector<8x256xf32> to vector<1x256xf32>
    %188 = vector.broadcast %187 : vector<1x256xf32> to vector<16x256xf32>
    %189 = arith.mulf %123, %188 : vector<16x256xf32>
    %cst_62 = arith.constant dense<0.000000e+00> : vector<16xf32>
    %190 = vector.multi_reduction <add>, %189, %cst_62 [1] : vector<16x256xf32> to vector<16xf32>
    %191 = vector.shape_cast %190 : vector<16xf32> to vector<16x1xf32>
    %c6 = arith.constant 6 : index
    %192 = memref.load %arg1[%c6] : memref<16xf32, #tpu.memory_space<smem>>
    %193 = vector.broadcast %192 : f32 to vector<16x1xf32>
    %194 = arith.addf %191, %193 : vector<16x1xf32>
    %195 = vector.extract_strided_slice %28 {offsets = [5, 0], sizes = [1, 256], strides = [1, 1]} : vector<8x256xf32> to vector<1x256xf32>
    %196 = vector.broadcast %195 : vector<1x256xf32> to vector<16x256xf32>
    %197 = arith.mulf %123, %196 : vector<16x256xf32>
    %cst_63 = arith.constant dense<0.000000e+00> : vector<16xf32>
    %198 = vector.multi_reduction <add>, %197, %cst_63 [1] : vector<16x256xf32> to vector<16xf32>
    %199 = vector.shape_cast %198 : vector<16xf32> to vector<16x1xf32>
    %c7 = arith.constant 7 : index
    %200 = memref.load %arg1[%c7] : memref<16xf32, #tpu.memory_space<smem>>
    %201 = vector.broadcast %200 : f32 to vector<16x1xf32>
    %202 = arith.addf %199, %201 : vector<16x1xf32>
    %203 = math.absf %194 : vector<16x1xf32>
    %204 = vector.broadcast %203 : vector<16x1xf32> to vector<16x256xf32>
    %205 = arith.mulf %204, %74 : vector<16x256xf32>
    %206 = vector.broadcast %202 : vector<16x1xf32> to vector<16x256xf32>
    %207 = arith.addf %205, %206 : vector<16x256xf32>
    %c0_64 = arith.constant 0 : index
    %208 = memref.load %arg1[%c0_64] : memref<16xf32, #tpu.memory_space<smem>>
    %209 = vector.broadcast %208 : f32 to vector<16x256xf32>
    %210 = arith.mulf %209, %161 : vector<16x256xf32>
    %c1 = arith.constant 1 : index
    %211 = memref.load %arg1[%c1] : memref<16xf32, #tpu.memory_space<smem>>
    %212 = vector.broadcast %211 : f32 to vector<16x256xf32>
    %213 = arith.mulf %212, %157 : vector<16x256xf32>
    %214 = arith.addf %210, %213 : vector<16x256xf32>
    %c2 = arith.constant 2 : index
    %215 = memref.load %arg1[%c2] : memref<16xf32, #tpu.memory_space<smem>>
    %216 = vector.broadcast %215 : f32 to vector<16x256xf32>
    %217 = arith.mulf %216, %186 : vector<16x256xf32>
    %218 = arith.addf %214, %217 : vector<16x256xf32>
    %c3 = arith.constant 3 : index
    %219 = memref.load %arg1[%c3] : memref<16xf32, #tpu.memory_space<smem>>
    %220 = vector.broadcast %219 : f32 to vector<16x256xf32>
    %221 = arith.mulf %220, %207 : vector<16x256xf32>
    %222 = arith.addf %218, %221 : vector<16x256xf32>
    %223 = arith.truncf %222 : vector<16x256xf32> to vector<16x256xbf16>
    %c0_65 = arith.constant 0 : index
    %c0_66 = arith.constant 0 : index
    %224 = vector.load %arg20[%c0_65, %c0_66] : memref<256x64xbf16, #tpu.memory_space<vmem>>, vector<256x64xbf16>
    %cst_67 = arith.constant dense<0.000000e+00> : vector<16x64xf32>
    %225 = tpu.matmul %223, %224, %cst_67 {dimension_numbers = #tpu.dot_dimension_numbers<[1], [0], [0], [1], [0, 0, 1, 1], [], []>} : vector<16x256xbf16>, vector<256x64xbf16>, vector<16x64xf32> -> vector<16x64xf32>
    %c0_68 = arith.constant 0 : index
    %c0_69 = arith.constant 0 : index
    %226 = vector.load %arg15[%c0_68, %c0_69] : memref<1x64xf32, #tpu.memory_space<vmem>>, vector<1x64xf32>
    %227 = vector.broadcast %226 : vector<1x64xf32> to vector<16x64xf32>
    %228 = arith.addf %225, %227 : vector<16x64xf32>
    %cst_70 = arith.constant 5.000000e-01 : f32
    %229 = vector.broadcast %cst_70 : f32 to vector<16x64xf32>
    %230 = arith.mulf %229, %228 : vector<16x64xf32>
    %cst_71 = arith.constant 0.707106769 : f32
    %231 = vector.broadcast %cst_71 : f32 to vector<16x64xf32>
    %232 = arith.mulf %228, %231 : vector<16x64xf32>
    %233 = math.erf %232 : vector<16x64xf32>
    %cst_72 = arith.constant 1.000000e+00 : f32
    %234 = vector.broadcast %cst_72 : f32 to vector<16x64xf32>
    %235 = arith.addf %234, %233 : vector<16x64xf32>
    %236 = arith.mulf %230, %235 : vector<16x64xf32>
    %237 = vector.shape_cast %142 : vector<2x8xf32> to vector<2x8x1xf32>
    %238 = vector.shape_cast %236 : vector<16x64xf32> to vector<2x8x64xf32>
    %239 = vector.broadcast %237 : vector<2x8x1xf32> to vector<2x8x64xf32>
    %240 = arith.mulf %239, %238 : vector<2x8x64xf32>
    %cst_73 = arith.constant dense<0.000000e+00> : vector<2x64xf32>
    %241 = vector.multi_reduction <add>, %240, %cst_73 [1] : vector<2x8x64xf32> to vector<2x64xf32>
    %c0_74 = arith.constant 0 : index
    %c0_75 = arith.constant 0 : index
    %242 = vector.load %arg16[%c0_74, %c0_75] : memref<1x64xf32, #tpu.memory_space<vmem>>, vector<1x64xf32>
    %243 = vector.broadcast %242 : vector<1x64xf32> to vector<2x64xf32>
    %244 = arith.mulf %241, %243 : vector<2x64xf32>
    %cst_76 = arith.constant dense<0.000000e+00> : vector<2xf32>
    %245 = vector.multi_reduction <add>, %244, %cst_76 [1] : vector<2x64xf32> to vector<2xf32>
    %246 = vector.shape_cast %245 : vector<2xf32> to vector<2x1xf32>
    %c8 = arith.constant 8 : index
    %247 = memref.load %arg1[%c8] : memref<16xf32, #tpu.memory_space<smem>>
    %248 = vector.broadcast %247 : f32 to vector<2x1xf32>
    %249 = arith.addf %246, %248 : vector<2x1xf32>
    %cst_77 = arith.constant 1.250000e-01 : f32
    %250 = vector.broadcast %cst_77 : f32 to vector<2x1xf32>
    %251 = arith.mulf %249, %250 : vector<2x1xf32>
    %252 = vector.shape_cast %251 : vector<2x1xf32> to vector<2x1xf32>
    %253 = vector.broadcast %252 : vector<2x1xf32> to vector<2x128xf32>
    %c0_78 = arith.constant 0 : index
    %c0_79 = arith.constant 0 : index
    %254 = vector.load %arg17[%c0_78, %c0_79] : memref<2x128xf32, #tpu.memory_space<vmem>>, vector<2x128xf32>
    tpu.vector_store %arg17[%c0_78, %c0_79], %253 {strides = array<i32>} : memref<2x128xf32, #tpu.memory_space<vmem>>, vector<2x128xf32>,
    return
  }
  func.func @transform_0(%arg0: i32) -> i32 {
    %c0_i32 = arith.constant 0 : i32
    %c0_i32_0 = arith.constant 0 : i32
    return %c0_i32 : i32
  }
  func.func @transform_1(%arg0: i32) -> (i32, i32) {
    %c0_i32 = arith.constant 0 : i32
    %c0_i32_0 = arith.constant 0 : i32
    %c0_i32_1 = arith.constant 0 : i32
    return %c0_i32, %c0_i32_0 : i32, i32
  }
  func.func @transform_2(%arg0: i32) -> (i32, i32) {
    %c0_i32 = arith.constant 0 : i32
    %c0_i32_0 = arith.constant 0 : i32
    %c0_i32_1 = arith.constant 0 : i32
    return %c0_i32, %c0_i32_0 : i32, i32
  }
  func.func @transform_3(%arg0: i32) -> (i32, i32) {
    %c0_i32 = arith.constant 0 : i32
    %c0_i32_0 = arith.constant 0 : i32
    %c0_i32_1 = arith.constant 0 : i32
    return %c0_i32, %c0_i32_0 : i32, i32
  }
  func.func @transform_4(%arg0: i32) -> (i32, i32) {
    %c0_i32 = arith.constant 0 : i32
    %c0_i32_0 = arith.constant 0 : i32
    %c0_i32_1 = arith.constant 0 : i32
    return %c0_i32, %c0_i32_0 : i32, i32
  }
  func.func @transform_5(%arg0: i32) -> (i32, i32) {
    %c0_i32 = arith.constant 0 : i32
    %c0_i32_0 = arith.constant 0 : i32
    %c0_i32_1 = arith.constant 0 : i32
    return %c0_i32, %c0_i32_0 : i32, i32
  }
  func.func @transform_6(%arg0: i32) -> (i32, i32) {
    %c0_i32 = arith.constant 0 : i32
    %c0_i32_0 = arith.constant 0 : i32
    %c0_i32_1 = arith.constant 0 : i32
    return %c0_i32, %c0_i32_0 : i32, i32
  }
  func.func @transform_7(%arg0: i32) -> (i32, i32) {
    %c0_i32 = arith.constant 0 : i32
    %c0_i32_0 = arith.constant 0 : i32
    %c0_i32_1 = arith.constant 0 : i32
    return %c0_i32, %c0_i32_0 : i32, i32
  }
  func.func @transform_8(%arg0: i32) -> (i32, i32) {
    %c0_i32 = arith.constant 0 : i32
    %c0_i32_0 = arith.constant 0 : i32
    %c0_i32_1 = arith.constant 0 : i32
    return %c0_i32, %c0_i32_0 : i32, i32
  }
  func.func @transform_9(%arg0: i32) -> (i32, i32) {
    %c0_i32 = arith.constant 0 : i32
    %c0_i32_0 = arith.constant 0 : i32
    %c0_i32_1 = arith.constant 0 : i32
    return %c0_i32, %c0_i32_0 : i32, i32
  }
  func.func @transform_13(%arg0: i32) -> (i32, i32) {
    %c0_i32 = arith.constant 0 : i32
    %c0_i32_0 = arith.constant 0 : i32
    %c0_i32_1 = arith.constant 0 : i32
    return %c0_i32, %c0_i32_0 : i32, i32
  }
  func.func @transform_14(%arg0: i32) -> (i32, i32) {
    %c0_i32 = arith.constant 0 : i32
    %c0_i32_0 = arith.constant 0 : i32
    %c0_i32_1 = arith.constant 0 : i32
    return %c0_i32, %c0_i32_0 : i32, i32
  }
  func.func @transform_15(%arg0: i32) -> (i32, i32) {
    %c0_i32 = arith.constant 0 : i32
    %c0_i32_0 = arith.constant 0 : i32
    %c0_i32_1 = arith.constant 0 : i32
    return %c0_i32, %c0_i32_0 : i32, i32
  }
  func.func @transform_16(%arg0: i32) -> (i32, i32) {
    %c0_i32 = arith.constant 0 : i32
    %c0_i32_0 = arith.constant 0 : i32
    %c0_i32_1 = arith.constant 0 : i32
    return %c0_i32, %c0_i32_0 : i32, i32
  }
}

</mosaic_0001>

<bundles_post_ra>
// kernel: tpu_custom_call.1
= control target key start
LH: loop header
LB: loop body
LE: loop exit
PB: predicated region body
PF: predicated region fallthrough
CT: control target
= control target key end

     0   :  { %s6483_s0 = inlined_call_operand.vmem [shape: f32[16], index: 0, kind: input, shape index: {}]   ;;  %s6484_s1 = inlined_call_operand.vmem [shape: f32[16,256], index: 1, kind: input, shape index: {}]   ;;  %s6485_s2 = inlined_call_operand.vmem [shape: f32[16,256], index: 2, kind: input, shape index: {}]   ;;  %s6486_s3 = inlined_call_operand.vmem [shape: f32[16,256], index: 3, kind: input, shape index: {}]   ;;  %s6487_s4 = inlined_call_operand.hbm [shape: bf16[256,768], index: 4, kind: input, shape index: {}]   ;;  %s6488_s5 = inlined_call_operand.hbm [shape: bf16[256,768], index: 5, kind: input, shape index: {}]   ;;  %s6489_s6 = inlined_call_operand.hbm [shape: bf16[256,1536], index: 6, kind: input, shape index: {}]   ;;  %s6490_s7 = inlined_call_operand.vmem [shape: f32[1,768], index: 7, kind: input, shape index: {}]   ;;  %s6491_s8 = inlined_call_operand.vmem [shape: f32[1,768], index: 8, kind: input, shape index: {}]   ;;  %s6492_s9 = inlined_call_operand.vmem [shape: f32[8,256], index: 9, kind: input, shape index: {}]   ;;  %s6493_s10 = inlined_call_operand.hbm [shape: bf16[256,256], index: 10, kind: input, shape index: {}]   ;;  %s6494_s11 = inlined_call_operand.hbm [shape: bf16[256,512], index: 11, kind: input, shape index: {}]   ;;  %s6495_s12 = inlined_call_operand.vmem [shape: bf16[256,64], index: 12, kind: input, shape index: {}]   ;;  %s6496_s13 = inlined_call_operand.vmem [shape: f32[1,512], index: 13, kind: input, shape index: {}]   ;;  %s6497_s14 = inlined_call_operand.vmem [shape: f32[1,64], index: 14, kind: input, shape index: {}]   ;;  %s6498_s15 = inlined_call_operand.vmem [shape: f32[1,64], index: 15, kind: input, shape index: {}]   ;;  %s6499_s16 = inlined_call_operand.hbm [shape: f32[2,128], index: 16, kind: output, shape index: {}]  }
   0x1   :  { %6504 = sst [smem:[#allocation34_spill]] %s6483_s0 }
   0x2   :  { %21 = vsyncpa [#allocation9], 0 }
   0x3   :  { %22 = vsyncpa [#allocation7], 0 }
   0x4   :  { %23 = vsyncpa [#allocation12], 0 }
   0x5   :  { %24 = vsyncpa [#allocation8], 0  ;;  %s6505_s23 = sld [smem:[#allocation34_spill]]  ;;  %s5807_s25 = smov [#allocation11]  }
   0x6   :  { %s58_s26 = sshll.u32 %s5807_s25, 4  ;;  %s5693_s29 = scalar_lea.hbm %s6488_s5, 12288  ;;  %s59_s26 = int_to_ptr.vmem [resolvable:$true] %s58_s26 }
   0x7   :  { %p5694_p0 = scmp.ne.s32.totalorder %s6488_s5, %s5693_s29  ;;  %p5697_p1 = scmp.lt.u32.totalorder %s5693_s29, %s6488_s5 }
   0x9   :  { %p5699_p2 = pnand %p5697_p1, %p5694_p0 }
   0xb   :  { %s31_s24 = sshll.u32 %s6505_s23, 4  ;;  %s32_s24 = int_to_ptr.vmem [resolvable:$true] %s31_s24 }
   0xc   :  { %5702 = shalt.err (!%p5699_p2)
}
   0xd   :  { %s5703_s19 = scalar_lea.vmem %s59_s26, 12288  ;;  %p5708_p4 = scmp.lt.s32.totalorder %s59_s26, %s59_s26 }
   0xe   :  { %p5704_p3 = scmp.ne.s32.totalorder %s59_s26, %s5703_s19  ;;  %p5709_p5 = scmp.lt.s32.totalorder %s5703_s19, %s5703_s19 }
  0x10   :  { %p5710_p6 = por %p5709_p5, %p5708_p4 }
  0x12   :  { %p5711_p7 = pnand %p5710_p6, %p5704_p3 }
  0x14   :  { %5714 = shalt.err (!%p5711_p7)
}
  0x15   :  { %s5808_s20 = smov 384   ;;  %s5809_s21 = smov 24  }
  0x16   :  { %64 = dma.hbm_to_vmem [thread:$0]  %s6488_s5, 12288, %s59_s26, [#allocation12], %s5808_s20, %s5808_s20, %s5809_s21  }
  0x17   :  { %s5715_s25 = scalar_lea.vmem %s32_s24, 16  ;;  %p5720_p9 = scmp.lt.s32.totalorder %s32_s24, %s32_s24 }
  0x18   :  { %p5716_p8 = scmp.ne.s32.totalorder %s32_s24, %s5715_s25  ;;  %p5721_p10 = scmp.lt.s32.totalorder %s5715_s25, %s5715_s25 }
  0x1a   :  { %p5722_p11 = por %p5721_p10, %p5720_p9 }
  0x1c   :  { %p5723_p12 = pnand %p5722_p11, %p5716_p8 }
  0x1e   :  { %5726 = shalt.err (!%p5723_p12)
}
  0x1f   :  { %s5810_s27 = smov [#allocation6]   ;;  %s5811_s28 = smov [#allocation10]  }
  0x20   :  { %34 = dma.vmem_to_smem %s32_s24, 16, %s5810_s27, [#allocation9]  }
  0x21   :  { %s46_s29 = sshll.u32 %s5811_s28, 4  ;;  %s5812_s30 = smov [#allocation13]   ;;  %s47_s29 = int_to_ptr.vmem [resolvable:$true] %s46_s29 }
  0x22   :  { %s70_s0 = sshll.u32 %s5812_s30, 4  ;;  %s5727_s5 = scalar_lea.hbm %s6487_s4, 12288  ;;  %s5932_s0 = int_to_ptr.vmem [resolvable:$true] %s70_s0 }
  0x23   :  { %p5728_p13 = scmp.ne.s32.totalorder %s6487_s4, %s5727_s5  ;;  %p5731_p0 = scmp.lt.u32.totalorder %s5727_s5, %s6487_s4 }
  0x25   :  { %p5733_p1 = pnand %p5731_p0, %p5728_p13 }
  0x27   :  { %5736 = shalt.err (!%p5733_p1)
}
  0x28   :  { %s5737_s24 = scalar_lea.vmem %s47_s29, 12288  ;;  %p5742_p3 = scmp.lt.s32.totalorder %s47_s29, %s47_s29 }
  0x29   :  { %p5738_p2 = scmp.ne.s32.totalorder %s47_s29, %s5737_s24  ;;  %p5743_p4 = scmp.lt.s32.totalorder %s5737_s24, %s5737_s24 }
  0x2b   :  { %p5744_p5 = por %p5743_p4, %p5742_p3 }
  0x2d   :  { %p5745_p6 = pnand %p5744_p5, %p5738_p2 }
  0x2f   :  { %5748 = shalt.err (!%p5745_p6)
}
  0x30   :  { %52 = dma.hbm_to_vmem [thread:$0]  %s6487_s4, 12288, %s47_s29, [#allocation7], %s5808_s20, %s5808_s20, %s5809_s21  }
  0x31   :  { %s5749_s17 = scalar_lea.hbm %s6489_s6, 24576 }
  0x32   :  { %p5750_p7 = scmp.ne.s32.totalorder %s6489_s6, %s5749_s17  ;;  %p5753_p8 = scmp.lt.u32.totalorder %s5749_s17, %s6489_s6 }
  0x34   :  { %p5755_p9 = pnand %p5753_p8, %p5750_p7 }
  0x36   :  { %5758 = shalt.err (!%p5755_p9)
}
  0x37   :  { %s5759_s22 = scalar_lea.vmem %s5932_s0, 24576  ;;  %p5764_p11 = scmp.lt.s32.totalorder %s5932_s0, %s5932_s0 }
  0x38   :  { %p5760_p10 = scmp.ne.s32.totalorder %s5932_s0, %s5759_s22  ;;  %p5765_p12 = scmp.lt.s32.totalorder %s5759_s22, %s5759_s22 }
  0x3a   :  { %p5766_p13 = por %p5765_p12, %p5764_p11 }
  0x3c   :  { %p5767_p0 = pnand %p5766_p13, %p5760_p10 }
  0x3e   :  { %5770 = shalt.err (!%p5767_p0)
}
  0x3f   :  { %s5813_s4 = smov 768   ;;  %s5814_s20 = smov 48  }
  0x40   :  { %76 = dma.hbm_to_vmem [thread:$0]  %s6489_s6, 24576, %s5932_s0, [#allocation12], %s5813_s4, %s5813_s4, %s5814_s20  }
  0x41   :  { %5793 = dma.done.wait [#allocation9], 16  }
  0x42   :  { %5794 = vsyncadd [#allocation9], 4294967280 }
  0x43   :  { %5795 = dma.done.wait [#allocation7], 12288  }
  0x44   :  { %5796 = vsyncadd [#allocation7], 4294955008 }
  0x45   :  { %5797 = dma.done.wait [#allocation12], 36864  }
  0x46   :  { %5798 = vsyncadd [#allocation12], 4294930432 }
  0x47   :  { %101 = sfence }
  0x48   :  { %s107_s23 = sld [smem:[#allocation0]]   ;;  %s5815_s24 = smov [#allocation2]  }
  0x49   :  { %s115_s25 = sshll.u32 %s5815_s24, 4  ;;  %s5816_s27 = smov 256   ;;  %s116_s25 = int_to_ptr.vmem [resolvable:$true] %s115_s25 }
  0x4a   :  { %119 = sst [smem:[#allocation16]] %s5816_s27  ;;  %s5817_s28 = smov 2  }
  0x4b   :  { %121 = sst [smem:[#allocation16 + $0x1]] %s5816_s27  ;;  %s5818_s30 = smov 64  }
  0x4c   :  { %123 = sst [smem:[#allocation16 + $0x2]] %s5817_s28  ;;  %s5819_s6 = smov 128  }
  0x4d   :  { %125 = sst [smem:[#allocation16 + $0x3]] %s5818_s30  ;;  %s5820_s18 = smov 4  }
  0x4e   :  { %s4576_s17 = sshll.u32 %s107_s23, 26  ;;  %127 = sst [smem:[#allocation16 + $0x4]] %s5819_s6 }
  0x4f   :  { %s4577_s0 = sadd.s32 134217728, %s4576_s17  ;;  %129 = sst [smem:[#allocation16 + $0x5]] %s5817_s28 }
  0x50   :  { %131 = sst [smem:[#allocation16 + $0x6]] %s5819_s6  ;;  %s5821_s5 = smov [#allocation5]  }
  0x51   :  { %133 = sst [smem:[#allocation16 + $0x7]] %s5818_s30  ;;  %s5822_s26 = smov [#allocation15]  }
  0x52   :  { %135 = sst [smem:[#allocation16 + $0x8]] %s5820_s18  ;;  %s5823_s4 = smov 512  }
  0x53   :  { %137 = dma.general %s6493_s10, 4096, %s116_s25, %s5821_s5, %s5822_s26, [#allocation16], %s4577_s0, 0  }
  0x54   :  { %158 = sst [smem:[#allocation18 + $0x2]] %s5820_s18  ;;  %s5824_s20 = smov [#allocation3]  }
  0x55   :  { %154 = sst [smem:[#allocation18]] %s5823_s4  ;;  %s150_s21 = sshll.u32 %s5824_s20, 4  ;;  %s151_s21 = int_to_ptr.vmem [resolvable:$true] %s150_s21 }
  0x56   :  { %156 = sst [smem:[#allocation18 + $0x1]] %s5823_s4  ;;  %s5825_s29 = smov [#allocation5 + $0x1]  }
  0x57   :  { %160 = sst [smem:[#allocation18 + $0x3]] %s5818_s30  ;;  %s5826_s23 = smov [#allocation17]  }
  0x58   :  { %162 = sst [smem:[#allocation18 + $0x4]] %s5819_s6 }
  0x59   :  { %164 = sst [smem:[#allocation18 + $0x5]] %s5817_s28 }
  0x5a   :  { %166 = sst [smem:[#allocation18 + $0x6]] %s5816_s27 }
  0x5b   :  { %168 = sst [smem:[#allocation18 + $0x7]] %s5818_s30 }
  0x5c   :  { %170 = sst [smem:[#allocation18 + $0x8]] %s5820_s18 }
  0x5d   :  { %172 = dma.general %s6494_s11, 8192, %s151_s21, %s5825_s29, %s5826_s23, [#allocation18], %s4577_s0, 0  }
  0x5e   :  { %v5975_v0 = vld [vmem:[%s6495_s12] sm:$0xff]  ;;  %v5980_v1 = vld [vmem:[%s6495_s12 + $0x8] sm:$0xff]  ;;  %v5985_v2 = vld [vmem:[%s6495_s12 + $0x10] sm:$0xff] }
  0x5f   :  { %v5990_v3 = vld [vmem:[%s6495_s12 + $0x18] sm:$0xff]  ;;  %v5995_v4 = vld [vmem:[%s6495_s12 + $0x20] sm:$0xff]  ;;  %v6000_v5 = vld [vmem:[%s6495_s12 + $0x28] sm:$0xff] }
  0x60   :  { %6506 = vst [vmem:[#allocation27_spill] sm:$0xff] %v6000_v5  ;;  %v6005_v6 = vld [vmem:[%s6495_s12 + $0x30] sm:$0xff]  ;;  %v6010_v7 = vld [vmem:[%s6495_s12 + $0x38] sm:$0xff]  ;;  %v6015_v8 = vld [vmem:[%s6495_s12 + $0x40] sm:$0xff] }
  0x61   :  { %6507 = vst [vmem:[#allocation28_spill] sm:$0xff] %v6005_v6  ;;  %6508 = vst [vmem:[#allocation29_spill] sm:$0xff] %v6010_v7  ;;  %v6020_v9 = vld [vmem:[%s6495_s12 + $0x48] sm:$0xff]  ;;  %v6025_v10 = vld [vmem:[%s6495_s12 + $0x50] sm:$0xff] }
  0x62   :  { %v6030_v11 = vld [vmem:[%s6495_s12 + $0x58] sm:$0xff]  ;;  %v6035_v12 = vld [vmem:[%s6495_s12 + $0x60] sm:$0xff]  ;;  %v6040_v13 = vld [vmem:[%s6495_s12 + $0x68] sm:$0xff] }
  0x63   :  { %6509 = vst [vmem:[#allocation30_spill] sm:$0xff] %v6040_v13  ;;  %v6045_v14 = vld [vmem:[%s6495_s12 + $0x70] sm:$0xff]  ;;  %v6050_v15 = vld [vmem:[%s6495_s12 + $0x78] sm:$0xff] }
  0x64   :  { %6510 = vst [vmem:[#allocation31_spill] sm:$0xff] %v6045_v14  ;;  %6511 = vst [vmem:[#allocation32_spill] sm:$0xff] %v6050_v15 }
  0x65   :  { %245 = vsyncadd [#allocation5 + $0x2], 2048  ;;  %v5061_v16 = vld [vmem:[#allocation13 + $0x4] ss:$48 sps:$4 sm:$0xff]   ;;  %v5063_v17 = vld [vmem:[#allocation13 + $0xc] ss:$48 sps:$4 sm:$0xff]  }
  0x66   :  { %v5065_v18 = vld [vmem:[#allocation13] ss:$48 sps:$4 sm:$0xff]   ;;  %v5066_v19 = vld [vmem:[#allocation13 + $0x8] ss:$48 sps:$4 sm:$0xff]   ;;  %1416 = vmatprep.subr.bf16.mxu0 %v5061_v16  ;;  %v5067_v20 = vld [vmem:[#allocation13 + $0x64] ss:$48 sps:$4 sm:$0xff]   ;;  %1459 = vmatprep.subr.bf16.mxu1 %v5063_v17 }
  0x67   :  { %1417 = vmatpush1.bf16.msra.mxu0 %v5065_v18  ;;  %v5069_v21 = vld [vmem:[#allocation13 + $0x6c] ss:$48 sps:$4 sm:$0xff]   ;;  %1460 = vmatpush1.bf16.msra.mxu1 %v5066_v19  ;;  %v5071_v22 = vld [vmem:[#allocation13 + $0x60] ss:$48 sps:$4 sm:$0xff]   ;;  %v5072_v23 = vld [vmem:[#allocation13 + $0x68] ss:$48 sps:$4 sm:$0xff]  }
  0x68   :  { %1418 = vmatprep.subr.bf16.mxu0 %v5067_v20  ;;  %1461 = vmatprep.subr.bf16.mxu1 %v5069_v21  ;;  %v5073_v24 = vld [vmem:[#allocation13 + $0xc4] ss:$48 sps:$4 sm:$0xff]   ;;  %v5075_v25 = vld [vmem:[#allocation13 + $0xcc] ss:$48 sps:$4 sm:$0xff]   ;;  %v5077_v26 = vld [vmem:[#allocation13 + $0xc0] ss:$48 sps:$4 sm:$0xff]  }
  0x69   :  { %v5078_v27 = vld [vmem:[#allocation13 + $0xc8] ss:$48 sps:$4 sm:$0xff]   ;;  %v5079_v28 = vld [vmem:[#allocation13 + $0x124] ss:$48 sps:$4 sm:$0xff]   ;;  %v5081_v29 = vld [vmem:[#allocation13 + $0x12c] ss:$48 sps:$4 sm:$0xff]  }
  0x6a   :  { %v5083_v30 = vld [vmem:[#allocation13 + $0x120] ss:$48 sps:$4 sm:$0xff]   ;;  %v5084_v31 = vld [vmem:[#allocation13 + $0x128] ss:$48 sps:$4 sm:$0xff]   ;;  %v5085_v32 = vld [vmem:[#allocation13 + $0x184] ss:$48 sps:$4 sm:$0xff]  }
  0x6b   :  { %1419 = vmatpush1.bf16.msra.mxu0 %v5071_v22  ;;  %1462 = vmatpush1.bf16.msra.mxu1 %v5072_v23  ;;  %v5087_v33 = vld [vmem:[#allocation13 + $0x18c] ss:$48 sps:$4 sm:$0xff]   ;;  %v5089_v34 = vld [vmem:[#allocation13 + $0x180] ss:$48 sps:$4 sm:$0xff]   ;;  %v5090_v35 = vld [vmem:[#allocation13 + $0x188] ss:$48 sps:$4 sm:$0xff]  }
  0x6c   :  { %1420 = vmatprep.subr.bf16.mxu0 %v5073_v24  ;;  %1463 = vmatprep.subr.bf16.mxu1 %v5075_v25  ;;  %v5091_v36 = vld [vmem:[#allocation13 + $0x1e4] ss:$48 sps:$4 sm:$0xff]   ;;  %v5093_v37 = vld [vmem:[#allocation13 + $0x1ec] ss:$48 sps:$4 sm:$0xff]   ;;  %v5095_v38 = vld [vmem:[#allocation13 + $0x1e0] ss:$48 sps:$4 sm:$0xff]  }
  0x6d   :  { %v5096_v39 = vld [vmem:[#allocation13 + $0x1e8] ss:$48 sps:$4 sm:$0xff]   ;;  %v5097_v40 = vld [vmem:[#allocation13 + $0x244] ss:$48 sps:$4 sm:$0xff]   ;;  %v5099_v41 = vld [vmem:[#allocation13 + $0x24c] ss:$48 sps:$4 sm:$0xff]  }
  0x6e   :  { %v5101_v42 = vld [vmem:[#allocation13 + $0x240] ss:$48 sps:$4 sm:$0xff]   ;;  %v5102_v43 = vld [vmem:[#allocation13 + $0x248] ss:$48 sps:$4 sm:$0xff]   ;;  %v5103_v44 = vld [vmem:[#allocation13 + $0x2a4] ss:$48 sps:$4 sm:$0xff]  }
  0x6f   :  { %1421 = vmatpush1.bf16.msra.mxu0 %v5077_v26  ;;  %1464 = vmatpush1.bf16.msra.mxu1 %v5078_v27  ;;  %v5105_v45 = vld [vmem:[#allocation13 + $0x2ac] ss:$48 sps:$4 sm:$0xff]   ;;  %v5107_v46 = vld [vmem:[#allocation13 + $0x2a0] ss:$48 sps:$4 sm:$0xff]   ;;  %v5108_v47 = vld [vmem:[#allocation13 + $0x2a8] ss:$48 sps:$4 sm:$0xff]  }
  0x70   :  { %1422 = vmatprep.subr.bf16.mxu0 %v5079_v28  ;;  %1465 = vmatprep.subr.bf16.mxu1 %v5081_v29  ;;  %v5109_v48 = vld [vmem:[#allocation13 + $0x304] ss:$48 sps:$4 sm:$0xff]   ;;  %v5111_v49 = vld [vmem:[#allocation13 + $0x30c] ss:$48 sps:$4 sm:$0xff]   ;;  %v5113_v50 = vld [vmem:[#allocation13 + $0x300] ss:$48 sps:$4 sm:$0xff]  }
  0x71   :  { %v5114_v51 = vld [vmem:[#allocation13 + $0x308] ss:$48 sps:$4 sm:$0xff]   ;;  %v5115_v52 = vld [vmem:[#allocation13 + $0x364] ss:$48 sps:$4 sm:$0xff]   ;;  %v5117_v53 = vld [vmem:[#allocation13 + $0x36c] ss:$48 sps:$4 sm:$0xff]  }
  0x72   :  { %v5119_v54 = vld [vmem:[#allocation13 + $0x360] ss:$48 sps:$4 sm:$0xff]   ;;  %v5120_v55 = vld [vmem:[#allocation13 + $0x368] ss:$48 sps:$4 sm:$0xff]   ;;  %v5121_v56 = vld [vmem:[#allocation13 + $0x3c4] ss:$48 sps:$4 sm:$0xff]  }
  0x73   :  { %1423 = vmatpush1.bf16.msra.mxu0 %v5083_v30  ;;  %1466 = vmatpush1.bf16.msra.mxu1 %v5084_v31  ;;  %v5123_v57 = vld [vmem:[#allocation13 + $0x3cc] ss:$48 sps:$4 sm:$0xff]   ;;  %v5125_v58 = vld [vmem:[#allocation13 + $0x3c0] ss:$48 sps:$4 sm:$0xff]   ;;  %v5126_v59 = vld [vmem:[#allocation13 + $0x3c8] ss:$48 sps:$4 sm:$0xff]  }
  0x74   :  { %1424 = vmatprep.subr.bf16.mxu0 %v5085_v32  ;;  %1467 = vmatprep.subr.bf16.mxu1 %v5087_v33  ;;  %v5127_v60 = vld [vmem:[#allocation13 + $0x424] ss:$48 sps:$4 sm:$0xff]   ;;  %v5129_v61 = vld [vmem:[#allocation13 + $0x42c] ss:$48 sps:$4 sm:$0xff]   ;;  %v5131_v16 = vld [vmem:[#allocation13 + $0x420] ss:$48 sps:$4 sm:$0xff]  }
  0x75   :  { %v255_v62 = vld [vmem:[%s6486_s3 + $0x8] sm:$0xff]  ;;  %v257_v63 = vld [vmem:[%s6486_s3 + $0x18] sm:$0xff]  ;;  %v5133_v19 = vld [vmem:[#allocation13 + $0x484] ss:$48 sps:$4 sm:$0xff]   ;;  %vm3370_vm0 = vcmask 64512   ;;  %vm3952_vm1 = vcmask 1041409  }
  0x76   :  { %v5132_v17 = vld [vmem:[#allocation13 + $0x428] ss:$48 sps:$4 sm:$0xff]   ;;  %v6058_v18 = vpack.c.bf16 %v257_v63, %v255_v62  ;;  %v5135_v20 = vld [vmem:[#allocation13 + $0x48c] ss:$48 sps:$4 sm:$0xff]   ;;  %v5137_v21 = vld [vmem:[#allocation13 + $0x480] ss:$48 sps:$4 sm:$0xff]  }
  0x77   :  { %1425 = vmatpush1.bf16.msra.mxu0 %v5089_v34  ;;  %1468 = vmatpush1.bf16.msra.mxu1 %v5090_v35  ;;  %v5138_v22 = vld [vmem:[#allocation13 + $0x488] ss:$48 sps:$4 sm:$0xff]   ;;  %v5139_v23 = vld [vmem:[#allocation13 + $0x4e4] ss:$48 sps:$4 sm:$0xff]   ;;  %v5141_v24 = vld [vmem:[#allocation13 + $0x4ec] ss:$48 sps:$4 sm:$0xff]  }
  0x78   :  { %1426 = vmatprep.subr.bf16.mxu0 %v5091_v36  ;;  %1469 = vmatprep.subr.bf16.mxu1 %v5093_v37  ;;  %v5143_v25 = vld [vmem:[#allocation13 + $0x4e0] ss:$48 sps:$4 sm:$0xff]   ;;  %v5144_v26 = vld [vmem:[#allocation13 + $0x4e8] ss:$48 sps:$4 sm:$0xff]   ;;  %v5145_v27 = vld [vmem:[#allocation13 + $0x544] ss:$48 sps:$4 sm:$0xff]  }
  0x79   :  { %1448 = vmatprep.mubr.bf16.mxu0 %v6058_v18  ;;  %1491 = vmatprep.mubr.bf16.mxu1 %v6058_v18  ;;  %v5147_v28 = vld [vmem:[#allocation13 + $0x54c] ss:$48 sps:$4 sm:$0xff]   ;;  %v5149_v29 = vld [vmem:[#allocation13 + $0x540] ss:$48 sps:$4 sm:$0xff]   ;;  %v5150_v30 = vld [vmem:[#allocation13 + $0x548] ss:$48 sps:$4 sm:$0xff]  }
  0x7a   :  { %v5151_v31 = vld [vmem:[#allocation13 + $0x5a4] ss:$48 sps:$4 sm:$0xff]   ;;  %v5153_v32 = vld [vmem:[#allocation13 + $0x5ac] ss:$48 sps:$4 sm:$0xff]   ;;  %v5155_v33 = vld [vmem:[#allocation13 + $0x5a0] ss:$48 sps:$4 sm:$0xff]  }
  0x7b   :  { %1427 = vmatpush1.bf16.msra.mxu0 %v5095_v38  ;;  %1470 = vmatpush1.bf16.msra.mxu1 %v5096_v39  ;;  %v254_v34 = vld [vmem:[%s6486_s3] sm:$0xff]  ;;  %v256_v35 = vld [vmem:[%s6486_s3 + $0x10] sm:$0xff]  ;;  %v5156_v36 = vld [vmem:[#allocation13 + $0x5a8] ss:$48 sps:$4 sm:$0xff]   ;;  %vm3955_vm2 = vcmask 58368  }
  0x7c   :  { %1428 = vmatprep.subr.bf16.mxu0 %v5097_v40  ;;  %1471 = vmatprep.subr.bf16.mxu1 %v5099_v41  ;;  %v5159_v37 = vld [vmem:[#allocation13 + $0x14] ss:$48 sps:$4 sm:$0xff]   ;;  %v5162_v38 = vld [vmem:[#allocation13 + $0x1c] ss:$48 sps:$4 sm:$0xff]   ;;  %v6068_v39 = vpack.c.bf16 %v256_v35, %v254_v34  ;;  %v5157_v40 = vld [vmem:[#allocation13 + $0x10] ss:$48 sps:$4 sm:$0xff]  }
  0x7d   :  { %v5160_v41 = vld [vmem:[#allocation13 + $0x18] ss:$48 sps:$4 sm:$0xff]   ;;  %v5195_v62 = vld [vmem:[#allocation13 + $0x254] ss:$48 sps:$4 sm:$0xff]   ;;  %v5198_v63 = vld [vmem:[#allocation13 + $0x25c] ss:$48 sps:$4 sm:$0xff]  }
  0x7e   :  { %v5220_v34 = vld [vmem:[#allocation13 + $0x3d8] ss:$48 sps:$4 sm:$0xff]   ;;  %v5225_v35 = vld [vmem:[#allocation13 + $0x434] ss:$48 sps:$4 sm:$0xff]  }
  0x7f   :  { %1429 = vmatpush1.bf16.msra.mxu0 %v5101_v42  ;;  %1472 = vmatpush1.bf16.msra.mxu1 %v5102_v43  ;;  %v5165_v42 = vld [vmem:[#allocation13 + $0x74] ss:$48 sps:$4 sm:$0xff]   ;;  %v5168_v43 = vld [vmem:[#allocation13 + $0x7c] ss:$48 sps:$4 sm:$0xff]  }
  0x80   :  { %1430 = vmatprep.subr.bf16.mxu0 %v5103_v44  ;;  %1473 = vmatprep.subr.bf16.mxu1 %v5105_v45  ;;  %v5163_v44 = vld [vmem:[#allocation13 + $0x70] ss:$48 sps:$4 sm:$0xff]   ;;  %v5166_v45 = vld [vmem:[#allocation13 + $0x78] ss:$48 sps:$4 sm:$0xff]  }
  0x83   :  { %1431 = vmatpush1.bf16.msra.mxu0 %v5107_v46  ;;  %1474 = vmatpush1.bf16.msra.mxu1 %v5108_v47  ;;  %v5171_v46 = vld [vmem:[#allocation13 + $0xd4] ss:$48 sps:$4 sm:$0xff]   ;;  %v5174_v47 = vld [vmem:[#allocation13 + $0xdc] ss:$48 sps:$4 sm:$0xff]  }
  0x84   :  { %1432 = vmatprep.subr.bf16.mxu0 %v5109_v48  ;;  %1475 = vmatprep.subr.bf16.mxu1 %v5111_v49  ;;  %v5169_v48 = vld [vmem:[#allocation13 + $0xd0] ss:$48 sps:$4 sm:$0xff]   ;;  %v5172_v49 = vld [vmem:[#allocation13 + $0xd8] ss:$48 sps:$4 sm:$0xff]  }
  0x87   :  { %1433 = vmatpush1.bf16.msra.mxu0 %v5113_v50  ;;  %1476 = vmatpush1.bf16.msra.mxu1 %v5114_v51  ;;  %v5177_v50 = vld [vmem:[#allocation13 + $0x134] ss:$48 sps:$4 sm:$0xff]   ;;  %v5180_v51 = vld [vmem:[#allocation13 + $0x13c] ss:$48 sps:$4 sm:$0xff]  }
  0x88   :  { %1434 = vmatprep.subr.bf16.mxu0 %v5115_v52  ;;  %1477 = vmatprep.subr.bf16.mxu1 %v5117_v53  ;;  %v5175_v52 = vld [vmem:[#allocation13 + $0x130] ss:$48 sps:$4 sm:$0xff]   ;;  %v5178_v53 = vld [vmem:[#allocation13 + $0x138] ss:$48 sps:$4 sm:$0xff]  }
  0x8b   :  { %1435 = vmatpush1.bf16.msra.mxu0 %v5119_v54  ;;  %1478 = vmatpush1.bf16.msra.mxu1 %v5120_v55  ;;  %v5183_v54 = vld [vmem:[#allocation13 + $0x194] ss:$48 sps:$4 sm:$0xff]   ;;  %v5186_v55 = vld [vmem:[#allocation13 + $0x19c] ss:$48 sps:$4 sm:$0xff]  }
  0x8c   :  { %1436 = vmatprep.subr.bf16.mxu0 %v5121_v56  ;;  %1479 = vmatprep.subr.bf16.mxu1 %v5123_v57  ;;  %v5181_v56 = vld [vmem:[#allocation13 + $0x190] ss:$48 sps:$4 sm:$0xff]   ;;  %v5184_v57 = vld [vmem:[#allocation13 + $0x198] ss:$48 sps:$4 sm:$0xff]  }
  0x8f   :  { %1437 = vmatpush1.bf16.msra.mxu0 %v5125_v58  ;;  %1480 = vmatpush1.bf16.msra.mxu1 %v5126_v59  ;;  %v5189_v58 = vld [vmem:[#allocation13 + $0x1f4] ss:$48 sps:$4 sm:$0xff]   ;;  %v5192_v59 = vld [vmem:[#allocation13 + $0x1fc] ss:$48 sps:$4 sm:$0xff]  }
  0x90   :  { %1438 = vmatprep.subr.bf16.mxu0 %v5127_v60  ;;  %1481 = vmatprep.subr.bf16.mxu1 %v5129_v61  ;;  %v5187_v60 = vld [vmem:[#allocation13 + $0x1f0] ss:$48 sps:$4 sm:$0xff]   ;;  %v5190_v61 = vld [vmem:[#allocation13 + $0x1f8] ss:$48 sps:$4 sm:$0xff]  }
  0x93   :  { %1439 = vmatpush1.bf16.msra.mxu0 %v5131_v16  ;;  %1482 = vmatpush1.bf16.msra.mxu1 %v5132_v17  ;;  %v5193_v16 = vld [vmem:[#allocation13 + $0x250] ss:$48 sps:$4 sm:$0xff]   ;;  %v5196_v17 = vld [vmem:[#allocation13 + $0x258] ss:$48 sps:$4 sm:$0xff]  }
  0x94   :  { %1440 = vmatprep.subr.bf16.mxu0 %v5133_v19  ;;  %1483 = vmatprep.subr.bf16.mxu1 %v5135_v20  ;;  %v5201_v19 = vld [vmem:[#allocation13 + $0x2b4] ss:$48 sps:$4 sm:$0xff]   ;;  %v5204_v20 = vld [vmem:[#allocation13 + $0x2bc] ss:$48 sps:$4 sm:$0xff]  }
  0x97   :  { %1441 = vmatpush1.bf16.msra.mxu0 %v5137_v21  ;;  %1484 = vmatpush1.bf16.msra.mxu1 %v5138_v22  ;;  %v5199_v21 = vld [vmem:[#allocation13 + $0x2b0] ss:$48 sps:$4 sm:$0xff]   ;;  %v5202_v22 = vld [vmem:[#allocation13 + $0x2b8] ss:$48 sps:$4 sm:$0xff]  }
  0x98   :  { %1442 = vmatprep.subr.bf16.mxu0 %v5139_v23  ;;  %1485 = vmatprep.subr.bf16.mxu1 %v5141_v24  ;;  %v5207_v23 = vld [vmem:[#allocation13 + $0x314] ss:$48 sps:$4 sm:$0xff]   ;;  %v5210_v24 = vld [vmem:[#allocation13 + $0x31c] ss:$48 sps:$4 sm:$0xff]  }
  0x9b   :  { %1443 = vmatpush1.bf16.msra.mxu0 %v5143_v25  ;;  %1486 = vmatpush1.bf16.msra.mxu1 %v5144_v26  ;;  %v5205_v25 = vld [vmem:[#allocation13 + $0x310] ss:$48 sps:$4 sm:$0xff]   ;;  %v5208_v26 = vld [vmem:[#allocation13 + $0x318] ss:$48 sps:$4 sm:$0xff]  }
  0x9c   :  { %1444 = vmatprep.subr.bf16.mxu0 %v5145_v27  ;;  %1487 = vmatprep.subr.bf16.mxu1 %v5147_v28  ;;  %v5213_v27 = vld [vmem:[#allocation13 + $0x374] ss:$48 sps:$4 sm:$0xff]   ;;  %v5216_v28 = vld [vmem:[#allocation13 + $0x37c] ss:$48 sps:$4 sm:$0xff]  }
  0x9f   :  { %1445 = vmatpush1.bf16.msra.mxu0 %v5149_v29  ;;  %1488 = vmatpush1.bf16.msra.mxu1 %v5150_v30  ;;  %v5211_v29 = vld [vmem:[#allocation13 + $0x370] ss:$48 sps:$4 sm:$0xff]   ;;  %v5214_v30 = vld [vmem:[#allocation13 + $0x378] ss:$48 sps:$4 sm:$0xff]  }
  0xa0   :  { %1446 = vmatprep.subr.bf16.mxu0 %v5151_v31  ;;  %1489 = vmatprep.subr.bf16.mxu1 %v5153_v32  ;;  %v5219_v31 = vld [vmem:[#allocation13 + $0x3d4] ss:$48 sps:$4 sm:$0xff]   ;;  %v5222_v32 = vld [vmem:[#allocation13 + $0x3dc] ss:$48 sps:$4 sm:$0xff]  }
  0xa3   :  { %1447 = vmatpush1.bf16.msra.mxu0 %v5155_v33  ;;  %1490 = vmatpush1.bf16.msra.mxu1 %v5156_v36  ;;  %v5217_v33 = vld [vmem:[#allocation13 + $0x3d0] ss:$48 sps:$4 sm:$0xff]   ;;  %v5228_v36 = vld [vmem:[#allocation13 + $0x43c] ss:$48 sps:$4 sm:$0xff]  }
  0xa4   :  { %1502 = vmatprep.subr.bf16.mxu0 %v5159_v37  ;;  %1545 = vmatprep.subr.bf16.mxu1 %v5162_v38  ;;  %v5223_v37 = vld [vmem:[#allocation13 + $0x430] ss:$48 sps:$4 sm:$0xff]   ;;  %v5226_v38 = vld [vmem:[#allocation13 + $0x438] ss:$48 sps:$4 sm:$0xff]  }
  0xa6   :  { %1449 = vmatmul.mubr.bf16.vlgmr.msra.gmra.mrb[0].mxu0 %v6068_v39  ;;  %1492 = vmatmul.mubr.bf16.vlgmr.msra.gmra.mrb[0].mxu1 %v6068_v39 }
  0xa7   :  { %1503 = vmatpush1.bf16.msra.mxu0 %v5157_v40  ;;  %1546 = vmatpush1.bf16.msra.mxu1 %v5160_v41  ;;  %v5231_v40 = vld [vmem:[#allocation13 + $0x494] ss:$48 sps:$4 sm:$0xff]   ;;  %v5234_v41 = vld [vmem:[#allocation13 + $0x49c] ss:$48 sps:$4 sm:$0xff]  }
  0xa8   :  { %1504 = vmatprep.subr.bf16.mxu0 %v5165_v42  ;;  %1547 = vmatprep.subr.bf16.mxu1 %v5168_v43  ;;  %v5229_v42 = vld [vmem:[#allocation13 + $0x490] ss:$48 sps:$4 sm:$0xff]   ;;  %v5232_v43 = vld [vmem:[#allocation13 + $0x498] ss:$48 sps:$4 sm:$0xff]  }
  0xa9   :  { %1534 = vmatprep.mubr.bf16.mxu0 %v6058_v18  ;;  %1577 = vmatprep.mubr.bf16.mxu1 %v6058_v18 }
  0xab   :  { %1505 = vmatpush1.bf16.msra.mxu0 %v5163_v44  ;;  %1548 = vmatpush1.bf16.msra.mxu1 %v5166_v45  ;;  %v5237_v44 = vld [vmem:[#allocation13 + $0x4f4] ss:$48 sps:$4 sm:$0xff]   ;;  %v5240_v45 = vld [vmem:[#allocation13 + $0x4fc] ss:$48 sps:$4 sm:$0xff]  }
  0xac   :  { %1506 = vmatprep.subr.bf16.mxu0 %v5171_v46  ;;  %1549 = vmatprep.subr.bf16.mxu1 %v5174_v47  ;;  %v5235_v46 = vld [vmem:[#allocation13 + $0x4f0] ss:$48 sps:$4 sm:$0xff]   ;;  %v5238_v47 = vld [vmem:[#allocation13 + $0x4f8] ss:$48 sps:$4 sm:$0xff]  }
  0xaf   :  { %1507 = vmatpush1.bf16.msra.mxu0 %v5169_v48  ;;  %1550 = vmatpush1.bf16.msra.mxu1 %v5172_v49  ;;  %v5243_v48 = vld [vmem:[#allocation13 + $0x554] ss:$48 sps:$4 sm:$0xff]   ;;  %v5246_v49 = vld [vmem:[#allocation13 + $0x55c] ss:$48 sps:$4 sm:$0xff]  }
  0xb0   :  { %1508 = vmatprep.subr.bf16.mxu0 %v5177_v50  ;;  %1551 = vmatprep.subr.bf16.mxu1 %v5180_v51  ;;  %v5241_v50 = vld [vmem:[#allocation13 + $0x550] ss:$48 sps:$4 sm:$0xff]   ;;  %v5244_v51 = vld [vmem:[#allocation13 + $0x558] ss:$48 sps:$4 sm:$0xff]  }
  0xb3   :  { %1509 = vmatpush1.bf16.msra.mxu0 %v5175_v52  ;;  %1552 = vmatpush1.bf16.msra.mxu1 %v5178_v53  ;;  %v5249_v52 = vld [vmem:[#allocation13 + $0x5b4] ss:$48 sps:$4 sm:$0xff]   ;;  %v5252_v53 = vld [vmem:[#allocation13 + $0x5bc] ss:$48 sps:$4 sm:$0xff]  }
  0xb4   :  { %1510 = vmatprep.subr.bf16.mxu0 %v5183_v54  ;;  %1553 = vmatprep.subr.bf16.mxu1 %v5186_v55  ;;  %v5247_v54 = vld [vmem:[#allocation13 + $0x5b0] ss:$48 sps:$4 sm:$0xff]   ;;  %v5250_v55 = vld [vmem:[#allocation13 + $0x5b8] ss:$48 sps:$4 sm:$0xff]  }
  0xb7   :  { %1511 = vmatpush1.bf16.msra.mxu0 %v5181_v56  ;;  %1554 = vmatpush1.bf16.msra.mxu1 %v5184_v57  ;;  %v5255_v56 = vld [vmem:[#allocation13 + $0x24] ss:$48 sps:$4 sm:$0xff]   ;;  %v5258_v57 = vld [vmem:[#allocation13 + $0x2c] ss:$48 sps:$4 sm:$0xff]  }
  0xb8   :  { %1512 = vmatprep.subr.bf16.mxu0 %v5189_v58  ;;  %1555 = vmatprep.subr.bf16.mxu1 %v5192_v59  ;;  %v5253_v58 = vld [vmem:[#allocation13 + $0x20] ss:$48 sps:$4 sm:$0xff]   ;;  %v5256_v59 = vld [vmem:[#allocation13 + $0x28] ss:$48 sps:$4 sm:$0xff]  }
  0xbb   :  { %1513 = vmatpush1.bf16.msra.mxu0 %v5187_v60  ;;  %1556 = vmatpush1.bf16.msra.mxu1 %v5190_v61  ;;  %v5261_v60 = vld [vmem:[#allocation13 + $0x84] ss:$48 sps:$4 sm:$0xff]   ;;  %v5264_v61 = vld [vmem:[#allocation13 + $0x8c] ss:$48 sps:$4 sm:$0xff]  }
  0xbc   :  { %1514 = vmatprep.subr.bf16.mxu0 %v5195_v62  ;;  %1557 = vmatprep.subr.bf16.mxu1 %v5198_v63  ;;  %v5259_v62 = vld [vmem:[#allocation13 + $0x80] ss:$48 sps:$4 sm:$0xff]   ;;  %v5262_v63 = vld [vmem:[#allocation13 + $0x88] ss:$48 sps:$4 sm:$0xff]  }
  0xbf   :  { %1515 = vmatpush1.bf16.msra.mxu0 %v5193_v16  ;;  %1558 = vmatpush1.bf16.msra.mxu1 %v5196_v17  ;;  %v5267_v16 = vld [vmem:[#allocation13 + $0xe4] ss:$48 sps:$4 sm:$0xff]   ;;  %v5270_v17 = vld [vmem:[#allocation13 + $0xec] ss:$48 sps:$4 sm:$0xff]  }
  0xc0   :  { %1516 = vmatprep.subr.bf16.mxu0 %v5201_v19  ;;  %1559 = vmatprep.subr.bf16.mxu1 %v5204_v20  ;;  %v5265_v19 = vld [vmem:[#allocation13 + $0xe0] ss:$48 sps:$4 sm:$0xff]   ;;  %v5268_v20 = vld [vmem:[#allocation13 + $0xe8] ss:$48 sps:$4 sm:$0xff]  }
  0xc3   :  { %1517 = vmatpush1.bf16.msra.mxu0 %v5199_v21  ;;  %1560 = vmatpush1.bf16.msra.mxu1 %v5202_v22  ;;  %v5273_v21 = vld [vmem:[#allocation13 + $0x144] ss:$48 sps:$4 sm:$0xff]   ;;  %v5276_v22 = vld [vmem:[#allocation13 + $0x14c] ss:$48 sps:$4 sm:$0xff]  }
  0xc4   :  { %1518 = vmatprep.subr.bf16.mxu0 %v5207_v23  ;;  %1561 = vmatprep.subr.bf16.mxu1 %v5210_v24  ;;  %v5271_v23 = vld [vmem:[#allocation13 + $0x140] ss:$48 sps:$4 sm:$0xff]   ;;  %v5274_v24 = vld [vmem:[#allocation13 + $0x148] ss:$48 sps:$4 sm:$0xff]  }
  0xc7   :  { %1519 = vmatpush1.bf16.msra.mxu0 %v5205_v25  ;;  %1562 = vmatpush1.bf16.msra.mxu1 %v5208_v26  ;;  %v5279_v25 = vld [vmem:[#allocation13 + $0x1a4] ss:$48 sps:$4 sm:$0xff]   ;;  %v5282_v26 = vld [vmem:[#allocation13 + $0x1ac] ss:$48 sps:$4 sm:$0xff]  }
  0xc8   :  { %1520 = vmatprep.subr.bf16.mxu0 %v5213_v27  ;;  %1563 = vmatprep.subr.bf16.mxu1 %v5216_v28  ;;  %v5277_v27 = vld [vmem:[#allocation13 + $0x1a0] ss:$48 sps:$4 sm:$0xff]   ;;  %v5285_v28 = vld [vmem:[#allocation13 + $0x204] ss:$48 sps:$4 sm:$0xff]  }
  0xcb   :  { %1521 = vmatpush1.bf16.msra.mxu0 %v5211_v29  ;;  %1564 = vmatpush1.bf16.msra.mxu1 %v5214_v30  ;;  %v5288_v29 = vld [vmem:[#allocation13 + $0x20c] ss:$48 sps:$4 sm:$0xff]   ;;  %v5283_v30 = vld [vmem:[#allocation13 + $0x200] ss:$48 sps:$4 sm:$0xff]  }
  0xcc   :  { %1522 = vmatprep.subr.bf16.mxu0 %v5219_v31  ;;  %1565 = vmatprep.subr.bf16.mxu1 %v5222_v32  ;;  %v5286_v31 = vld [vmem:[#allocation13 + $0x208] ss:$48 sps:$4 sm:$0xff]   ;;  %v5291_v32 = vld [vmem:[#allocation13 + $0x264] ss:$48 sps:$4 sm:$0xff]  }
  0xcf   :  { %1523 = vmatpush1.bf16.msra.mxu0 %v5217_v33  ;;  %1566 = vmatpush1.bf16.msra.mxu1 %v5220_v34  ;;  %v5294_v33 = vld [vmem:[#allocation13 + $0x26c] ss:$48 sps:$4 sm:$0xff]   ;;  %v5289_v34 = vld [vmem:[#allocation13 + $0x260] ss:$48 sps:$4 sm:$0xff]  }
  0xd0   :  { %1524 = vmatprep.subr.bf16.mxu0 %v5225_v35  ;;  %1567 = vmatprep.subr.bf16.mxu1 %v5228_v36  ;;  %v5292_v35 = vld [vmem:[#allocation13 + $0x268] ss:$48 sps:$4 sm:$0xff]   ;;  %v5297_v36 = vld [vmem:[#allocation13 + $0x2c4] ss:$48 sps:$4 sm:$0xff]  }
  0xd3   :  { %1525 = vmatpush1.bf16.msra.mxu0 %v5223_v37  ;;  %1568 = vmatpush1.bf16.msra.mxu1 %v5226_v38  ;;  %v5300_v37 = vld [vmem:[#allocation13 + $0x2cc] ss:$48 sps:$4 sm:$0xff]   ;;  %v5295_v38 = vld [vmem:[#allocation13 + $0x2c0] ss:$48 sps:$4 sm:$0xff]  }
  0xd4   :  { %1526 = vmatprep.subr.bf16.mxu0 %v5231_v40  ;;  %1569 = vmatprep.subr.bf16.mxu1 %v5234_v41  ;;  %v5298_v40 = vld [vmem:[#allocation13 + $0x2c8] ss:$48 sps:$4 sm:$0xff]   ;;  %v5303_v41 = vld [vmem:[#allocation13 + $0x324] ss:$48 sps:$4 sm:$0xff]  }
  0xd7   :  { %1527 = vmatpush1.bf16.msra.mxu0 %v5229_v42  ;;  %1570 = vmatpush1.bf16.msra.mxu1 %v5232_v43  ;;  %v5306_v42 = vld [vmem:[#allocation13 + $0x32c] ss:$48 sps:$4 sm:$0xff]   ;;  %v5301_v43 = vld [vmem:[#allocation13 + $0x320] ss:$48 sps:$4 sm:$0xff]  }
  0xd8   :  { %1528 = vmatprep.subr.bf16.mxu0 %v5237_v44  ;;  %1571 = vmatprep.subr.bf16.mxu1 %v5240_v45  ;;  %v5304_v44 = vld [vmem:[#allocation13 + $0x328] ss:$48 sps:$4 sm:$0xff]   ;;  %v5309_v45 = vld [vmem:[#allocation13 + $0x384] ss:$48 sps:$4 sm:$0xff]  }
  0xdb   :  { %1529 = vmatpush1.bf16.msra.mxu0 %v5235_v46  ;;  %1572 = vmatpush1.bf16.msra.mxu1 %v5238_v47  ;;  %v5312_v46 = vld [vmem:[#allocation13 + $0x38c] ss:$48 sps:$4 sm:$0xff]   ;;  %v5307_v47 = vld [vmem:[#allocation13 + $0x380] ss:$48 sps:$4 sm:$0xff]  }
  0xdc   :  { %1530 = vmatprep.subr.bf16.mxu0 %v5243_v48  ;;  %1573 = vmatprep.subr.bf16.mxu1 %v5246_v49  ;;  %v5310_v48 = vld [vmem:[#allocation13 + $0x388] ss:$48 sps:$4 sm:$0xff]   ;;  %v5315_v49 = vld [vmem:[#allocation13 + $0x3e4] ss:$48 sps:$4 sm:$0xff]  }
  0xdf   :  { %1531 = vmatpush1.bf16.msra.mxu0 %v5241_v50  ;;  %1574 = vmatpush1.bf16.msra.mxu1 %v5244_v51  ;;  %v5318_v50 = vld [vmem:[#allocation13 + $0x3ec] ss:$48 sps:$4 sm:$0xff]   ;;  %v5313_v51 = vld [vmem:[#allocation13 + $0x3e0] ss:$48 sps:$4 sm:$0xff]  }
  0xe0   :  { %1532 = vmatprep.subr.bf16.mxu0 %v5249_v52  ;;  %1575 = vmatprep.subr.bf16.mxu1 %v5252_v53  ;;  %v5316_v52 = vld [vmem:[#allocation13 + $0x3e8] ss:$48 sps:$4 sm:$0xff]   ;;  %v5321_v53 = vld [vmem:[#allocation13 + $0x444] ss:$48 sps:$4 sm:$0xff]  }
  0xe3   :  { %1533 = vmatpush1.bf16.msra.mxu0 %v5247_v54  ;;  %1576 = vmatpush1.bf16.msra.mxu1 %v5250_v55  ;;  %v5324_v54 = vld [vmem:[#allocation13 + $0x44c] ss:$48 sps:$4 sm:$0xff]   ;;  %v5319_v55 = vld [vmem:[#allocation13 + $0x440] ss:$48 sps:$4 sm:$0xff]  }
  0xe4   :  { %1588 = vmatprep.subr.bf16.mxu0 %v5255_v56  ;;  %1631 = vmatprep.subr.bf16.mxu1 %v5258_v57  ;;  %v5322_v56 = vld [vmem:[#allocation13 + $0x448] ss:$48 sps:$4 sm:$0xff]   ;;  %v5327_v57 = vld [vmem:[#allocation13 + $0x4a4] ss:$48 sps:$4 sm:$0xff]  }
  0xe6   :  { %1535 = vmatmul.mubr.bf16.vlgmr.msra.gmra.mrb[4].mxu0 %v6068_v39  ;;  %1578 = vmatmul.mubr.bf16.vlgmr.msra.gmra.mrb[4].mxu1 %v6068_v39 }
  0xe7   :  { %1589 = vmatpush1.bf16.msra.mxu0 %v5253_v58  ;;  %1632 = vmatpush1.bf16.msra.mxu1 %v5256_v59  ;;  %v5330_v58 = vld [vmem:[#allocation13 + $0x4ac] ss:$48 sps:$4 sm:$0xff]   ;;  %v5325_v59 = vld [vmem:[#allocation13 + $0x4a0] ss:$48 sps:$4 sm:$0xff]  }
  0xe8   :  { %1590 = vmatprep.subr.bf16.mxu0 %v5261_v60  ;;  %1633 = vmatprep.subr.bf16.mxu1 %v5264_v61  ;;  %v5328_v60 = vld [vmem:[#allocation13 + $0x4a8] ss:$48 sps:$4 sm:$0xff]   ;;  %v5333_v61 = vld [vmem:[#allocation13 + $0x504] ss:$48 sps:$4 sm:$0xff]  }
  0xe9   :  { %1620 = vmatprep.mubr.bf16.mxu0 %v6058_v18  ;;  %1663 = vmatprep.mubr.bf16.mxu1 %v6058_v18  ;;  %v5280_v18 = vld [vmem:[#allocation13 + $0x1a8] ss:$48 sps:$4 sm:$0xff]  }
  0xeb   :  { %1591 = vmatpush1.bf16.msra.mxu0 %v5259_v62  ;;  %1634 = vmatpush1.bf16.msra.mxu1 %v5262_v63  ;;  %v5336_v62 = vld [vmem:[#allocation13 + $0x50c] ss:$48 sps:$4 sm:$0xff]   ;;  %v5331_v63 = vld [vmem:[#allocation13 + $0x500] ss:$48 sps:$4 sm:$0xff]  }
  0xec   :  { %1592 = vmatprep.subr.bf16.mxu0 %v5267_v16  ;;  %1635 = vmatprep.subr.bf16.mxu1 %v5270_v17  ;;  %v5334_v16 = vld [vmem:[#allocation13 + $0x508] ss:$48 sps:$4 sm:$0xff]   ;;  %v5339_v17 = vld [vmem:[#allocation13 + $0x564] ss:$48 sps:$4 sm:$0xff]  }
  0xef   :  { %1593 = vmatpush1.bf16.msra.mxu0 %v5265_v19  ;;  %1636 = vmatpush1.bf16.msra.mxu1 %v5268_v20  ;;  %v5342_v19 = vld [vmem:[#allocation13 + $0x56c] ss:$48 sps:$4 sm:$0xff]   ;;  %v5337_v20 = vld [vmem:[#allocation13 + $0x560] ss:$48 sps:$4 sm:$0xff]  }
  0xf0   :  { %1594 = vmatprep.subr.bf16.mxu0 %v5273_v21  ;;  %1637 = vmatprep.subr.bf16.mxu1 %v5276_v22  ;;  %v5340_v21 = vld [vmem:[#allocation13 + $0x568] ss:$48 sps:$4 sm:$0xff]   ;;  %v5345_v22 = vld [vmem:[#allocation13 + $0x5c4] ss:$48 sps:$4 sm:$0xff]  }
  0xf3   :  { %1595 = vmatpush1.bf16.msra.mxu0 %v5271_v23  ;;  %1638 = vmatpush1.bf16.msra.mxu1 %v5274_v24  ;;  %v5348_v23 = vld [vmem:[#allocation13 + $0x5cc] ss:$48 sps:$4 sm:$0xff]   ;;  %v5343_v24 = vld [vmem:[#allocation13 + $0x5c0] ss:$48 sps:$4 sm:$0xff]  }
  0xf4   :  { %1596 = vmatprep.subr.bf16.mxu0 %v5279_v25  ;;  %1639 = vmatprep.subr.bf16.mxu1 %v5282_v26  ;;  %v5346_v25 = vld [vmem:[#allocation13 + $0x5c8] ss:$48 sps:$4 sm:$0xff]   ;;  %v5351_v26 = vld [vmem:[#allocation10 + $0x4] ss:$24 sps:$4 sm:$0xff]  }
  0xf7   :  { %1597 = vmatpush1.bf16.msra.mxu0 %v5277_v27  ;;  %1640 = vmatpush1.bf16.msra.mxu1 %v5280_v18  ;;  %v5354_v27 = vld [vmem:[#allocation10 + $0xc] ss:$24 sps:$4 sm:$0xff]  }
  0xf8   :  { %1598 = vmatprep.subr.bf16.mxu0 %v5285_v28  ;;  %1641 = vmatprep.subr.bf16.mxu1 %v5288_v29  ;;  %v247_v18 = vld [vmem:[%s6484_s1 + $0x8] sm:$0xff]  ;;  %v249_v28 = vld [vmem:[%s6484_s1 + $0x18] sm:$0xff] }
  0xf9   :  { %v5349_v29 = vld [vmem:[#allocation10] ss:$24 sps:$4 sm:$0xff]  }
  0xfb   :  { %1599 = vmatpush1.bf16.msra.mxu0 %v5283_v30  ;;  %1642 = vmatpush1.bf16.msra.mxu1 %v5286_v31  ;;  %v5352_v30 = vld [vmem:[#allocation10 + $0x8] ss:$24 sps:$4 sm:$0xff]   ;;  %v5357_v31 = vld [vmem:[#allocation10 + $0x34] ss:$24 sps:$4 sm:$0xff]  }
  0xfc   :  { %1600 = vmatprep.subr.bf16.mxu0 %v5291_v32  ;;  %1643 = vmatprep.subr.bf16.mxu1 %v5294_v33  ;;  %v5360_v32 = vld [vmem:[#allocation10 + $0x3c] ss:$24 sps:$4 sm:$0xff]   ;;  %v6084_v33 = vpack.c.bf16 %v249_v28, %v247_v18  ;;  %v5418_v18 = vld [vmem:[#allocation10 + $0x218] ss:$24 sps:$4 sm:$0xff]  }
  0xfd   :  { %v5423_v28 = vld [vmem:[#allocation10 + $0x244] ss:$24 sps:$4 sm:$0xff]  }
  0xff   :  { %1601 = vmatpush1.bf16.msra.mxu0 %v5289_v34  ;;  %1644 = vmatpush1.bf16.msra.mxu1 %v5292_v35  ;;  %v5355_v34 = vld [vmem:[#allocation10 + $0x30] ss:$24 sps:$4 sm:$0xff]  }
 0x100   :  { %1602 = vmatprep.subr.bf16.mxu0 %v5297_v36  ;;  %1645 = vmatprep.subr.bf16.mxu1 %v5300_v37  ;;  %v5358_v35 = vld [vmem:[#allocation10 + $0x38] ss:$24 sps:$4 sm:$0xff]   ;;  %v5363_v36 = vld [vmem:[#allocation10 + $0x64] ss:$24 sps:$4 sm:$0xff]  }
 0x101   :  { %v5366_v37 = vld [vmem:[#allocation10 + $0x6c] ss:$24 sps:$4 sm:$0xff]  }
 0x103   :  { %1603 = vmatpush1.bf16.msra.mxu0 %v5295_v38  ;;  %1646 = vmatpush1.bf16.msra.mxu1 %v5298_v40  ;;  %v5361_v38 = vld [vmem:[#allocation10 + $0x60] ss:$24 sps:$4 sm:$0xff]  }
 0x104   :  { %1604 = vmatprep.subr.bf16.mxu0 %v5303_v41  ;;  %1647 = vmatprep.subr.bf16.mxu1 %v5306_v42  ;;  %v5364_v40 = vld [vmem:[#allocation10 + $0x68] ss:$24 sps:$4 sm:$0xff]   ;;  %v5369_v41 = vld [vmem:[#allocation10 + $0x94] ss:$24 sps:$4 sm:$0xff]  }
 0x105   :  { %v5367_v42 = vld [vmem:[#allocation10 + $0x90] ss:$24 sps:$4 sm:$0xff]  }
 0x107   :  { %1605 = vmatpush1.bf16.msra.mxu0 %v5301_v43  ;;  %1648 = vmatpush1.bf16.msra.mxu1 %v5304_v44  ;;  %v5370_v43 = vld [vmem:[#allocation10 + $0x98] ss:$24 sps:$4 sm:$0xff]   ;;  %v5375_v44 = vld [vmem:[#allocation10 + $0xc4] ss:$24 sps:$4 sm:$0xff]  }
 0x108   :  { %1606 = vmatprep.subr.bf16.mxu0 %v5309_v45  ;;  %1649 = vmatprep.subr.bf16.mxu1 %v5312_v46  ;;  %v5378_v45 = vld [vmem:[#allocation10 + $0xcc] ss:$24 sps:$4 sm:$0xff]   ;;  %v5373_v46 = vld [vmem:[#allocation10 + $0xc0] ss:$24 sps:$4 sm:$0xff]  }
 0x10b   :  { %1607 = vmatpush1.bf16.msra.mxu0 %v5307_v47  ;;  %1650 = vmatpush1.bf16.msra.mxu1 %v5310_v48  ;;  %v5376_v47 = vld [vmem:[#allocation10 + $0xc8] ss:$24 sps:$4 sm:$0xff]   ;;  %v5381_v48 = vld [vmem:[#allocation10 + $0xf4] ss:$24 sps:$4 sm:$0xff]  }
 0x10c   :  { %1608 = vmatprep.subr.bf16.mxu0 %v5315_v49  ;;  %1651 = vmatprep.subr.bf16.mxu1 %v5318_v50  ;;  %v5384_v49 = vld [vmem:[#allocation10 + $0xfc] ss:$24 sps:$4 sm:$0xff]   ;;  %v5379_v50 = vld [vmem:[#allocation10 + $0xf0] ss:$24 sps:$4 sm:$0xff]  }
 0x10f   :  { %1609 = vmatpush1.bf16.msra.mxu0 %v5313_v51  ;;  %1652 = vmatpush1.bf16.msra.mxu1 %v5316_v52  ;;  %v5382_v51 = vld [vmem:[#allocation10 + $0xf8] ss:$24 sps:$4 sm:$0xff]   ;;  %v5387_v52 = vld [vmem:[#allocation10 + $0x124] ss:$24 sps:$4 sm:$0xff]  }
 0x110   :  { %1610 = vmatprep.subr.bf16.mxu0 %v5321_v53  ;;  %1653 = vmatprep.subr.bf16.mxu1 %v5324_v54  ;;  %v5390_v53 = vld [vmem:[#allocation10 + $0x12c] ss:$24 sps:$4 sm:$0xff]   ;;  %v5385_v54 = vld [vmem:[#allocation10 + $0x120] ss:$24 sps:$4 sm:$0xff]  }
 0x113   :  { %1611 = vmatpush1.bf16.msra.mxu0 %v5319_v55  ;;  %1654 = vmatpush1.bf16.msra.mxu1 %v5322_v56  ;;  %v5388_v55 = vld [vmem:[#allocation10 + $0x128] ss:$24 sps:$4 sm:$0xff]   ;;  %v5393_v56 = vld [vmem:[#allocation10 + $0x154] ss:$24 sps:$4 sm:$0xff]  }
 0x114   :  { %1612 = vmatprep.subr.bf16.mxu0 %v5327_v57  ;;  %1655 = vmatprep.subr.bf16.mxu1 %v5330_v58  ;;  %v5396_v57 = vld [vmem:[#allocation10 + $0x15c] ss:$24 sps:$4 sm:$0xff]   ;;  %v5391_v58 = vld [vmem:[#allocation10 + $0x150] ss:$24 sps:$4 sm:$0xff]  }
 0x117   :  { %1613 = vmatpush1.bf16.msra.mxu0 %v5325_v59  ;;  %1656 = vmatpush1.bf16.msra.mxu1 %v5328_v60  ;;  %v5394_v59 = vld [vmem:[#allocation10 + $0x158] ss:$24 sps:$4 sm:$0xff]   ;;  %v5399_v60 = vld [vmem:[#allocation10 + $0x184] ss:$24 sps:$4 sm:$0xff]  }
 0x118   :  { %1614 = vmatprep.subr.bf16.mxu0 %v5333_v61  ;;  %1657 = vmatprep.subr.bf16.mxu1 %v5336_v62  ;;  %v5402_v61 = vld [vmem:[#allocation10 + $0x18c] ss:$24 sps:$4 sm:$0xff]   ;;  %v5397_v62 = vld [vmem:[#allocation10 + $0x180] ss:$24 sps:$4 sm:$0xff]  }
 0x11b   :  { %1615 = vmatpush1.bf16.msra.mxu0 %v5331_v63  ;;  %1658 = vmatpush1.bf16.msra.mxu1 %v5334_v16  ;;  %v5400_v63 = vld [vmem:[#allocation10 + $0x188] ss:$24 sps:$4 sm:$0xff]   ;;  %v5405_v16 = vld [vmem:[#allocation10 + $0x1b4] ss:$24 sps:$4 sm:$0xff]  }
 0x11c   :  { %1616 = vmatprep.subr.bf16.mxu0 %v5339_v17  ;;  %1659 = vmatprep.subr.bf16.mxu1 %v5342_v19  ;;  %v5408_v17 = vld [vmem:[#allocation10 + $0x1bc] ss:$24 sps:$4 sm:$0xff]   ;;  %v5403_v19 = vld [vmem:[#allocation10 + $0x1b0] ss:$24 sps:$4 sm:$0xff]  }
 0x11f   :  { %1617 = vmatpush1.bf16.msra.mxu0 %v5337_v20  ;;  %1660 = vmatpush1.bf16.msra.mxu1 %v5340_v21  ;;  %v5406_v20 = vld [vmem:[#allocation10 + $0x1b8] ss:$24 sps:$4 sm:$0xff]   ;;  %v5411_v21 = vld [vmem:[#allocation10 + $0x1e4] ss:$24 sps:$4 sm:$0xff]  }
 0x120   :  { %1618 = vmatprep.subr.bf16.mxu0 %v5345_v22  ;;  %1661 = vmatprep.subr.bf16.mxu1 %v5348_v23  ;;  %v5414_v22 = vld [vmem:[#allocation10 + $0x1ec] ss:$24 sps:$4 sm:$0xff]   ;;  %v5409_v23 = vld [vmem:[#allocation10 + $0x1e0] ss:$24 sps:$4 sm:$0xff]  }
 0x123   :  { %1619 = vmatpush1.bf16.msra.mxu0 %v5343_v24  ;;  %1662 = vmatpush1.bf16.msra.mxu1 %v5346_v25  ;;  %v5412_v24 = vld [vmem:[#allocation10 + $0x1e8] ss:$24 sps:$4 sm:$0xff]   ;;  %v5417_v25 = vld [vmem:[#allocation10 + $0x214] ss:$24 sps:$4 sm:$0xff]  }
 0x124   :  { %2250 = vmatprep.subr.bf16.mxu0 %v5351_v26  ;;  %2293 = vmatprep.subr.bf16.mxu1 %v5354_v27  ;;  %v5420_v26 = vld [vmem:[#allocation10 + $0x21c] ss:$24 sps:$4 sm:$0xff]   ;;  %v5415_v27 = vld [vmem:[#allocation10 + $0x210] ss:$24 sps:$4 sm:$0xff]  }
 0x126   :  { %1621 = vmatmul.mubr.bf16.vlgmr.msra.gmra.mrb[8].mxu0 %v6068_v39  ;;  %1664 = vmatmul.mubr.bf16.vlgmr.msra.gmra.mrb[8].mxu1 %v6068_v39  ;;  %v5372_v39 = vld [vmem:[#allocation10 + $0x9c] ss:$24 sps:$4 sm:$0xff]  }
 0x127   :  { %2251 = vmatpush1.bf16.msra.mxu0 %v5349_v29  ;;  %2294 = vmatpush1.bf16.msra.mxu1 %v5352_v30  ;;  %v5426_v29 = vld [vmem:[#allocation10 + $0x24c] ss:$24 sps:$4 sm:$0xff]   ;;  %v5421_v30 = vld [vmem:[#allocation10 + $0x240] ss:$24 sps:$4 sm:$0xff]  }
 0x128   :  { %2252 = vmatprep.subr.bf16.mxu0 %v5357_v31  ;;  %2295 = vmatprep.subr.bf16.mxu1 %v5360_v32  ;;  %v5424_v31 = vld [vmem:[#allocation10 + $0x248] ss:$24 sps:$4 sm:$0xff]   ;;  %v5429_v32 = vld [vmem:[#allocation10 + $0x274] ss:$24 sps:$4 sm:$0xff]  }
 0x129   :  { %2282 = vmatprep.mubr.bf16.mxu0 %v6084_v33  ;;  %2325 = vmatprep.mubr.bf16.mxu1 %v6084_v33 }
 0x12b   :  { %2253 = vmatpush1.bf16.msra.mxu0 %v5355_v34  ;;  %2296 = vmatpush1.bf16.msra.mxu1 %v5358_v35  ;;  %v5432_v34 = vld [vmem:[#allocation10 + $0x27c] ss:$24 sps:$4 sm:$0xff]   ;;  %v5427_v35 = vld [vmem:[#allocation10 + $0x270] ss:$24 sps:$4 sm:$0xff]  }
 0x12c   :  { %2254 = vmatprep.subr.bf16.mxu0 %v5363_v36  ;;  %2297 = vmatprep.subr.bf16.mxu1 %v5366_v37  ;;  %v5430_v36 = vld [vmem:[#allocation10 + $0x278] ss:$24 sps:$4 sm:$0xff]   ;;  %v5435_v37 = vld [vmem:[#allocation10 + $0x2a4] ss:$24 sps:$4 sm:$0xff]  }
 0x12f   :  { %2255 = vmatpush1.bf16.msra.mxu0 %v5361_v38  ;;  %2298 = vmatpush1.bf16.msra.mxu1 %v5364_v40  ;;  %v5438_v38 = vld [vmem:[#allocation10 + $0x2ac] ss:$24 sps:$4 sm:$0xff]   ;;  %v5433_v40 = vld [vmem:[#allocation10 + $0x2a0] ss:$24 sps:$4 sm:$0xff]  }
 0x130   :  { %2256 = vmatprep.subr.bf16.mxu0 %v5369_v41  ;;  %2299 = vmatprep.subr.bf16.mxu1 %v5372_v39  ;;  %v5436_v41 = vld [vmem:[#allocation10 + $0x2a8] ss:$24 sps:$4 sm:$0xff]   ;;  %v5441_v39 = vld [vmem:[#allocation10 + $0x2d4] ss:$24 sps:$4 sm:$0xff]  }
 0x133   :  { %2257 = vmatpush1.bf16.msra.mxu0 %v5367_v42  ;;  %2300 = vmatpush1.bf16.msra.mxu1 %v5370_v43  ;;  %v5439_v42 = vld [vmem:[#allocation10 + $0x2d0] ss:$24 sps:$4 sm:$0xff]   ;;  %v5444_v43 = vld [vmem:[#allocation10 + $0x2dc] ss:$24 sps:$4 sm:$0xff]  }
 0x134   :  { %2258 = vmatprep.subr.bf16.mxu0 %v5375_v44  ;;  %2301 = vmatprep.subr.bf16.mxu1 %v5378_v45  ;;  %v6093_v44 = vld [vmem:[%s6484_s1] sm:$0xff]  ;;  %v6098_v45 = vld [vmem:[%s6484_s1 + $0x10] sm:$0xff] }
 0x137   :  { %2259 = vmatpush1.bf16.msra.mxu0 %v5373_v46  ;;  %2302 = vmatpush1.bf16.msra.mxu1 %v5376_v47  ;;  %v5442_v46 = vld [vmem:[#allocation10 + $0x2d8] ss:$24 sps:$4 sm:$0xff]   ;;  %v5447_v47 = vld [vmem:[#allocation10 + $0x14] ss:$24 sps:$4 sm:$0xff]  }
 0x138   :  { %2260 = vmatprep.subr.bf16.mxu0 %v5381_v48  ;;  %2303 = vmatprep.subr.bf16.mxu1 %v5384_v49  ;;  %v5445_v48 = vld [vmem:[#allocation10 + $0x10] ss:$24 sps:$4 sm:$0xff]   ;;  %v5450_v49 = vld [vmem:[#allocation11 + $0x4] ss:$24 sps:$4 sm:$0xff]  }
 0x13b   :  { %2261 = vmatpush1.bf16.msra.mxu0 %v5379_v50  ;;  %2304 = vmatpush1.bf16.msra.mxu1 %v5382_v51  ;;  %v6102_v50 = vpack.c.bf16 %v6098_v45, %v6093_v44  ;;  %v6107_v51 = vld [vmem:[%s6485_s2 + $0x8] sm:$0xff] }
 0x13c   :  { %2262 = vmatprep.subr.bf16.mxu0 %v5387_v52  ;;  %2305 = vmatprep.subr.bf16.mxu1 %v5390_v53  ;;  %v6112_v52 = vld [vmem:[%s6485_s2 + $0x18] sm:$0xff] }
 0x13d   :  { %v5448_v53 = vld [vmem:[#allocation11] ss:$24 sps:$4 sm:$0xff]  }
 0x13f   :  { %2263 = vmatpush1.bf16.msra.mxu0 %v5385_v54  ;;  %2306 = vmatpush1.bf16.msra.mxu1 %v5388_v55  ;;  %v5453_v54 = vld [vmem:[#allocation10 + $0x44] ss:$24 sps:$4 sm:$0xff]   ;;  %v5456_v55 = vld [vmem:[#allocation11 + $0x34] ss:$24 sps:$4 sm:$0xff]  }
 0x140   :  { %2264 = vmatprep.subr.bf16.mxu0 %v5393_v56  ;;  %2307 = vmatprep.subr.bf16.mxu1 %v5396_v57  ;;  %v6117_v56 = vpack.c.bf16 %v6112_v52, %v6107_v51  ;;  %v5451_v57 = vld [vmem:[#allocation10 + $0x40] ss:$24 sps:$4 sm:$0xff]  }
 0x143   :  { %2265 = vmatpush1.bf16.msra.mxu0 %v5391_v58  ;;  %2308 = vmatpush1.bf16.msra.mxu1 %v5394_v59  ;;  %v5454_v58 = vld [vmem:[#allocation11 + $0x30] ss:$24 sps:$4 sm:$0xff]   ;;  %v5459_v59 = vld [vmem:[#allocation10 + $0x74] ss:$24 sps:$4 sm:$0xff]  }
 0x144   :  { %2266 = vmatprep.subr.bf16.mxu0 %v5399_v60  ;;  %2309 = vmatprep.subr.bf16.mxu1 %v5402_v61  ;;  %v5462_v60 = vld [vmem:[#allocation11 + $0x64] ss:$24 sps:$4 sm:$0xff]   ;;  %v5457_v61 = vld [vmem:[#allocation10 + $0x70] ss:$24 sps:$4 sm:$0xff]  }
 0x147   :  { %2267 = vmatpush1.bf16.msra.mxu0 %v5397_v62  ;;  %2310 = vmatpush1.bf16.msra.mxu1 %v5400_v63  ;;  %v5460_v62 = vld [vmem:[#allocation11 + $0x60] ss:$24 sps:$4 sm:$0xff]   ;;  %v5465_v63 = vld [vmem:[#allocation10 + $0xa4] ss:$24 sps:$4 sm:$0xff]  }
 0x148   :  { %2268 = vmatprep.subr.bf16.mxu0 %v5405_v16  ;;  %2311 = vmatprep.subr.bf16.mxu1 %v5408_v17  ;;  %v5468_v16 = vld [vmem:[#allocation11 + $0x94] ss:$24 sps:$4 sm:$0xff]   ;;  %v5463_v17 = vld [vmem:[#allocation10 + $0xa0] ss:$24 sps:$4 sm:$0xff]  }
 0x14b   :  { %2269 = vmatpush1.bf16.msra.mxu0 %v5403_v19  ;;  %2312 = vmatpush1.bf16.msra.mxu1 %v5406_v20  ;;  %v5466_v19 = vld [vmem:[#allocation11 + $0x90] ss:$24 sps:$4 sm:$0xff]   ;;  %v5471_v20 = vld [vmem:[#allocation10 + $0xd4] ss:$24 sps:$4 sm:$0xff]  }
 0x14c   :  { %2270 = vmatprep.subr.bf16.mxu0 %v5411_v21  ;;  %2313 = vmatprep.subr.bf16.mxu1 %v5414_v22  ;;  %v5474_v21 = vld [vmem:[#allocation11 + $0xc4] ss:$24 sps:$4 sm:$0xff]   ;;  %v5472_v22 = vld [vmem:[#allocation11 + $0xc0] ss:$24 sps:$4 sm:$0xff]  }
 0x14f   :  { %2271 = vmatpush1.bf16.msra.mxu0 %v5409_v23  ;;  %2314 = vmatpush1.bf16.msra.mxu1 %v5412_v24  ;;  %v5477_v23 = vld [vmem:[#allocation10 + $0x104] ss:$24 sps:$4 sm:$0xff]   ;;  %v5480_v24 = vld [vmem:[#allocation11 + $0xf4] ss:$24 sps:$4 sm:$0xff]  }
 0x150   :  { %2272 = vmatprep.subr.bf16.mxu0 %v5417_v25  ;;  %2315 = vmatprep.subr.bf16.mxu1 %v5420_v26  ;;  %v5475_v25 = vld [vmem:[#allocation10 + $0x100] ss:$24 sps:$4 sm:$0xff]   ;;  %v5478_v26 = vld [vmem:[#allocation11 + $0xf0] ss:$24 sps:$4 sm:$0xff]  }
 0x153   :  { %2273 = vmatpush1.bf16.msra.mxu0 %v5415_v27  ;;  %2316 = vmatpush1.bf16.msra.mxu1 %v5418_v18  ;;  %v5483_v27 = vld [vmem:[#allocation10 + $0x134] ss:$24 sps:$4 sm:$0xff]   ;;  %v5486_v18 = vld [vmem:[#allocation11 + $0x124] ss:$24 sps:$4 sm:$0xff]  }
 0x154   :  { %2274 = vmatprep.subr.bf16.mxu0 %v5423_v28  ;;  %2317 = vmatprep.subr.bf16.mxu1 %v5426_v29  ;;  %v5481_v28 = vld [vmem:[#allocation10 + $0x130] ss:$24 sps:$4 sm:$0xff]   ;;  %v5484_v29 = vld [vmem:[#allocation11 + $0x120] ss:$24 sps:$4 sm:$0xff]  }
 0x157   :  { %2275 = vmatpush1.bf16.msra.mxu0 %v5421_v30  ;;  %2318 = vmatpush1.bf16.msra.mxu1 %v5424_v31  ;;  %v5489_v30 = vld [vmem:[#allocation10 + $0x164] ss:$24 sps:$4 sm:$0xff]   ;;  %v5492_v31 = vld [vmem:[#allocation11 + $0x154] ss:$24 sps:$4 sm:$0xff]  }
 0x158   :  { %2276 = vmatprep.subr.bf16.mxu0 %v5429_v32  ;;  %2319 = vmatprep.subr.bf16.mxu1 %v5432_v34  ;;  %v5487_v32 = vld [vmem:[#allocation10 + $0x160] ss:$24 sps:$4 sm:$0xff]   ;;  %v5490_v34 = vld [vmem:[#allocation11 + $0x150] ss:$24 sps:$4 sm:$0xff]  }
 0x15b   :  { %2277 = vmatpush1.bf16.msra.mxu0 %v5427_v35  ;;  %2320 = vmatpush1.bf16.msra.mxu1 %v5430_v36  ;;  %v5495_v35 = vld [vmem:[#allocation10 + $0x194] ss:$24 sps:$4 sm:$0xff]   ;;  %v5498_v36 = vld [vmem:[#allocation11 + $0x184] ss:$24 sps:$4 sm:$0xff]  }
 0x15c   :  { %2278 = vmatprep.subr.bf16.mxu0 %v5435_v37  ;;  %2321 = vmatprep.subr.bf16.mxu1 %v5438_v38  ;;  %v5493_v37 = vld [vmem:[#allocation10 + $0x190] ss:$24 sps:$4 sm:$0xff]   ;;  %v5496_v38 = vld [vmem:[#allocation11 + $0x180] ss:$24 sps:$4 sm:$0xff]  }
 0x15f   :  { %2279 = vmatpush1.bf16.msra.mxu0 %v5433_v40  ;;  %2322 = vmatpush1.bf16.msra.mxu1 %v5436_v41  ;;  %v5501_v40 = vld [vmem:[#allocation10 + $0x1c4] ss:$24 sps:$4 sm:$0xff]   ;;  %v5504_v41 = vld [vmem:[#allocation11 + $0x1b4] ss:$24 sps:$4 sm:$0xff]  }
 0x160   :  { %2280 = vmatprep.subr.bf16.mxu0 %v5441_v39  ;;  %2323 = vmatprep.subr.bf16.mxu1 %v5444_v43  ;;  %v5499_v39 = vld [vmem:[#allocation10 + $0x1c0] ss:$24 sps:$4 sm:$0xff]   ;;  %v5507_v43 = vld [vmem:[#allocation10 + $0x1f4] ss:$24 sps:$4 sm:$0xff]  }
 0x163   :  { %2281 = vmatpush1.bf16.msra.mxu0 %v5439_v42  ;;  %2324 = vmatpush1.bf16.msra.mxu1 %v5442_v46  ;;  %v5502_v42 = vld [vmem:[#allocation11 + $0x1b0] ss:$24 sps:$4 sm:$0xff]   ;;  %v5510_v46 = vld [vmem:[#allocation11 + $0x1e4] ss:$24 sps:$4 sm:$0xff]  }
 0x164   :  { %2336 = vmatprep.subr.bf16.mxu0 %v5447_v47  ;;  %2999 = vmatprep.subr.bf16.mxu1 %v5450_v49  ;;  %v5505_v47 = vld [vmem:[#allocation10 + $0x1f0] ss:$24 sps:$4 sm:$0xff]   ;;  %v5513_v49 = vld [vmem:[#allocation10 + $0x224] ss:$24 sps:$4 sm:$0xff]  }
 0x166   :  { %2283 = vmatmul.mubr.bf16.vlgmr.msra.gmra.mrb[0].mxu0 %v6102_v50  ;;  %2326 = vmatmul.mubr.bf16.vlgmr.msra.gmra.mrb[0].mxu1 %v6102_v50 }
 0x167   :  { %2337 = vmatpush1.bf16.msra.mxu0 %v5445_v48  ;;  %3000 = vmatpush1.bf16.msra.mxu1 %v5448_v53  ;;  %v5508_v48 = vld [vmem:[#allocation11 + $0x1e0] ss:$24 sps:$4 sm:$0xff]   ;;  %v5516_v53 = vld [vmem:[#allocation11 + $0x214] ss:$24 sps:$4 sm:$0xff]  }
 0x168   :  { %2338 = vmatprep.subr.bf16.mxu0 %v5453_v54  ;;  %3001 = vmatprep.subr.bf16.mxu1 %v5456_v55  ;;  %v5511_v54 = vld [vmem:[#allocation10 + $0x220] ss:$24 sps:$4 sm:$0xff]   ;;  %v5514_v55 = vld [vmem:[#allocation11 + $0x210] ss:$24 sps:$4 sm:$0xff]  }
 0x169   :  { %2368 = vmatprep.mubr.bf16.mxu0 %v6084_v33  ;;  %3031 = vmatprep.mubr.bf16.mxu1 %v6117_v56  ;;  %v5469_v33 = vld [vmem:[#allocation10 + $0xd0] ss:$24 sps:$4 sm:$0xff]  }
 0x16b   :  { %2339 = vmatpush1.bf16.msra.mxu0 %v5451_v57  ;;  %3002 = vmatpush1.bf16.msra.mxu1 %v5454_v58  ;;  %v5519_v57 = vld [vmem:[#allocation10 + $0x254] ss:$24 sps:$4 sm:$0xff]   ;;  %v5522_v58 = vld [vmem:[#allocation11 + $0x244] ss:$24 sps:$4 sm:$0xff]  }
 0x16c   :  { %2340 = vmatprep.subr.bf16.mxu0 %v5459_v59  ;;  %3003 = vmatprep.subr.bf16.mxu1 %v5462_v60  ;;  %v5517_v59 = vld [vmem:[#allocation10 + $0x250] ss:$24 sps:$4 sm:$0xff]   ;;  %v5520_v60 = vld [vmem:[#allocation11 + $0x240] ss:$24 sps:$4 sm:$0xff]  }
 0x16f   :  { %2341 = vmatpush1.bf16.msra.mxu0 %v5457_v61  ;;  %3004 = vmatpush1.bf16.msra.mxu1 %v5460_v62  ;;  %v5525_v61 = vld [vmem:[#allocation10 + $0x284] ss:$24 sps:$4 sm:$0xff]   ;;  %v5528_v62 = vld [vmem:[#allocation11 + $0x274] ss:$24 sps:$4 sm:$0xff]  }
 0x170   :  { %2342 = vmatprep.subr.bf16.mxu0 %v5465_v63  ;;  %3005 = vmatprep.subr.bf16.mxu1 %v5468_v16  ;;  %v5523_v63 = vld [vmem:[#allocation10 + $0x280] ss:$24 sps:$4 sm:$0xff]   ;;  %v5526_v16 = vld [vmem:[#allocation11 + $0x270] ss:$24 sps:$4 sm:$0xff]  }
 0x173   :  { %2343 = vmatpush1.bf16.msra.mxu0 %v5463_v17  ;;  %3006 = vmatpush1.bf16.msra.mxu1 %v5466_v19  ;;  %v5531_v17 = vld [vmem:[#allocation10 + $0x2b4] ss:$24 sps:$4 sm:$0xff]   ;;  %v5534_v19 = vld [vmem:[#allocation11 + $0x2a4] ss:$24 sps:$4 sm:$0xff]  }
 0x174   :  { %2344 = vmatprep.subr.bf16.mxu0 %v5471_v20  ;;  %3007 = vmatprep.subr.bf16.mxu1 %v5474_v21  ;;  %v5529_v20 = vld [vmem:[#allocation10 + $0x2b0] ss:$24 sps:$4 sm:$0xff]   ;;  %v5532_v21 = vld [vmem:[#allocation11 + $0x2a0] ss:$24 sps:$4 sm:$0xff]  }
 0x177   :  { %2345 = vmatpush1.bf16.msra.mxu0 %v5469_v33  ;;  %3008 = vmatpush1.bf16.msra.mxu1 %v5472_v22  ;;  %v5537_v33 = vld [vmem:[#allocation10 + $0x2e4] ss:$24 sps:$4 sm:$0xff]   ;;  %v5540_v22 = vld [vmem:[#allocation11 + $0x2d4] ss:$24 sps:$4 sm:$0xff]  }
 0x178   :  { %2346 = vmatprep.subr.bf16.mxu0 %v5477_v23  ;;  %3009 = vmatprep.subr.bf16.mxu1 %v5480_v24  ;;  %v5535_v23 = vld [vmem:[#allocation10 + $0x2e0] ss:$24 sps:$4 sm:$0xff]   ;;  %v5538_v24 = vld [vmem:[#allocation11 + $0x2d0] ss:$24 sps:$4 sm:$0xff]  }
 0x17b   :  { %2347 = vmatpush1.bf16.msra.mxu0 %v5475_v25  ;;  %3010 = vmatpush1.bf16.msra.mxu1 %v5478_v26  ;;  %v6125_v25 = vld [vmem:[%s6485_s2] sm:$0xff]  ;;  %v6130_v26 = vld [vmem:[%s6485_s2 + $0x10] sm:$0xff] }
 0x17c   :  { %2348 = vmatprep.subr.bf16.mxu0 %v5483_v27  ;;  %3011 = vmatprep.subr.bf16.mxu1 %v5486_v18  ;;  %v5543_v27 = vld [vmem:[#allocation11 + $0xc] ss:$24 sps:$4 sm:$0xff]  }
 0x17d   :  { %v5546_v18 = vld [vmem:[#allocation11 + $0x14] ss:$24 sps:$4 sm:$0xff]  }
 0x17f   :  { %2349 = vmatpush1.bf16.msra.mxu0 %v5481_v28  ;;  %3012 = vmatpush1.bf16.msra.mxu1 %v5484_v29  ;;  %v6134_v28 = vpack.c.bf16 %v6130_v26, %v6125_v25  ;;  %v5541_v29 = vld [vmem:[#allocation11 + $0x8] ss:$24 sps:$4 sm:$0xff]  }
 0x180   :  { %2350 = vmatprep.subr.bf16.mxu0 %v5489_v30  ;;  %3013 = vmatprep.subr.bf16.mxu1 %v5492_v31  ;;  %v5544_v30 = vld [vmem:[#allocation11 + $0x10] ss:$24 sps:$4 sm:$0xff]   ;;  %v5549_v31 = vld [vmem:[#allocation11 + $0x3c] ss:$24 sps:$4 sm:$0xff]  }
 0x183   :  { %2351 = vmatpush1.bf16.msra.mxu0 %v5487_v32  ;;  %3014 = vmatpush1.bf16.msra.mxu1 %v5490_v34  ;;  %v5552_v32 = vld [vmem:[#allocation11 + $0x44] ss:$24 sps:$4 sm:$0xff]   ;;  %v5547_v34 = vld [vmem:[#allocation11 + $0x38] ss:$24 sps:$4 sm:$0xff]  }
 0x184   :  { %2352 = vmatprep.subr.bf16.mxu0 %v5495_v35  ;;  %3015 = vmatprep.subr.bf16.mxu1 %v5498_v36  ;;  %v5550_v35 = vld [vmem:[#allocation11 + $0x40] ss:$24 sps:$4 sm:$0xff]   ;;  %v5555_v36 = vld [vmem:[#allocation11 + $0x6c] ss:$24 sps:$4 sm:$0xff]  }
 0x187   :  { %2353 = vmatpush1.bf16.msra.mxu0 %v5493_v37  ;;  %3016 = vmatpush1.bf16.msra.mxu1 %v5496_v38  ;;  %v5558_v37 = vld [vmem:[#allocation11 + $0x74] ss:$24 sps:$4 sm:$0xff]   ;;  %v5553_v38 = vld [vmem:[#allocation11 + $0x68] ss:$24 sps:$4 sm:$0xff]  }
 0x188   :  { %2354 = vmatprep.subr.bf16.mxu0 %v5501_v40  ;;  %3017 = vmatprep.subr.bf16.mxu1 %v5504_v41  ;;  %v5556_v40 = vld [vmem:[#allocation11 + $0x70] ss:$24 sps:$4 sm:$0xff]   ;;  %v5564_v41 = vld [vmem:[#allocation11 + $0xa4] ss:$24 sps:$4 sm:$0xff]  }
 0x18b   :  { %2355 = vmatpush1.bf16.msra.mxu0 %v5499_v39  ;;  %3018 = vmatpush1.bf16.msra.mxu1 %v5502_v42  ;;  %v5559_v39 = vld [vmem:[#allocation11 + $0x98] ss:$24 sps:$4 sm:$0xff]  }
 0x18c   :  { %2356 = vmatprep.subr.bf16.mxu0 %v5507_v43  ;;  %3019 = vmatprep.subr.bf16.mxu1 %v5510_v46  ;;  %v5562_v42 = vld [vmem:[#allocation11 + $0xa0] ss:$24 sps:$4 sm:$0xff]   ;;  %v5567_v43 = vld [vmem:[#allocation11 + $0xcc] ss:$24 sps:$4 sm:$0xff]  }
 0x18d   :  { %v5570_v46 = vld [vmem:[#allocation11 + $0xd4] ss:$24 sps:$4 sm:$0xff]  }
 0x18f   :  { %2357 = vmatpush1.bf16.msra.mxu0 %v5505_v47  ;;  %3020 = vmatpush1.bf16.msra.mxu1 %v5508_v48  ;;  %v5565_v47 = vld [vmem:[#allocation11 + $0xc8] ss:$24 sps:$4 sm:$0xff]   ;;  %v5573_v48 = vld [vmem:[#allocation11 + $0xfc] ss:$24 sps:$4 sm:$0xff]  }
 0x190   :  { %2358 = vmatprep.subr.bf16.mxu0 %v5513_v49  ;;  %3021 = vmatprep.subr.bf16.mxu1 %v5516_v53  ;;  %v5576_v49 = vld [vmem:[#allocation11 + $0x104] ss:$24 sps:$4 sm:$0xff]   ;;  %v5571_v53 = vld [vmem:[#allocation11 + $0xf8] ss:$24 sps:$4 sm:$0xff]  }
 0x193   :  { %2359 = vmatpush1.bf16.msra.mxu0 %v5511_v54  ;;  %3022 = vmatpush1.bf16.msra.mxu1 %v5514_v55  ;;  %v5574_v54 = vld [vmem:[#allocation11 + $0x100] ss:$24 sps:$4 sm:$0xff]   ;;  %v5579_v55 = vld [vmem:[#allocation11 + $0x12c] ss:$24 sps:$4 sm:$0xff]  }
 0x194   :  { %2360 = vmatprep.subr.bf16.mxu0 %v5519_v57  ;;  %3023 = vmatprep.subr.bf16.mxu1 %v5522_v58  ;;  %v5582_v57 = vld [vmem:[#allocation11 + $0x134] ss:$24 sps:$4 sm:$0xff]   ;;  %v5577_v58 = vld [vmem:[#allocation11 + $0x128] ss:$24 sps:$4 sm:$0xff]  }
 0x197   :  { %2361 = vmatpush1.bf16.msra.mxu0 %v5517_v59  ;;  %3024 = vmatpush1.bf16.msra.mxu1 %v5520_v60  ;;  %v5580_v59 = vld [vmem:[#allocation11 + $0x130] ss:$24 sps:$4 sm:$0xff]   ;;  %v5585_v60 = vld [vmem:[#allocation11 + $0x15c] ss:$24 sps:$4 sm:$0xff]  }
 0x198   :  { %2362 = vmatprep.subr.bf16.mxu0 %v5525_v61  ;;  %3025 = vmatprep.subr.bf16.mxu1 %v5528_v62  ;;  %v5588_v61 = vld [vmem:[#allocation11 + $0x164] ss:$24 sps:$4 sm:$0xff]   ;;  %v5583_v62 = vld [vmem:[#allocation11 + $0x158] ss:$24 sps:$4 sm:$0xff]  }
 0x19b   :  { %2363 = vmatpush1.bf16.msra.mxu0 %v5523_v63  ;;  %3026 = vmatpush1.bf16.msra.mxu1 %v5526_v16  ;;  %v5586_v63 = vld [vmem:[#allocation11 + $0x160] ss:$24 sps:$4 sm:$0xff]   ;;  %v5591_v16 = vld [vmem:[#allocation11 + $0x18c] ss:$24 sps:$4 sm:$0xff]  }
 0x19c   :  { %2364 = vmatprep.subr.bf16.mxu0 %v5531_v17  ;;  %3027 = vmatprep.subr.bf16.mxu1 %v5534_v19  ;;  %v5594_v17 = vld [vmem:[#allocation11 + $0x194] ss:$24 sps:$4 sm:$0xff]   ;;  %v5589_v19 = vld [vmem:[#allocation11 + $0x188] ss:$24 sps:$4 sm:$0xff]  }
 0x19f   :  { %2365 = vmatpush1.bf16.msra.mxu0 %v5529_v20  ;;  %3028 = vmatpush1.bf16.msra.mxu1 %v5532_v21  ;;  %v5592_v20 = vld [vmem:[#allocation11 + $0x190] ss:$24 sps:$4 sm:$0xff]   ;;  %v5597_v21 = vld [vmem:[#allocation11 + $0x1bc] ss:$24 sps:$4 sm:$0xff]  }
 0x1a0   :  { %2366 = vmatprep.subr.bf16.mxu0 %v5537_v33  ;;  %3029 = vmatprep.subr.bf16.mxu1 %v5540_v22  ;;  %v5600_v33 = vld [vmem:[#allocation11 + $0x1c4] ss:$24 sps:$4 sm:$0xff]   ;;  %v5595_v22 = vld [vmem:[#allocation11 + $0x1b8] ss:$24 sps:$4 sm:$0xff]  }
 0x1a3   :  { %2367 = vmatpush1.bf16.msra.mxu0 %v5535_v23  ;;  %3030 = vmatpush1.bf16.msra.mxu1 %v5538_v24  ;;  %v5598_v23 = vld [vmem:[#allocation11 + $0x1c0] ss:$24 sps:$4 sm:$0xff]   ;;  %v5603_v24 = vld [vmem:[#allocation11 + $0x1ec] ss:$24 sps:$4 sm:$0xff]  }
 0x1a4   :  { %3042 = vmatprep.subr.bf16.mxu0 %v5543_v27  ;;  %3085 = vmatprep.subr.bf16.mxu1 %v5546_v18  ;;  %v5606_v27 = vld [vmem:[#allocation11 + $0x1f4] ss:$24 sps:$4 sm:$0xff]   ;;  %v5601_v18 = vld [vmem:[#allocation11 + $0x1e8] ss:$24 sps:$4 sm:$0xff]  }
 0x1a6   :  { %2369 = vmatmul.mubr.bf16.vlgmr.msra.gmra.mrb[4].mxu0 %v6102_v50  ;;  %3032 = vmatmul.mubr.bf16.vlgmr.msra.gmra.mrb[4].mxu1 %v6134_v28  ;;  %v5561_v50 = vld [vmem:[#allocation11 + $0x9c] ss:$24 sps:$4 sm:$0xff]  }
 0x1a7   :  { %3043 = vmatpush1.bf16.msra.mxu0 %v5541_v29  ;;  %3086 = vmatpush1.bf16.msra.mxu1 %v5544_v30  ;;  %v5604_v29 = vld [vmem:[#allocation11 + $0x1f0] ss:$24 sps:$4 sm:$0xff]   ;;  %v5609_v30 = vld [vmem:[#allocation11 + $0x21c] ss:$24 sps:$4 sm:$0xff]  }
 0x1a8   :  { %3044 = vmatprep.subr.bf16.mxu0 %v5549_v31  ;;  %3087 = vmatprep.subr.bf16.mxu1 %v5552_v32  ;;  %v5612_v31 = vld [vmem:[#allocation11 + $0x224] ss:$24 sps:$4 sm:$0xff]   ;;  %v5607_v32 = vld [vmem:[#allocation11 + $0x218] ss:$24 sps:$4 sm:$0xff]  }
 0x1a9   :  { %3074 = vmatprep.mubr.bf16.mxu0 %v6117_v56  ;;  %3117 = vmatprep.mubr.bf16.mxu1 %v6117_v56  ;;  %v5568_v56 = vld [vmem:[#allocation11 + $0xd0] ss:$24 sps:$4 sm:$0xff]  }
 0x1ab   :  { %3045 = vmatpush1.bf16.msra.mxu0 %v5547_v34  ;;  %3088 = vmatpush1.bf16.msra.mxu1 %v5550_v35  ;;  %v5610_v34 = vld [vmem:[#allocation11 + $0x220] ss:$24 sps:$4 sm:$0xff]   ;;  %v5615_v35 = vld [vmem:[#allocation11 + $0x24c] ss:$24 sps:$4 sm:$0xff]  }
 0x1ac   :  { %3046 = vmatprep.subr.bf16.mxu0 %v5555_v36  ;;  %3089 = vmatprep.subr.bf16.mxu1 %v5558_v37  ;;  %v5618_v36 = vld [vmem:[#allocation11 + $0x254] ss:$24 sps:$4 sm:$0xff]   ;;  %v5613_v37 = vld [vmem:[#allocation11 + $0x248] ss:$24 sps:$4 sm:$0xff]  }
 0x1af   :  { %3047 = vmatpush1.bf16.msra.mxu0 %v5553_v38  ;;  %3090 = vmatpush1.bf16.msra.mxu1 %v5556_v40  ;;  %v5616_v38 = vld [vmem:[#allocation11 + $0x250] ss:$24 sps:$4 sm:$0xff]   ;;  %v5621_v40 = vld [vmem:[#allocation11 + $0x27c] ss:$24 sps:$4 sm:$0xff]  }
 0x1b0   :  { %3048 = vmatprep.subr.bf16.mxu0 %v5561_v50  ;;  %3091 = vmatprep.subr.bf16.mxu1 %v5564_v41  ;;  %v5624_v50 = vld [vmem:[#allocation11 + $0x284] ss:$24 sps:$4 sm:$0xff]   ;;  %v5619_v41 = vld [vmem:[#allocation11 + $0x278] ss:$24 sps:$4 sm:$0xff]  }
 0x1b3   :  { %3049 = vmatpush1.bf16.msra.mxu0 %v5559_v39  ;;  %3092 = vmatpush1.bf16.msra.mxu1 %v5562_v42  ;;  %v5622_v39 = vld [vmem:[#allocation11 + $0x280] ss:$24 sps:$4 sm:$0xff]   ;;  %v5627_v42 = vld [vmem:[#allocation11 + $0x2ac] ss:$24 sps:$4 sm:$0xff]  }
 0x1b4   :  { %3050 = vmatprep.subr.bf16.mxu0 %v5567_v43  ;;  %3093 = vmatprep.subr.bf16.mxu1 %v5570_v46  ;;  %v5630_v43 = vld [vmem:[#allocation11 + $0x2b4] ss:$24 sps:$4 sm:$0xff]   ;;  %v5625_v46 = vld [vmem:[#allocation11 + $0x2a8] ss:$24 sps:$4 sm:$0xff]  }
 0x1b7   :  { %3051 = vmatpush1.bf16.msra.mxu0 %v5565_v47  ;;  %3094 = vmatpush1.bf16.msra.mxu1 %v5568_v56  ;;  %v5628_v47 = vld [vmem:[#allocation11 + $0x2b0] ss:$24 sps:$4 sm:$0xff]   ;;  %v5633_v56 = vld [vmem:[#allocation11 + $0x2dc] ss:$24 sps:$4 sm:$0xff]  }
 0x1b8   :  { %3052 = vmatprep.subr.bf16.mxu0 %v5573_v48  ;;  %3095 = vmatprep.subr.bf16.mxu1 %v5576_v49  ;;  %v5636_v48 = vld [vmem:[#allocation11 + $0x2e4] ss:$24 sps:$4 sm:$0xff]   ;;  %v5631_v49 = vld [vmem:[#allocation11 + $0x2d8] ss:$24 sps:$4 sm:$0xff]  }
 0x1bb   :  { %3053 = vmatpush1.bf16.msra.mxu0 %v5571_v53  ;;  %3096 = vmatpush1.bf16.msra.mxu1 %v5574_v54  ;;  %v5634_v53 = vld [vmem:[#allocation11 + $0x2e0] ss:$24 sps:$4 sm:$0xff]   ;;  %v2381_v54 = vlaneseq }
 0x1bc   :  { %3054 = vmatprep.subr.bf16.mxu0 %v5579_v55  ;;  %3097 = vmatprep.subr.bf16.mxu1 %v5582_v57 }
 0x1bd   :  { %v6142_v55 = vshrl.u32 %v2381_v54, 7 }
 0x1bf   :  { %3055 = vmatpush1.bf16.msra.mxu0 %v5577_v58  ;;  %3098 = vmatpush1.bf16.msra.mxu1 %v5580_v59  ;;  %6512 = vst [vmem:[#allocation33_spill] sm:$0xff] %v6142_v55  ;;  %v6145_v57 = vsub.s32 1, %v6142_v55  ;;  %v2379_v58 = vld [vmem:[%s6490_s7] sm:$0x3f]  ;;  %v6151_v59 = vsub.s32 3, %v6142_v55 }
 0x1c0   :  { %3056 = vmatprep.subr.bf16.mxu0 %v5585_v60  ;;  %3099 = vmatprep.subr.bf16.mxu1 %v5588_v61  ;;  %v6154_v60 = vsub.s32 2, %v6142_v55 }
 0x1c1   :  { %v2388_v61 = vrot.slane %v2379_v58, %v6145_v57 }
 0x1c3   :  { %3057 = vmatpush1.bf16.msra.mxu0 %v5583_v62  ;;  %3100 = vmatpush1.bf16.msra.mxu1 %v5586_v63  ;;  %v2396_v62 = vrot.slane %v2379_v58, %v6151_v59 }
 0x1c4   :  { %3058 = vmatprep.subr.bf16.mxu0 %v5591_v16  ;;  %3101 = vmatprep.subr.bf16.mxu1 %v5594_v17  ;;  %v2392_v16 = vrot.slane %v2379_v58, %v6154_v60 }
 0x1c7   :  { %3059 = vmatpush1.bf16.msra.mxu0 %v5589_v19  ;;  %3102 = vmatpush1.bf16.msra.mxu1 %v5592_v20 }
 0x1c8   :  { %3060 = vmatprep.subr.bf16.mxu0 %v5597_v21  ;;  %3103 = vmatprep.subr.bf16.mxu1 %v5600_v33 }
 0x1cb   :  { %3061 = vmatpush1.bf16.msra.mxu0 %v5595_v22  ;;  %3104 = vmatpush1.bf16.msra.mxu1 %v5598_v23 }
 0x1cc   :  { %3062 = vmatprep.subr.bf16.mxu0 %v5603_v24  ;;  %3105 = vmatprep.subr.bf16.mxu1 %v5606_v27 }
 0x1cf   :  { %3063 = vmatpush1.bf16.msra.mxu0 %v5601_v18  ;;  %3106 = vmatpush1.bf16.msra.mxu1 %v5604_v29 }
 0x1d0   :  { %3064 = vmatprep.subr.bf16.mxu0 %v5609_v30  ;;  %3107 = vmatprep.subr.bf16.mxu1 %v5612_v31 }
 0x1d3   :  { %3065 = vmatpush1.bf16.msra.mxu0 %v5607_v32  ;;  %3108 = vmatpush1.bf16.msra.mxu1 %v5610_v34 }
 0x1d4   :  { %3066 = vmatprep.subr.bf16.mxu0 %v5615_v35  ;;  %3109 = vmatprep.subr.bf16.mxu1 %v5618_v36  ;;  %v6164_v36 = vsub.s32 5, %v6142_v55 }
 0x1d7   :  { %3067 = vmatpush1.bf16.msra.mxu0 %v5613_v37  ;;  %3110 = vmatpush1.bf16.msra.mxu1 %v5616_v38  ;;  %v6167_v37 = vsub.s32 4, %v6142_v55  ;;  %v2404_v38 = vrot.slane %v2379_v58, %v6164_v36 }
 0x1d8   :  { %3068 = vmatprep.subr.bf16.mxu0 %v5621_v40  ;;  %3111 = vmatprep.subr.bf16.mxu1 %v5624_v50 }
 0x1d9   :  { %v2400_v40 = vrot.slane %v2379_v58, %v6167_v37 }
 0x1db   :  { %3069 = vmatpush1.bf16.msra.mxu0 %v5619_v41  ;;  %3112 = vmatpush1.bf16.msra.mxu1 %v5622_v39 }
 0x1dc   :  { %3070 = vmatprep.subr.bf16.mxu0 %v5627_v42  ;;  %3113 = vmatprep.subr.bf16.mxu1 %v5630_v43 }
 0x1df   :  { %3071 = vmatpush1.bf16.msra.mxu0 %v5625_v46  ;;  %3114 = vmatpush1.bf16.msra.mxu1 %v5628_v47 }
 0x1e0   :  { %3072 = vmatprep.subr.bf16.mxu0 %v5633_v56  ;;  %3115 = vmatprep.subr.bf16.mxu1 %v5636_v48 }
 0x1e3   :  { %3073 = vmatpush1.bf16.msra.mxu0 %v5631_v49  ;;  %3116 = vmatpush1.bf16.msra.mxu1 %v5634_v53 }
 0x1e6   :  { %3075 = vmatmul.mubr.bf16.vlgmr.msra.gmra.mrb[8].mxu0 %v6134_v28  ;;  %3118 = vmatmul.mubr.bf16.vlgmr.msra.gmra.mrb[8].mxu1 %v6134_v28  ;;  %v6158_v28 = vsub.s32 0, %v6142_v55 }
 0x1e8   :  { %v2384_v22 = vrot.slane %v2379_v58, %v6158_v28  ;;  %v6184_v58 = vld [vmem:[%s6492_s9] sm:$0xff] }
 0x239   :  { %v2284_v63 = vpop.f32.mrb[0].mxu0  ;;  %v2327_v17 = vpop.f32.mrb[0].mxu1 }
 0x23a   :  { %v2286_v19 = vpop.f32.mrb[1].mxu0  ;;  %v2329_v21 = vpop.f32.mrb[1].mxu1  ;;  %v2413_v18 = vadd.f32 %v2392_v16, %v2327_v17  ;;  %v2411_v31 = vadd.f32 %v2384_v22, %v2284_v63 }
 0x23b   :  { %v2412_v20 = vadd.f32 %v2388_v61, %v2286_v19  ;;  %v2288_v33 = vpop.f32.mrb[2].mxu0  ;;  %v2414_v23 = vadd.f32 %v2396_v62, %v2329_v21  ;;  %v2331_v24 = vpop.f32.mrb[2].mxu1 }
 0x23c   :  { %v2290_v27 = vpop.f32.mrb[3].mxu0  ;;  %v2333_v29 = vpop.f32.mrb[3].mxu1  ;;  %v2419_v32 = vadd.f32 %v2392_v16, %v2331_v24  ;;  %v2417_v35 = vadd.f32 %v2384_v22, %v2288_v33  ;;  %v3196_v16 = vrot.slane %v6184_v58, %v6145_v57  ;;  %v6209_v33 = vld [vmem:[%s6486_s3] sm:$0xff] }
 0x23d   :  { %3292 = vmatprep.mubr.f32.mxu0 %v2412_v20  ;;  %v2420_v30 = vadd.f32 %v2396_v62, %v2333_v29  ;;  %3228 = vmatprep.subr.mxu0 %v2414_v23  ;;  %v2418_v34 = vadd.f32 %v2388_v61, %v2290_v27  ;;  %v6189_v61 = vld [vmem:[%s6492_s9 + $0x8] sm:$0xff]  ;;  %v3178_v62 = vrot.slane %v6184_v58, %v6158_v28  ;;  %v6221_v29 = vld [vmem:[%s6491_s8] sm:$0x3f] }
 0x23e   :  { %3229 = vmatpush1.xpose.msra.mxu0 %v2413_v18  ;;  %v3182_v63 = vrot.slane %v6189_v61, %v6158_v28  ;;  %v3200_v17 = vrot.slane %v6189_v61, %v6145_v57  ;;  %v6203_v20 = vld [vmem:[%s6484_s1 + $0x8] sm:$0xff]  ;;  %v3201_v22 = vmul.f32 %v6209_v33, %v3196_v16 }
 0x23f   :  { %3298 = vmatprep.subr.mxu0 %v2420_v30  ;;  %v3183_v19 = vmul.f32 %v3178_v62, %v6093_v44  ;;  %v6215_v23 = vld [vmem:[%s6486_s3 + $0x8] sm:$0xff]  ;;  %v3149_v30 = vrot.slane %v6221_v29, %v6167_v37 }
 0x240   :  { %v3184_v21 = vmul.f32 %v6203_v20, %v3182_v63  ;;  %v3202_v24 = vmul.f32 %v6215_v23, %v3200_v17 }
 0x241   :  { %3293 = vmatmul.mubr.f32.vlgmr.msra.gmra.mrb[12].mxu0 %v2411_v31  ;;  %v3153_v31 = vrot.slane %v6221_v29, %v6164_v36 }
 0x242   :  { %3299 = vmatpush1.xpose.msra.mxu0 %v2419_v32  ;;  %3362 = vmatprep.mubr.f32.mxu0 %v2418_v34  ;;  %v3187_v27 = vadd.f32 %v3184_v21, %v3183_v19  ;;  %v3205_v18 = vadd.f32 %v3202_v24, %v3201_v22 }
 0x244   :  { %3188 = vadd.xlane.f32.xlu1 %v3187_v27 }
 0x245   :  { %3363 = vmatmul.mubr.f32.vlgmr.msra.gmra.mrb[14].mxu0 %v2417_v35 }
 0x248   :  { %3206 = vadd.xlane.f32.xlu1 %v3205_v18 }
 0x279   :  { %v2370_v50 = vpop.f32.mrb[4].mxu0  ;;  %v6171_v41 = vpop.f32.mrb[4].mxu1 }
 0x27a   :  { %v2372_v39 = vpop.f32.mrb[5].mxu0  ;;  %v6173_v43 = vpop.f32.mrb[5].mxu1  ;;  %v2415_v47 = vadd.f32 %v2400_v40, %v2370_v50 }
 0x27b   :  { %v2416_v42 = vadd.f32 %v2404_v38, %v2372_v39  ;;  %v2374_v46 = vpop.f32.mrb[6].mxu0  ;;  %v6177_v48 = vpop.f32.mrb[6].mxu1 }
 0x27c   :  { %v6175_v56 = vadd.f32 %v2400_v40, %v2374_v46  ;;  %v2376_v49 = vpop.f32.mrb[7].mxu0  ;;  %v6179_v54 = vpop.f32.mrb[7].mxu1 }
 0x27d   :  { %v2422_v53 = vadd.f32 %v2404_v38, %v2376_v49  ;;  %3398 = vmatprep.subr.mxu0 %v2416_v42 }
 0x27e   :  { %3399 = vmatpush1.msra.mxu0 %v2415_v47 }
 0x27f   :  { %3472 = vmatprep.subr.mxu0 %v2422_v53 }
 0x2b9   :  { %v6227_v32 = vpop.f32.mrb[8].mxu0  ;;  %v3119_v34 = vpop.f32.mrb[8].mxu1 }
 0x2ba   :  { %v6229_v35 = vpop.f32.mrb[9].mxu0  ;;  %v6231_v38 = vadd.f32 %v3149_v30, %v3119_v34  ;;  %v3121_v40 = vpop.f32.mrb[9].mxu1 }
 0x2bb   :  { %v6233_v50 = vpop.f32.mrb[10].mxu0  ;;  %v6235_v39 = vadd.f32 %v3153_v31, %v3121_v40  ;;  %v3123_v42 = vpop.f32.mrb[10].mxu1 }
 0x2bc   :  { %v6237_v46 = vpop.f32.mrb[11].mxu0  ;;  %v6239_v47 = vadd.f32 %v3149_v30, %v3123_v42  ;;  %v3125_v49 = vpop.f32.mrb[11].mxu1  ;;  %v6248_v30 = vld [vmem:[%s6486_s3 + $0x10] sm:$0xff]  ;;  %v6254_v42 = vld [vmem:[%s6486_s3 + $0x18] sm:$0xff]  ;;  %s4969_s3 = sld [smem:[#allocation6 + $0x5]] }
 0x2bd   :  { %v6241_v53 = vadd.f32 %v3153_v31, %v3125_v49  ;;  %v3203_v31 = vmul.f32 %v6248_v30, %v3196_v16  ;;  %v3204_v49 = vmul.f32 %v6254_v42, %v3200_v17 }
 0x314   :  { %v3294_v19 = vpop.f32.mrb[12].mxu0 }
 0x315   :  { %v3368_v21 = vmul.f32 0.0625, %v3294_v19  ;;  %v3296_v22 = vpop.f32.mrb[13].mxu0  ;;  %v3185_v19 = vmul.f32 %v3178_v62, %v6098_v45 }
 0x316   :  { %v6261_v22 = vld [vmem:[%s6484_s1 + $0x18] sm:$0xff]  ;;  %s4964_s1 = sld [smem:[#allocation6 + $0x4]] }
 0x317   :  { %v3371_v24 = vsel %vm3370_vm0, %v3368_v21, -inf }
 0x318   :  { %3372 = vmax.xlane.f32.xlu0 %v3371_v24  ;;  %v3364_v27 = vpop.f32.mrb[14].mxu0  ;;  %v3186_v24 = vmul.f32 %v6261_v22, %v3182_v63  ;;  %v6502_v63 = vmov 0.0  }
 0x319   :  { %v3369_v18 = vmul.f32 0.0625, %v3364_v27  ;;  %v3366_v34 = vpop.f32.mrb[15].mxu0  ;;  %v3208_v27 = vadd.f32 %v3204_v49, %v3203_v31  ;;  %3462 = vmatprep.mubr.f32.mxu0 %v6502_v63  ;;  %v3189_v31 = vpop.xlane.xlu1 %3188 }
 0x31a   :  { %v3190_v34 = vadd.f32 %v3186_v24, %v3185_v19 }
 0x31b   :  { %v3374_v40 = vsel %vm3370_vm0, %v3369_v18, -inf  ;;  %3209 = vadd.xlane.f32.xlu1 %v3208_v27 }
 0x31c   :  { %3375 = vmax.xlane.f32.xlu0 %v3374_v40 }
 0x320   :  { %3191 = vadd.xlane.f32.xlu0 %v3190_v34 }
 0x3a5   :  { %v3373_v16 = vpop.xlane.xlu0 %3372 }
 0x3a6   :  { %v3377_v40 = vsub.f32 %v3368_v21, %v3373_v16  ;;  %v3207_v21 = vpop.xlane.xlu1 %3206 }
 0x3a8   :  { %v3379_v55 = vmul.f32 1.442695, %v3377_v40 }
 0x3a9   :  { %v3376_v7 = vpop.xlane.xlu0 %3375 }
 0x3aa   :  { %5637 = vpow2.f32 %v3379_v55  ;;  %v3378_v15 = vsub.f32 %v3369_v18, %v3376_v7  ;;  %v3210_v49 = vpop.xlane.xlu1 %3209  ;;  %v3211_v55 = vadd.f32 %v3207_v21, %v3189_v31  ;;  %v3213_v7 = vstv %s4964_s1 }
 0x3ab   :  { %v3145_v31 = vrot.slane %v6221_v29, %v6151_v59 }
 0x3ac   :  { %v3381_v17 = vmul.f32 1.442695, %v3378_v15  ;;  %v3214_v18 = vadd.f32 %v3213_v7, %v3211_v55 }
 0x3ad   :  { %v3192_v19 = vpop.xlane.xlu0 %3191 }
 0x3ae   :  { %5639 = vpow2.f32 %v3381_v17  ;;  %v3212_v15 = vadd.f32 %v3210_v49, %v3192_v19  ;;  %v4965_v27 = vmul.f32 -1.442695, %v3214_v18  ;;  %v3163_v18 = vadd.f32 %v3145_v31, %v6229_v35 }
 0x3b0   :  { %v3215_v24 = vadd.f32 %v3213_v7, %v3212_v15  ;;  %5641 = vpow2.f32 %v4965_v27  ;;  %v3137_v15 = vrot.slane %v6221_v29, %v6145_v57 }
 0x3b2   :  { %v4966_v34 = vmul.f32 -1.442695, %v3215_v24  ;;  %v3161_v27 = vadd.f32 %v3137_v15, %v6173_v43 }
 0x3b4   :  { %v5638_v62 = vpop.eup %5637  ;;  %5643 = vpow2.f32 %v4966_v34 }
 0x3b5   :  { %v3383_v6 = vsel %vm3370_vm0, %v5638_v62, 0.0 }
 0x3b6   :  { %3384 = vadd.xlane.f32.xlu0 %v3383_v6 }
 0x3b8   :  { %v5640_v14 = vpop.eup %5639 }
 0x3b9   :  { %v3386_v5 = vsel %vm3370_vm0, %v5640_v14, 0.0 }
 0x3ba   :  { %3387 = vadd.xlane.f32.xlu1 %v3386_v5  ;;  %v5642_v6 = vpop.eup %5641 }
 0x3bb   :  { %v3222_v5 = vadd.f32 1.0, %v5642_v6  ;;  %v3167_v6 = vadd.f32 %v3137_v15, %v6179_v54  ;;  %v3586_v15 = vrot.slane %v6189_v61, %v6151_v59 }
 0x3be   :  { %v5644_v16 = vpop.eup %5643 }
 0x3bf   :  { %v3223_v40 = vadd.f32 1.0, %v5644_v16 }
 0x443   :  { %v3385_v17 = vpop.xlane.xlu0 %3384 }
 0x444   :  { %5645 = vrcp.f32 %v3385_v17 }
 0x445   :  { %5647 = vrcp.f32 %v3222_v5 }
 0x446   :  { %5649 = vrcp.f32 %v3223_v40 }
 0x447   :  { %v3388_v63 = vpop.xlane.xlu1 %3387 }
 0x448   :  { %5651 = vrcp.f32 %v3388_v63  ;;  %v6513_v63 = vmov 0.0  }
 0x44e   :  { %v5646_v13 = vpop.eup %5645 }
 0x44f   :  { %v3390_v21 = vmul.f32 %v5646_v13, %v5638_v62  ;;  %v5648_v49 = vpop.eup %5647  ;;  %v3141_v13 = vrot.slane %v6221_v29, %v6154_v60 }
 0x450   :  { %v5650_v19 = vpop.eup %5649 }
 0x451   :  { %v6269_v55 = vmul.f32 %v5648_v49, %v3390_v21  ;;  %v3162_v35 = vadd.f32 %v3141_v13, %v6227_v32  ;;  %v3168_v16 = vadd.f32 %v3141_v13, %v6233_v50 }
 0x452   :  { %v5652_v7 = vpop.eup %5651 }
 0x453   :  { %v3392_v24 = vmul.f32 %v5652_v7, %v5640_v14  ;;  %4967 = vmatmul.mubr.msk.f32.vlgmr.msra.gmra.mrb[16].mxu0 %vm3370_vm0, %v6269_v55  ;;  %v3133_v14 = vrot.slane %v6221_v29, %v6158_v28  ;;  %v3582_v7 = vrot.slane %v6184_v58, %v6151_v59 }
 0x454   :  { %3473 = vmatpush1.msra.mxu0 %v6175_v56  ;;  %3536 = vmatprep.mubr.f32.mxu0 %v6513_v63  ;;  %v3169_v56 = vadd.f32 %v3145_v31, %v6237_v46 }
 0x455   :  { %3614 = vmatprep.subr.mxu0 %v3163_v18  ;;  %v6280_v62 = vmul.f32 %v5650_v19, %v3392_v24  ;;  %v3160_v34 = vadd.f32 %v3133_v14, %v6171_v41  ;;  %v3166_v43 = vadd.f32 %v3133_v14, %v6177_v48  ;;  %v3588_v18 = vmul.f32 %v6215_v23, %v3586_v15 }
 0x456   :  { %v3589_v14 = vmul.f32 %v6248_v30, %v3582_v7 }
 0x457   :  { %4968 = vmatmul.mubr.msk.f32.vlgmr.msra.gmra.mrb[18].mxu0 %vm3370_vm0, %v6280_v62 }
 0x458   :  { %3678 = vmatprep.mubr.f32.mxu0 %v3161_v27 }
 0x45b   :  { %3615 = vmatpush1.xpose.msra.mxu0 %v3162_v35  ;;  %v3590_v35 = vmul.f32 %v6254_v42, %v3586_v15 }
 0x45c   :  { %3684 = vmatprep.subr.mxu0 %v3169_v56 }
 0x45e   :  { %3679 = vmatmul.mubr.f32.vlgmr.msra.gmra.mrb[20].mxu0 %v3160_v34  ;;  %v3594_v34 = vadd.f32 %v3590_v35, %v3589_v14 }
 0x45f   :  { %3685 = vmatpush1.xpose.msra.mxu0 %v3168_v16  ;;  %3748 = vmatprep.mubr.f32.mxu0 %v3167_v6 }
 0x460   :  { %3783 = vmatprep.subr.mxu0 %v6235_v39 }
 0x462   :  { %3749 = vmatmul.mubr.f32.vlgmr.msra.gmra.mrb[22].mxu0 %v3166_v43 }
 0x463   :  { %3784 = vmatpush1.msra.mxu0 %v6231_v38  ;;  %3847 = vmatprep.mubr.f32.mxu0 %v6513_v63  ;;  %v3564_v38 = vrot.slane %v6184_v58, %v6154_v60 }
 0x464   :  { %3857 = vmatprep.subr.mxu0 %v6241_v53  ;;  %v3568_v53 = vrot.slane %v6189_v61, %v6154_v60 }
 0x465   :  { %v3569_v5 = vmul.f32 %v3564_v38, %v6125_v25  ;;  %v3571_v13 = vmul.f32 %v3564_v38, %v6130_v26 }
 0x466   :  { %v3572_v27 = vmul.f32 %v3568_v53, %v6112_v52 }
 0x468   :  { %v3576_v56 = vadd.f32 %v3572_v27, %v3571_v13 }
 0x526   :  { %v3464_v41 = vpop.f32.mrb[16].mxu0 }
 0x527   :  { %v6298_v29 = vadd.f32 %v3464_v41, %v6093_v44  ;;  %v3466_v54 = vpop.f32.mrb[17].mxu0 }
 0x528   :  { %v6301_v32 = vadd.f32 %v6203_v20, %v3466_v54  ;;  %v3570_v20 = vmul.f32 %v3568_v53, %v6107_v51  ;;  %v3587_v51 = vmul.f32 %v6209_v33, %v3582_v7  ;;  %v3599_v53 = vstv %s4969_s3 }
 0x52a   :  { %v3538_v50 = vpop.f32.mrb[18].mxu0  ;;  %v3573_v21 = vadd.f32 %v3570_v20, %v3569_v5  ;;  %v3591_v24 = vadd.f32 %v3588_v18, %v3587_v51  ;;  %v3543_v51 = vsel %vm3370_vm0, %v6269_v55, 0.0  ;;  %v3550_v18 = vsel %vm3370_vm0, %v6280_v62, 0.0 }
 0x52b   :  { %v6304_v48 = vadd.f32 %v3538_v50, %v6098_v45  ;;  %v3540_v39 = vpop.f32.mrb[19].mxu0  ;;  %v3551_v13 = vrot.slane %v3550_v18, 4 }
 0x52c   :  { %v6307_v46 = vadd.f32 %v6261_v22, %v3540_v39 }
 0x531   :  { %v3680_v44 = vpop.f32.mrb[20].mxu0 }
 0x532   :  { %v3754_v40 = vmul.f32 0.0625, %v3680_v44  ;;  %v3682_v17 = vpop.f32.mrb[21].mxu0 }
 0x534   :  { %v3756_v45 = vsel %vm3370_vm0, %v3754_v40, -inf }
 0x535   :  { %3757 = vmax.xlane.f32.xlu0 %v3756_v45  ;;  %v3750_v31 = vpop.f32.mrb[22].mxu0 }
 0x536   :  { %v3755_v22 = vmul.f32 0.0625, %v3750_v31  ;;  %v3752_v49 = vpop.f32.mrb[23].mxu0 }
 0x538   :  { %v3759_v19 = vsel %vm3370_vm0, %v3755_v22, -inf }
 0x539   :  { %3760 = vmax.xlane.f32.xlu1 %v3759_v19  ;;  %3574 = vadd.xlane.f32.xlu0 %v3573_v21 }
 0x53d   :  { %3592 = vadd.xlane.f32.xlu1 %v3591_v24  ;;  %3577 = vadd.xlane.f32.xlu0 %v3576_v56  ;;  %v3544_v24 = vrot.slane %v3543_v51, 4  ;;  %v3552_v56 = vadd.f32 %v3551_v13, %v3550_v18 }
 0x53f   :  { %v3545_v35 = vadd.f32 %v3544_v24, %v3543_v51 }
 0x541   :  { %3595 = vadd.xlane.f32.xlu1 %v3594_v34 }
 0x5c2   :  { %v3758_v6 = vpop.xlane.xlu0 %3757 }
 0x5c3   :  { %v3762_v16 = vsub.f32 %v3754_v40, %v3758_v6 }
 0x5c5   :  { %v3764_v43 = vmul.f32 1.442695, %v3762_v16 }
 0x5c6   :  { %v3761_v33 = vpop.xlane.xlu1 %3760  ;;  %v3575_v42 = vpop.xlane.xlu0 %3574 }
 0x5c7   :  { %5653 = vpow2.f32 %v3764_v43  ;;  %v3763_v23 = vsub.f32 %v3755_v22, %v3761_v33  ;;  %v3546_v33 = vrot.slane %v3545_v35, 2 }
 0x5c9   :  { %v3766_v41 = vmul.f32 1.442695, %v3763_v23  ;;  %v3553_v23 = vrot.slane %v3552_v56, 2 }
 0x5ca   :  { %v3593_v39 = vpop.xlane.xlu1 %3592  ;;  %v3578_v44 = vpop.xlane.xlu0 %3577 }
 0x5cb   :  { %5655 = vpow2.f32 %v3766_v41  ;;  %v3597_v38 = vadd.f32 %v3593_v39, %v3575_v42  ;;  %v3554_v42 = vadd.f32 %v3553_v23, %v3552_v56 }
 0x5cd   :  { %v3600_v20 = vadd.f32 %v3599_v53, %v3597_v38 }
 0x5ce   :  { %v3596_v5 = vpop.xlane.xlu1 %3595 }
 0x5cf   :  { %v3598_v40 = vadd.f32 %v3596_v5, %v3578_v44  ;;  %v4970_v17 = vmul.f32 -1.442695, %v3600_v20  ;;  %v3555_v44 = vrot.slane %v3554_v42, 1 }
 0x5d1   :  { %v5654_v54 = vpop.eup %5653  ;;  %v3601_v45 = vadd.f32 %v3599_v53, %v3598_v40  ;;  %5657 = vpow2.f32 %v4970_v17 }
 0x5d2   :  { %v3768_v50 = vsel %vm3370_vm0, %v5654_v54, 0.0 }
 0x5d3   :  { %3769 = vadd.xlane.f32.xlu0 %v3768_v50  ;;  %v4971_v31 = vmul.f32 -1.442695, %v3601_v45  ;;  %v3556_v45 = vadd.f32 %v3555_v44, %v3554_v42 }
 0x5d5   :  { %v5656_v52 = vpop.eup %5655  ;;  %5659 = vpow2.f32 %v4971_v31 }
 0x5d6   :  { %v3771_v30 = vsel %vm3370_vm0, %v5656_v52, 0.0 }
 0x5d7   :  { %3772 = vadd.xlane.f32.xlu1 %v3771_v30  ;;  %v3547_v30 = vadd.f32 %v3546_v33, %v3545_v35 }
 0x5db   :  { %v5658_v21 = vpop.eup %5657 }
 0x5dc   :  { %v3608_v22 = vadd.f32 1.0, %v5658_v21 }
 0x5de   :  { %5661 = vrcp.f32 %v3608_v22 }
 0x5df   :  { %v5660_v49 = vpop.eup %5659 }
 0x5e0   :  { %v3609_v19 = vadd.f32 1.0, %v5660_v49 }
 0x5e8   :  { %v5662_v27 = vpop.eup %5661 }
 0x660   :  { %v3770_v7 = vpop.xlane.xlu0 %3769 }
 0x661   :  { %5663 = vrcp.f32 %v3770_v7 }
 0x662   :  { %5665 = vrcp.f32 %v3609_v19  ;;  %v3559_v19 = vmul.f32 0.125, %v3556_v45 }
 0x664   :  { %v3773_v15 = vpop.xlane.xlu1 %3772  ;;  %v3945_v24 = vmul.f32 0.65, %v3559_v19 }
 0x665   :  { %5667 = vrcp.f32 %v3773_v15 }
 0x66b   :  { %v5664_v14 = vpop.eup %5663 }
 0x66c   :  { %v3775_v34 = vmul.f32 %v5664_v14, %v5654_v54  ;;  %v5666_v6 = vpop.eup %5665 }
 0x66e   :  { %v3778_v16 = vmul.f32 %v5662_v27, %v3775_v34 }
 0x66f   :  { %v5668_v43 = vpop.eup %5667 }
 0x670   :  { %v3777_v41 = vmul.f32 %v5668_v43, %v5656_v52  ;;  %4972 = vmatmul.mubr.msk.f32.vlgmr.msra.gmra.mrb[24].mxu0 %vm3370_vm0, %v3778_v16  ;;  %v3928_v55 = vsel %vm3370_vm0, %v3778_v16, 0.0  ;;  %v3548_v52 = vrot.slane %v3547_v30, 1 }
 0x671   :  { %3858 = vmatpush1.msra.mxu0 %v6239_v47  ;;  %3921 = vmatprep.mubr.f32.mxu0 %v6513_v63  ;;  %v3929_v62 = vrot.slane %v3928_v55, 4 }
 0x672   :  { %v3779_v50 = vmul.f32 %v5666_v6, %v3777_v41  ;;  %v3549_v47 = vadd.f32 %v3548_v52, %v3547_v30 }
 0x673   :  { %v3930_v39 = vadd.f32 %v3929_v62, %v3928_v55 }
 0x674   :  { %4973 = vmatmul.mubr.msk.f32.vlgmr.msra.gmra.mrb[26].mxu0 %vm3370_vm0, %v3779_v50  ;;  %v3935_v54 = vsel %vm3370_vm0, %v3779_v50, 0.0  ;;  %v3558_v49 = vmul.f32 0.125, %v3549_v47 }
 0x675   :  { %v3931_v38 = vrot.slane %v3930_v39, 2  ;;  %v3936_v53 = vrot.slane %v3935_v54, 4 }
 0x676   :  { %v3944_v18 = vmul.f32 0.65, %v3558_v49 }
 0x677   :  { %v3932_v5 = vadd.f32 %v3931_v38, %v3930_v39  ;;  %v3937_v20 = vadd.f32 %v3936_v53, %v3935_v54  ;;  %v5683_v38 = vld [vmem:[%s6485_s2 + $0x8] sm:$0xff] }
 0x679   :  { %v3933_v40 = vrot.slane %v3932_v5, 1  ;;  %v3938_v17 = vrot.slane %v3937_v20, 2 }
 0x67b   :  { %v3934_v63 = vadd.f32 %v3933_v40, %v3932_v5  ;;  %v3939_v31 = vadd.f32 %v3938_v17, %v3937_v20  ;;  %v5684_v20 = vld [vmem:[%s6485_s2 + $0x18] sm:$0xff] }
 0x67d   :  { %v3940_v21 = vrot.slane %v3939_v31, 1  ;;  %v3942_v22 = vmul.f32 0.125, %v3934_v63 }
 0x67f   :  { %v3941_v7 = vadd.f32 %v3940_v21, %v3939_v31  ;;  %v3946_v51 = vmul.f32 0.35, %v3942_v22 }
 0x681   :  { %v3943_v15 = vmul.f32 0.125, %v3941_v7  ;;  %v3948_v27 = vadd.f32 %v3946_v51, %v3944_v18 }
 0x683   :  { %v3947_v13 = vmul.f32 0.35, %v3943_v15 }
 0x685   :  { %v3949_v14 = vadd.f32 %v3947_v13, %v3945_v24 }
 0x687   :  { %v3953_v35 = vsel %vm3952_vm1, %v3949_v14, %v3948_v27 }
 0x688   :  { %v3956_v56 = vsel %vm3955_vm2, %v3953_v35, -inf }
 0x689   :  { %3957 = vmax.xlane.f32.xlu0 %v3956_v56 }
 0x716   :  { %v3958_v34 = vpop.xlane.xlu0 %3957 }
 0x717   :  { %v3960_v6 = vrot.slane %v3958_v34, 1  ;;  %v3963_v16 = vsub.f32 %v3948_v27, %v3958_v34 }
 0x719   :  { %v3964_v43 = vsub.f32 %v3949_v14, %v3960_v6  ;;  %v3965_v33 = vmul.f32 1.442695, %v3963_v16 }
 0x71b   :  { %v3967_v23 = vmul.f32 1.442695, %v3964_v43 }
 0x71d   :  { %5669 = vpow2.f32 %v3967_v23 }
 0x71e   :  { %5671 = vpow2.f32 %v3965_v33 }
 0x727   :  { %v5670_v41 = vpop.eup %5669 }
 0x728   :  { %v3971_v55 = vrot.slane %v5670_v41, 7  ;;  %v5672_v62 = vpop.eup %5671 }
 0x72a   :  { %v3972_v50 = vsel %vm3952_vm1, %v3971_v55, %v5672_v62 }
 0x72b   :  { %v3974_v30 = vsel %vm3955_vm2, %v3972_v50, 0.0 }
 0x72c   :  { %3975 = vadd.xlane.f32.xlu1 %v3974_v30 }
 0x743   :  { %v3849_v42 = vpop.f32.mrb[24].mxu0 }
 0x744   :  { %v6344_v39 = vadd.f32 %v3849_v42, %v6125_v25  ;;  %v3851_v54 = vpop.f32.mrb[25].mxu0 }
 0x745   :  { %v6349_v53 = vadd.f32 %v5683_v38, %v3851_v54 }
 0x747   :  { %v3923_v52 = vpop.f32.mrb[26].mxu0 }
 0x748   :  { %v6352_v44 = vadd.f32 %v3923_v52, %v6130_v26  ;;  %v3925_v5 = vpop.f32.mrb[27].mxu0 }
 0x749   :  { %v6357_v40 = vadd.f32 %v5684_v20, %v3925_v5 }
 0x7b9   :  { %v3976_v25 = vpop.xlane.xlu1 %3975 }
 0x7ba   :  { %v3978_v17 = vrot.slane %v3976_v25, 1  ;;  %5673 = vrcp.f32 %v3976_v25 }
 0x7bc   :  { %5675 = vrcp.f32 %v3978_v17 }
 0x7c4   :  { %v5674_v47 = vpop.eup %5673 }
 0x7c5   :  { %v6359_v45 = vmul.f32 %v5674_v47, %v5672_v62 }
 0x7c6   :  { %v5676_v63 = vpop.eup %5675 }
 0x7c7   :  { %v6361_v31 = vmul.f32 %v5676_v63, %v5670_v41 }
 0x7c8   :  { %5799 = dma.done.wait [#allocation5], 4096 }
 0x7c9   :  { %5800 = vsyncadd [#allocation5], 4294963200 }
 0x7ca   :  { %5801 = dma.done.wait [#allocation5 + $0x1], 8192 }
 0x7cb   :  { %5802 = vsyncadd [#allocation5 + $0x1], 4294959104 }
 0x7cc   :  { %5803 = dma.done.wait [#allocation5 + $0x2], 2048 }
 0x7cd   :  { %5804 = vsyncadd [#allocation5 + $0x2], 4294965248  ;;  %v6365_v26 = vmul.f32 %v6344_v39, %v6298_v29  ;;  %v6369_v21 = vmul.f32 %v6349_v53, %v6301_v32  ;;  %v6373_v22 = vmul.f32 %v6352_v44, %v6304_v48  ;;  %v6377_v49 = vmul.f32 %v6357_v40, %v6307_v46  ;;  %v4002_v51 = vld [vmem:[#allocation3 + $0x18] sm:$0xff]  ;;  %v4001_v18 = vld [vmem:[#allocation3 + $0x10] sm:$0xff]  ;;  %s4974_s2 = sld [smem:[#allocation6 + $0x6]]  ;;  %s6437_s20 = sld [smem:[#allocation6 + $0x7]] }
 0x7ce   :  { %v3998_v19 = vpack.c.bf16 %v6357_v40, %v6349_v53  ;;  %v4006_v24 = vld [vmem:[#allocation3 + $0x38] sm:$0xff]  ;;  %4128 = vmatprep.subr.bf16.mxu1 %v4002_v51  ;;  %v4005_v13 = vld [vmem:[#allocation3 + $0x30] sm:$0xff]  ;;  %v4000_v56 = vld [vmem:[#allocation3 + $0x8] sm:$0xff]  ;;  %v4314_v5 = vrot.slane %v6184_v58, %v6167_v37  ;;  %v4318_v20 = vrot.slane %v6189_v61, %v6167_v37  ;;  %v4336_v37 = vrot.slane %v6184_v58, %v6164_v36  ;;  %s4977_s29 = sld [smem:[#allocation6 + $0x2]]  ;;  %s4976_s23 = sld [smem:[#allocation6 + $0x1]] }
 0x7cf   :  { %v4254_v7 = vadd.f32 %v6369_v21, %v6365_v26  ;;  %v4257_v15 = vadd.f32 %v6377_v49, %v6373_v22  ;;  %4129 = vmatpush1.bf16.msra.mxu1 %v4001_v18  ;;  %v4010_v27 = vld [vmem:[#allocation3 + $0x58] sm:$0xff]  ;;  %v4009_v14 = vld [vmem:[#allocation3 + $0x50] sm:$0xff]  ;;  %v3999_v34 = vld [vmem:[#allocation3] sm:$0xff]  ;;  %4085 = vmatprep.subr.bf16.mxu0 %v4000_v56  ;;  %s4978_s24 = sld [smem:[#allocation6 + $0x3]]  ;;  %s6447_s17 = sld [smem:[#allocation6]]  ;;  %vm4493_vm3 = vcmask 523264  }
 0x7d0   :  { %4160 = vmatprep.mubr.bf16.mxu1 %v3998_v19  ;;  %4117 = vmatprep.mubr.bf16.mxu0 %v3998_v19  ;;  %v4014_v35 = vld [vmem:[#allocation3 + $0x78] sm:$0xff]  ;;  %v4013_v6 = vld [vmem:[#allocation3 + $0x70] sm:$0xff]  ;;  %v4004_v16 = vld [vmem:[#allocation3 + $0x28] sm:$0xff]  ;;  %v4319_v47 = vmul.f32 %v4314_v5, %v6344_v39  ;;  %v4320_v63 = vmul.f32 %v4318_v20, %v6349_v53  ;;  %v4321_v19 = vmul.f32 %v4314_v5, %v6352_v44  ;;  %vm4522_vm4 = vcmask 517120   ;;  %s4981_s25 = sld [smem:[#allocation6 + $0x8]]  ;;  %s5828_s5 = smov [#allocation14]  }
 0x7d1   :  { %4255 = vadd.xlane.f32.xlu0 %v4254_v7  ;;  %4130 = vmatprep.subr.bf16.mxu1 %v4006_v24  ;;  %v4018_v43 = vld [vmem:[#allocation3 + $0x98] sm:$0xff]  ;;  %v4003_v33 = vld [vmem:[#allocation3 + $0x20] sm:$0xff]  ;;  %v4008_v23 = vld [vmem:[#allocation3 + $0x48] sm:$0xff]  ;;  %v4322_v7 = vmul.f32 %v4318_v20, %v6357_v40  ;;  %s4537_s26 = sshll.u32 %s5828_s5, 4  ;;  %s4538_s26 = int_to_ptr.vmem [resolvable:$true] %s4537_s26 }
 0x7d2   :  { %4086 = vmatpush1.bf16.msra.mxu0 %v3999_v34  ;;  %v4017_v41 = vld [vmem:[#allocation3 + $0x90] sm:$0xff]  ;;  %v4022_v55 = vld [vmem:[#allocation3 + $0xb8] sm:$0xff]  ;;  %v4007_v62 = vld [vmem:[#allocation3 + $0x40] sm:$0xff]  ;;  %v4323_v18 = vadd.f32 %v4320_v63, %v4319_v47  ;;  %v4343_v34 = vmul.f32 %v4336_v37, %v6352_v44  ;;  %s5771_s28 = scalar_lea.vmem %s4538_s26, 32  ;;  %p5776_p2 = scmp.lt.s32.totalorder %s4538_s26, %s4538_s26 }
 0x7d3   :  { %4131 = vmatpush1.bf16.msra.mxu1 %v4005_v13  ;;  %4087 = vmatprep.subr.bf16.mxu0 %v4004_v16  ;;  %v4012_v50 = vld [vmem:[#allocation3 + $0x68] sm:$0xff]  ;;  %v4021_v30 = vld [vmem:[#allocation3 + $0xb0] sm:$0xff]  ;;  %v4026_v42 = vld [vmem:[#allocation3 + $0xd8] sm:$0xff]  ;;  %v6393_v24 = vadd.f32 %v4322_v7, %v4321_v19  ;;  %v4340_v13 = vrot.slane %v6189_v61, %v6164_v36  ;;  %p5772_p1 = scmp.ne.s32.totalorder %s4538_s26, %s5771_s28  ;;  %p5777_p3 = scmp.lt.s32.totalorder %s5771_s28, %s5771_s28 }
 0x7d4   :  { %4132 = vmatprep.subr.bf16.mxu1 %v4010_v27  ;;  %v4011_v54 = vld [vmem:[#allocation3 + $0x60] sm:$0xff]  ;;  %v4016_v38 = vld [vmem:[#allocation3 + $0x88] sm:$0xff]  ;;  %v4025_v52 = vld [vmem:[#allocation3 + $0xd0] sm:$0xff] }
 0x7d5   :  { %4258 = vadd.xlane.f32.xlu0 %v4257_v15  ;;  %v4030_v25 = vld [vmem:[#allocation3 + $0xf8] sm:$0xff]  ;;  %v4015_v17 = vld [vmem:[#allocation3 + $0x80] sm:$0xff]  ;;  %v4020_v15 = vld [vmem:[#allocation3 + $0xa8] sm:$0xff]  ;;  %v4342_v56 = vmul.f32 %v4340_v13, %v6349_v53  ;;  %v4344_v16 = vmul.f32 %v4340_v13, %v6357_v40  ;;  %p5778_p4 = por %p5777_p3, %p5776_p2 }
 0x7d6   :  { %4088 = vmatpush1.bf16.msra.mxu0 %v4003_v33  ;;  %v4029_v51 = vld [vmem:[#allocation3 + $0xf0] sm:$0xff]  ;;  %v4034_v27 = vld [vmem:[#allocation3 + $0x118] sm:$0xff]  ;;  %v4032_v40 = vld [vmem:[#allocation3 + $0x108] sm:$0xff] }
 0x7d7   :  { %4133 = vmatpush1.bf16.msra.mxu1 %v4009_v14  ;;  %4089 = vmatprep.subr.bf16.mxu0 %v4008_v23  ;;  %v4019_v14 = vld [vmem:[#allocation3 + $0xa0] sm:$0xff]  ;;  %v4038_v23 = vld [vmem:[#allocation3 + $0x138] sm:$0xff]  ;;  %v6403_v36 = vadd.f32 %v4344_v16, %v4343_v34  ;;  %v4037_v53 = vld [vmem:[#allocation3 + $0x130] sm:$0xff]  ;;  %v3997_v34 = vpack.c.bf16 %v6352_v44, %v6344_v39  ;;  %p5779_p5 = pnand %p5778_p4, %p5772_p1 }
 0x7d8   :  { %4134 = vmatprep.subr.bf16.mxu1 %v4014_v35  ;;  %v4341_v35 = vmul.f32 %v4336_v37, %v6344_v39  ;;  %v4050_v5 = vld [vmem:[#allocation3 + $0x198] sm:$0xff]  ;;  %v4035_v20 = vld [vmem:[#allocation3 + $0x120] sm:$0xff]  ;;  %v4044_v19 = vld [vmem:[#allocation3 + $0x168] sm:$0xff] }
 0x7d9   :  { %4324 = vadd.xlane.f32.xlu0 %v4323_v18  ;;  %v4054_v47 = vld [vmem:[#allocation3 + $0x1b8] sm:$0xff]  ;;  %v4039_v63 = vld [vmem:[#allocation3 + $0x140] sm:$0xff]  ;;  %v4053_v7 = vld [vmem:[#allocation3 + $0x1b0] sm:$0xff] }
 0x7da   :  { %4090 = vmatpush1.bf16.msra.mxu0 %v4007_v62  ;;  %v4345_v33 = vadd.f32 %v4342_v56, %v4341_v35  ;;  %v4042_v62 = vld [vmem:[#allocation3 + $0x158] sm:$0xff]  ;;  %v4048_v18 = vld [vmem:[#allocation3 + $0x188] sm:$0xff]  ;;  %v4057_v37 = vld [vmem:[#allocation3 + $0x1d0] sm:$0xff] }
 0x7db   :  { %4135 = vmatpush1.bf16.msra.mxu1 %v4013_v6  ;;  %4091 = vmatprep.subr.bf16.mxu0 %v4012_v50  ;;  %v4024_v6 = vld [vmem:[#allocation3 + $0xc8] sm:$0xff]  ;;  %v4027_v50 = vld [vmem:[#allocation3 + $0xe0] sm:$0xff]  ;;  %v4062_v13 = vld [vmem:[#allocation3 + $0x1f8] sm:$0xff] }
 0x7dc   :  { %4136 = vmatprep.subr.bf16.mxu1 %v4018_v43  ;;  %v4033_v43 = vld [vmem:[#allocation3 + $0x110] sm:$0xff]  ;;  %v4176_v56 = vld [vmem:[#allocation2 + $0x8] sm:$0xff]  ;;  %v4059_v44 = vld [vmem:[#allocation3 + $0x1e0] sm:$0xff] }
 0x7dd   :  { %4346 = vadd.xlane.f32.xlu0 %v4345_v33  ;;  %v4061_v35 = vld [vmem:[#allocation3 + $0x1f0] sm:$0xff]  ;;  %v4056_v16 = vld [vmem:[#allocation3 + $0x1c8] sm:$0xff]  ;;  %v4175_v33 = vld [vmem:[#allocation2] sm:$0xff] }
 0x7de   :  { %4092 = vmatpush1.bf16.msra.mxu0 %v4011_v54  ;;  %v4031_v54 = vld [vmem:[#allocation3 + $0x100] sm:$0xff]  ;;  %v4180_v39 = vld [vmem:[#allocation2 + $0x28] sm:$0xff] }
 0x7df   :  { %4137 = vmatpush1.bf16.msra.mxu1 %v4017_v41  ;;  %4093 = vmatprep.subr.bf16.mxu0 %v4016_v38  ;;  %v4023_v41 = vld [vmem:[#allocation3 + $0xc0] sm:$0xff]  ;;  %v4036_v38 = vld [vmem:[#allocation3 + $0x128] sm:$0xff] }
 0x7e0   :  { %4138 = vmatprep.subr.bf16.mxu1 %v4022_v55  ;;  %v4028_v55 = vld [vmem:[#allocation3 + $0xe8] sm:$0xff] }
 0x7e2   :  { %4094 = vmatpush1.bf16.msra.mxu0 %v4015_v17  ;;  %v4049_v17 = vld [vmem:[#allocation3 + $0x190] sm:$0xff] }
 0x7e3   :  { %4139 = vmatpush1.bf16.msra.mxu1 %v4021_v30  ;;  %4095 = vmatprep.subr.bf16.mxu0 %v4020_v15  ;;  %v4041_v30 = vld [vmem:[#allocation3 + $0x150] sm:$0xff]  ;;  %v4058_v15 = vld [vmem:[#allocation3 + $0x1d8] sm:$0xff] }
 0x7e4   :  { %4140 = vmatprep.subr.bf16.mxu1 %v4026_v42  ;;  %v4046_v42 = vld [vmem:[#allocation3 + $0x178] sm:$0xff] }
 0x7e6   :  { %4096 = vmatpush1.bf16.msra.mxu0 %v4019_v14  ;;  %v4052_v14 = vld [vmem:[#allocation3 + $0x1a8] sm:$0xff] }
 0x7e7   :  { %4141 = vmatpush1.bf16.msra.mxu1 %v4025_v52  ;;  %4097 = vmatprep.subr.bf16.mxu0 %v4024_v6  ;;  %v4045_v52 = vld [vmem:[#allocation3 + $0x170] sm:$0xff]  ;;  %v4051_v6 = vld [vmem:[#allocation3 + $0x1a0] sm:$0xff] }
 0x7e8   :  { %4142 = vmatprep.subr.bf16.mxu1 %v4030_v25  ;;  %v4040_v25 = vld [vmem:[#allocation3 + $0x148] sm:$0xff] }
 0x7ea   :  { %4098 = vmatpush1.bf16.msra.mxu0 %v4023_v41  ;;  %v4055_v41 = vld [vmem:[#allocation3 + $0x1c0] sm:$0xff] }
 0x7eb   :  { %4143 = vmatpush1.bf16.msra.mxu1 %v4029_v51  ;;  %4099 = vmatprep.subr.bf16.mxu0 %v4028_v55  ;;  %v4043_v51 = vld [vmem:[#allocation3 + $0x160] sm:$0xff]  ;;  %v4060_v55 = vld [vmem:[#allocation3 + $0x1e8] sm:$0xff] }
 0x7ec   :  { %4144 = vmatprep.subr.bf16.mxu1 %v4034_v27  ;;  %v4047_v27 = vld [vmem:[#allocation3 + $0x180] sm:$0xff] }
 0x7ee   :  { %4100 = vmatpush1.bf16.msra.mxu0 %v4027_v50  ;;  %v4182_v50 = vld [vmem:[#allocation2 + $0x38] sm:$0xff] }
 0x7ef   :  { %4145 = vmatpush1.bf16.msra.mxu1 %v4033_v43  ;;  %4101 = vmatprep.subr.bf16.mxu0 %v4032_v40  ;;  %v3996_v43 = vpack.c.bf16 %v6307_v46, %v6301_v32  ;;  %v4181_v40 = vld [vmem:[#allocation2 + $0x30] sm:$0xff] }
 0x7f0   :  { %4146 = vmatprep.subr.bf16.mxu1 %v4038_v23  ;;  %v4178_v23 = vld [vmem:[#allocation2 + $0x18] sm:$0xff] }
 0x7f2   :  { %4102 = vmatpush1.bf16.msra.mxu0 %v4031_v54  ;;  %v4186_v54 = vld [vmem:[#allocation2 + $0x58] sm:$0xff] }
 0x7f3   :  { %4147 = vmatpush1.bf16.msra.mxu1 %v4037_v53  ;;  %4103 = vmatprep.subr.bf16.mxu0 %v4036_v38  ;;  %v4177_v53 = vld [vmem:[#allocation2 + $0x10] sm:$0xff]  ;;  %v4188_v38 = vld [vmem:[#allocation2 + $0x68] sm:$0xff] }
 0x7f4   :  { %4148 = vmatprep.subr.bf16.mxu1 %v4042_v62  ;;  %v4179_v62 = vld [vmem:[#allocation2 + $0x20] sm:$0xff] }
 0x7f6   :  { %4104 = vmatpush1.bf16.msra.mxu0 %v4035_v20  ;;  %v6516_v20 = vld [vmem:[#allocation31_spill] sm:$0xff] }
 0x7f7   :  { %4149 = vmatpush1.bf16.msra.mxu1 %v4041_v30  ;;  %4105 = vmatprep.subr.bf16.mxu0 %v4040_v25  ;;  %v4184_v30 = vld [vmem:[#allocation2 + $0x48] sm:$0xff] }
 0x7f8   :  { %4150 = vmatprep.subr.bf16.mxu1 %v4046_v42  ;;  %v4183_v42 = vld [vmem:[#allocation2 + $0x40] sm:$0xff]  ;;  %v6517_v25 = vld [vmem:[#allocation28_spill] sm:$0xff] }
 0x7fa   :  { %4106 = vmatpush1.bf16.msra.mxu0 %v4039_v63  ;;  %v6519_v63 = vld [vmem:[#allocation29_spill] sm:$0xff] }
 0x7fb   :  { %4151 = vmatpush1.bf16.msra.mxu1 %v4045_v52  ;;  %4107 = vmatprep.subr.bf16.mxu0 %v4044_v19  ;;  %v6514_v52 = vld [vmem:[#allocation30_spill] sm:$0xff]  ;;  %v4197_v19 = vld [vmem:[#allocation2 + $0xb0] sm:$0xff] }
 0x7fc   :  { %4152 = vmatprep.subr.bf16.mxu1 %v4050_v5  ;;  %v6515_v5 = vld [vmem:[#allocation27_spill] sm:$0xff] }
 0x7fe   :  { %4108 = vmatpush1.bf16.msra.mxu0 %v4043_v51  ;;  %v4202_v51 = vld [vmem:[#allocation2 + $0xd8] sm:$0xff] }
 0x7ff   :  { %4153 = vmatpush1.bf16.msra.mxu1 %v4049_v17  ;;  %4109 = vmatprep.subr.bf16.mxu0 %v4048_v18  ;;  %v6518_v17 = vld [vmem:[#allocation32_spill] sm:$0xff] }
 0x800   :  { %4154 = vmatprep.subr.bf16.mxu1 %v4054_v47  ;;  %v4198_v47 = vld [vmem:[#allocation2 + $0xb8] sm:$0xff]  ;;  %v4201_v18 = vld [vmem:[#allocation2 + $0xd0] sm:$0xff] }
 0x802   :  { %4110 = vmatpush1.bf16.msra.mxu0 %v4047_v27  ;;  %v4206_v27 = vld [vmem:[#allocation2 + $0xf8] sm:$0xff] }
 0x803   :  { %4155 = vmatpush1.bf16.msra.mxu1 %v4053_v7  ;;  %4111 = vmatprep.subr.bf16.mxu0 %v4052_v14  ;;  %v4200_v7 = vld [vmem:[#allocation2 + $0xc8] sm:$0xff]  ;;  %v4205_v14 = vld [vmem:[#allocation2 + $0xf0] sm:$0xff] }
 0x804   :  { %4156 = vmatprep.subr.bf16.mxu1 %v4058_v15  ;;  %v4199_v15 = vld [vmem:[#allocation2 + $0xc0] sm:$0xff] }
 0x806   :  { %4112 = vmatpush1.bf16.msra.mxu0 %v4051_v6 }
 0x807   :  { %4157 = vmatpush1.bf16.msra.mxu1 %v4057_v37  ;;  %4113 = vmatprep.subr.bf16.mxu0 %v4056_v16  ;;  %v4204_v37 = vld [vmem:[#allocation2 + $0xe8] sm:$0xff] }
 0x808   :  { %4158 = vmatprep.subr.bf16.mxu1 %v4062_v13  ;;  %v4203_v13 = vld [vmem:[#allocation2 + $0xe0] sm:$0xff] }
 0x80a   :  { %4114 = vmatpush1.bf16.msra.mxu0 %v4055_v41 }
 0x80b   :  { %4159 = vmatpush1.bf16.msra.mxu1 %v4061_v35  ;;  %4115 = vmatprep.subr.bf16.mxu0 %v4060_v55  ;;  %v3995_v35 = vpack.c.bf16 %v6304_v48, %v6298_v29 }
 0x80c   :  { %4207 = vmatprep.subr.bf16.mxu1 %v4176_v56 }
 0x80e   :  { %4161 = vmatmul.mubr.bf16.vlgmr.msra.gmra.mrb[12].mxu1 %v3997_v34  ;;  %4116 = vmatpush1.bf16.msra.mxu0 %v4059_v44 }
 0x80f   :  { %4208 = vmatpush1.bf16.msra.mxu1 %v4175_v33  ;;  %4239 = vmatprep.mubr.bf16.mxu1 %v3996_v43 }
 0x810   :  { %4209 = vmatprep.subr.bf16.mxu1 %v4178_v23  ;;  %4985 = vmatprep.subr.bf16.mxu0 %v6015_v8  ;;  %v4185_v8 = vld [vmem:[#allocation2 + $0x50] sm:$0xff] }
 0x811   :  { %4118 = vmatmul.mubr.bf16.vlgmr.msra.gmra.mrb[28].mxu0 %v3997_v34 }
 0x812   :  { %4986 = vmatpush3.bf16.msra.mxu0 %v5975_v0  ;;  %v4187_v0 = vld [vmem:[#allocation2 + $0x60] sm:$0xff] }
 0x813   :  { %4210 = vmatpush1.bf16.msra.mxu1 %v4177_v53  ;;  %4987 = vmatprep.subr.bf16.mxu0 %v6020_v9  ;;  %v4190_v9 = vld [vmem:[#allocation2 + $0x78] sm:$0xff] }
 0x814   :  { %4211 = vmatprep.subr.bf16.mxu1 %v4180_v39 }
 0x816   :  { %4988 = vmatpush3.bf16.msra.mxu0 %v5980_v1  ;;  %v4189_v1 = vld [vmem:[#allocation2 + $0x70] sm:$0xff] }
 0x817   :  { %4212 = vmatpush1.bf16.msra.mxu1 %v4179_v62  ;;  %4989 = vmatprep.subr.bf16.mxu0 %v6025_v10  ;;  %v4192_v10 = vld [vmem:[#allocation2 + $0x88] sm:$0xff] }
 0x818   :  { %4213 = vmatprep.subr.bf16.mxu1 %v4182_v50 }
 0x81a   :  { %4990 = vmatpush3.bf16.msra.mxu0 %v5985_v2  ;;  %v4191_v2 = vld [vmem:[#allocation2 + $0x80] sm:$0xff] }
 0x81b   :  { %4214 = vmatpush1.bf16.msra.mxu1 %v4181_v40  ;;  %4991 = vmatprep.subr.bf16.mxu0 %v6030_v11  ;;  %v4194_v11 = vld [vmem:[#allocation2 + $0x98] sm:$0xff] }
 0x81c   :  { %4215 = vmatprep.subr.bf16.mxu1 %v4184_v30 }
 0x81e   :  { %4992 = vmatpush3.bf16.msra.mxu0 %v5990_v3  ;;  %v4193_v3 = vld [vmem:[#allocation2 + $0x90] sm:$0xff] }
 0x81f   :  { %4216 = vmatpush1.bf16.msra.mxu1 %v4183_v42  ;;  %4993 = vmatprep.subr.bf16.mxu0 %v6035_v12  ;;  %v4196_v12 = vld [vmem:[#allocation2 + $0xa8] sm:$0xff] }
 0x820   :  { %4217 = vmatprep.subr.bf16.mxu1 %v4186_v54 }
 0x822   :  { %4994 = vmatpush3.bf16.msra.mxu0 %v5995_v4  ;;  %v4195_v4 = vld [vmem:[#allocation2 + $0xa0] sm:$0xff] }
 0x823   :  { %4218 = vmatpush1.bf16.msra.mxu1 %v4185_v8  ;;  %4995 = vmatprep.subr.bf16.mxu0 %v6514_v52 }
 0x824   :  { %4219 = vmatprep.subr.bf16.mxu1 %v4188_v38 }
 0x826   :  { %4996 = vmatpush3.bf16.msra.mxu0 %v6515_v5 }
 0x827   :  { %4220 = vmatpush1.bf16.msra.mxu1 %v4187_v0  ;;  %4997 = vmatprep.subr.bf16.mxu0 %v6516_v20  ;;  %v4352_v20 = vstv %s6437_s20 }
 0x828   :  { %4221 = vmatprep.subr.bf16.mxu1 %v4190_v9  ;;  %v4330_v9 = vstv %s4974_s2 }
 0x82a   :  { %4998 = vmatpush3.bf16.msra.mxu0 %v6517_v25 }
 0x82b   :  { %4222 = vmatpush1.bf16.msra.mxu1 %v4189_v1  ;;  %4999 = vmatprep.subr.bf16.mxu0 %v6518_v17 }
 0x82c   :  { %4223 = vmatprep.subr.bf16.mxu1 %v4192_v10 }
 0x82e   :  { %5000 = vmatpush3.bf16.msra.mxu0 %v6519_v63 }
 0x82f   :  { %4224 = vmatpush1.bf16.msra.mxu1 %v4191_v2  ;;  %v6520_v2 = vld [vmem:[#allocation33_spill] sm:$0xff] }
 0x830   :  { %4225 = vmatprep.subr.bf16.mxu1 %v4194_v11  ;;  %v4289_v11 = vsub.s32 6, %v6520_v2  ;;  %v4301_v25 = vsub.s32 7, %v6520_v2 }
 0x833   :  { %4226 = vmatpush1.bf16.msra.mxu1 %v4193_v3 }
 0x834   :  { %4227 = vmatprep.subr.bf16.mxu1 %v4196_v12 }
 0x837   :  { %4228 = vmatpush1.bf16.msra.mxu1 %v4195_v4 }
 0x838   :  { %4229 = vmatprep.subr.bf16.mxu1 %v4198_v47 }
 0x83b   :  { %4230 = vmatpush1.bf16.msra.mxu1 %v4197_v19 }
 0x83c   :  { %4231 = vmatprep.subr.bf16.mxu1 %v4200_v7 }
 0x83f   :  { %4232 = vmatpush1.bf16.msra.mxu1 %v4199_v15  ;;  %v4290_v15 = vrot.slane %v6184_v58, %v4289_v11 }
 0x840   :  { %4233 = vmatprep.subr.bf16.mxu1 %v4202_v51  ;;  %v4294_v51 = vrot.slane %v6189_v61, %v4289_v11 }
 0x843   :  { %4234 = vmatpush1.bf16.msra.mxu1 %v4201_v18 }
 0x844   :  { %4235 = vmatprep.subr.bf16.mxu1 %v4204_v37 }
 0x847   :  { %4236 = vmatpush1.bf16.msra.mxu1 %v4203_v13  ;;  %v4306_v13 = vrot.slane %v6189_v61, %v4301_v25 }
 0x848   :  { %4237 = vmatprep.subr.bf16.mxu1 %v4206_v27 }
 0x84b   :  { %4238 = vmatpush1.bf16.msra.mxu1 %v4205_v14 }
 0x84e   :  { %4240 = vmatmul.mubr.bf16.vlgmr.msra.gmra.mrb[12].mxu1 %v3995_v35 }
 0x85e   :  { %v4256_v56 = vpop.xlane.xlu0 %4255 }
 0x85f   :  { %v4261_v34 = vmul.f32 0.00390625, %v4256_v56  ;;  %v4382_v56 = vstv %s4977_s29 }
 0x861   :  { %v4263_v6 = vsub.f32 %v6365_v26, %v4261_v34  ;;  %v4264_v16 = vsub.f32 %v6369_v21, %v4261_v34  ;;  %v4480_v26 = vrot.slane %v6359_v45, %v6158_v28  ;;  %v4487_v21 = vrot.slane %v6361_v31, %v6158_v28  ;;  %v4063_v31 = vld [vmem:[%s6496_s13] sm:$0xf] }
 0x862   :  { %v4259_v43 = vpop.xlane.xlu0 %4258  ;;  %v4068_v52 = vrot.slane %v4063_v31, %v6158_v28  ;;  %v4072_v12 = vrot.slane %v4063_v31, %v6145_v57  ;;  %v4302_v57 = vrot.slane %v6184_v58, %v4301_v25  ;;  %v4076_v35 = vrot.slane %v4063_v31, %v6154_v60 }
 0x863   :  { %v4262_v33 = vmul.f32 0.00390625, %v4259_v43  ;;  %v4267_v23 = vmul.f32 %v4263_v6, %v4263_v6  ;;  %v4268_v41 = vmul.f32 %v4264_v16, %v4264_v16  ;;  %4489 = vbcast.lane.b32.xlu0 %v4487_v21, 256  ;;  %v4372_v43 = vstv %s4976_s23 }
 0x864   :  { %v4080_v61 = vrot.slane %v4063_v31, %v6151_v59 }
 0x865   :  { %v4265_v55 = vsub.f32 %v6373_v22, %v4262_v33  ;;  %v4266_v53 = vsub.f32 %v6377_v49, %v4262_v33  ;;  %v4271_v39 = vadd.f32 %v4268_v41, %v4267_v23 }
 0x867   :  { %4272 = vadd.xlane.f32.xlu1 %v4271_v39  ;;  %v4269_v44 = vmul.f32 %v4265_v55, %v4265_v55  ;;  %v4270_v62 = vmul.f32 %v4266_v53, %v4266_v53 }
 0x869   :  { %v4274_v50 = vadd.f32 %v4270_v62, %v4269_v44  ;;  %v4392_v44 = vstv %s4978_s24 }
 0x86b   :  { %4275 = vadd.xlane.f32.xlu1 %v4274_v50  ;;  %v4366_v50 = vstv %s6447_s17 }
 0x86f   :  { %4327 = vadd.xlane.f32.xlu1 %v6393_v24 }
 0x873   :  { %4349 = vadd.xlane.f32.xlu1 %v6403_v36  ;;  %v4325_v36 = vpop.xlane.xlu0 %4324 }
 0x874   :  { %v4331_v45 = vadd.f32 %v4330_v9, %v4325_v36 }
 0x876   :  { %v4355_v1 = vand.u32 2147483647, %v4331_v45 }
 0x877   :  { %v4347_v5 = vpop.xlane.xlu0 %4346 }
 0x878   :  { %v4357_v47 = vmul.f32 %v4355_v1, %v6298_v29  ;;  %v4358_v63 = vmul.f32 %v4355_v1, %v6301_v32  ;;  %v4353_v19 = vadd.f32 %v4352_v20, %v4347_v5 }
 0x87a   :  { %v4362_v33 = vadd.f32 %v4358_v63, %v4353_v19 }
 0x884   :  { %4482 = vbcast.lane.b32.xlu1 %v4480_v26, 256 }
 0x8e4   :  { %v4119_v22 = vpop.f32.mrb[28].mxu0 }
 0x8e5   :  { %v4121_v49 = vpop.f32.mrb[29].mxu0  ;;  %v4120_v7 = vadd.f32 %v4119_v22, %v4068_v52 }
 0x8e6   :  { %v4123_v40 = vpop.f32.mrb[30].mxu0  ;;  %v4122_v37 = vadd.f32 %v4121_v49, %v4072_v12 }
 0x8e7   :  { %v4125_v30 = vpop.f32.mrb[31].mxu0  ;;  %v4171_v41 = vadd.f32 %v4120_v7, %v6298_v29  ;;  %v4124_v39 = vadd.f32 %v4123_v40, %v4068_v52 }
 0x8e8   :  { %v4172_v58 = vadd.f32 %v4122_v37, %v6301_v32  ;;  %v4126_v62 = vadd.f32 %v4125_v30, %v4072_v12 }
 0x8e9   :  { %v4373_v40 = vmul.f32 %v4372_v43, %v4171_v41 }
 0x8ea   :  { %v4174_v59 = vadd.f32 %v4126_v62, %v6307_v46 }
 0x8ec   :  { %v4376_v25 = vmul.f32 %v4372_v43, %v4174_v59 }
 0x8f4   :  { %v4273_v42 = vpop.xlane.xlu1 %4272 }
 0x8f5   :  { %v4277_v8 = vmul.f32 0.00390625, %v4273_v42  ;;  %v4394_v42 = vmul.f32 %v4392_v44, %v4362_v33  ;;  %v4979_v33 = vld [vmem:[%s6497_s14] ss:$0 sm:$0xff] }
 0x8f7   :  { %v4279_v24 = vadd.f32 1e-05, %v4277_v8 }
 0x8f8   :  { %v4276_v54 = vpop.xlane.xlu1 %4275 }
 0x8f9   :  { %v4278_v38 = vmul.f32 0.00390625, %v4276_v54  ;;  %5685 = vrsqrt.f32 %v4279_v24  ;;  %v4173_v54 = vadd.f32 %v4124_v39, %v6304_v48 }
 0x8fb   :  { %v4280_v0 = vadd.f32 1e-05, %v4278_v38  ;;  %v4374_v38 = vmul.f32 %v4372_v43, %v4172_v58 }
 0x8fc   :  { %v4328_v10 = vpop.xlane.xlu1 %4327 }
 0x8fd   :  { %5687 = vrsqrt.f32 %v4280_v0  ;;  %v4332_v17 = vadd.f32 %v4330_v9, %v4328_v10 }
 0x8ff   :  { %v4356_v14 = vand.u32 2147483647, %v4332_v17 }
 0x900   :  { %v4350_v23 = vpop.xlane.xlu1 %4349 }
 0x901   :  { %v4359_v60 = vmul.f32 %v4356_v14, %v6304_v48  ;;  %v4360_v21 = vmul.f32 %v4356_v14, %v6307_v46 }
 0x903   :  { %v5686_v3 = vpop.eup %5685 }
 0x904   :  { %v4283_v28 = vmul.f32 %v5686_v3, %v4263_v6  ;;  %v4284_v18 = vmul.f32 %v5686_v3, %v4264_v16  ;;  %v4361_v6 = vadd.f32 %v4357_v47, %v4353_v19 }
 0x906   :  { %v4295_v16 = vmul.f32 %v4290_v15, %v4283_v28  ;;  %v4393_v49 = vmul.f32 %v4392_v44, %v4361_v6 }
 0x907   :  { %v5688_v4 = vpop.eup %5687 }
 0x908   :  { %v4285_v27 = vmul.f32 %v5688_v4, %v4265_v55  ;;  %v4286_v34 = vmul.f32 %v5688_v4, %v4266_v53  ;;  %v4296_v55 = vmul.f32 %v4294_v51, %v4284_v18  ;;  %v4354_v53 = vadd.f32 %v4352_v20, %v4350_v23 }
 0x909   :  { %v4307_v32 = vadd.f32 %v4302_v57, %v4295_v16  ;;  %v4375_v20 = vmul.f32 %v4372_v43, %v4173_v54 }
 0x90a   :  { %v4297_v26 = vmul.f32 %v4290_v15, %v4285_v27  ;;  %v4298_v29 = vmul.f32 %v4294_v51, %v4286_v34  ;;  %v4308_v0 = vadd.f32 %v4306_v13, %v4296_v55  ;;  %v4363_v10 = vadd.f32 %v4359_v60, %v4354_v53 }
 0x90b   :  { %v4364_v5 = vadd.f32 %v4360_v21, %v4354_v53  ;;  %v4383_v3 = vmul.f32 %v4382_v56, %v4307_v32  ;;  %v4483_v53 = vpop.permute.xlu1 %4482 }
 0x90c   :  { %v4309_v31 = vadd.f32 %v4302_v57, %v4297_v26  ;;  %v4310_v11 = vadd.f32 %v4306_v13, %v4298_v29  ;;  %v4384_v4 = vmul.f32 %v4382_v56, %v4308_v0  ;;  %v4395_v28 = vmul.f32 %v4392_v44, %v4363_v10 }
 0x90d   :  { %v4396_v18 = vmul.f32 %v4392_v44, %v4364_v5 }
 0x90e   :  { %v4385_v19 = vmul.f32 %v4382_v56, %v4309_v31  ;;  %v4386_v51 = vmul.f32 %v4382_v56, %v4310_v11 }
 0x921   :  { %v4241_v22 = vpop.f32.mrb[12].mxu1 }
 0x922   :  { %v5007_v8 = vadd.f32 %v4241_v22, %v4076_v35  ;;  %v4243_v30 = vpop.f32.mrb[13].mxu1 }
 0x923   :  { %v5008_v24 = vadd.f32 %v4243_v30, %v4080_v61  ;;  %v4245_v36 = vpop.f32.mrb[14].mxu1 }
 0x924   :  { %v4367_v9 = vmul.f32 %v5007_v8, %v4366_v50  ;;  %v5009_v45 = vadd.f32 %v4245_v36, %v4076_v35  ;;  %v4247_v1 = vpop.f32.mrb[15].mxu1 }
 0x925   :  { %v4368_v52 = vmul.f32 %v5008_v24, %v4366_v50  ;;  %v5010_v2 = vadd.f32 %v4247_v1, %v4080_v61 }
 0x926   :  { %v4377_v48 = vadd.f32 %v4373_v40, %v4367_v9  ;;  %v4369_v12 = vmul.f32 %v5009_v45, %v4366_v50 }
 0x927   :  { %v4378_v17 = vadd.f32 %v4374_v38, %v4368_v52  ;;  %v4370_v46 = vmul.f32 %v5010_v2, %v4366_v50  ;;  %v4980_v2 = vld [vmem:[%s6498_s15] ss:$0 sm:$0xff] }
 0x928   :  { %v4387_v47 = vadd.f32 %v4383_v3, %v4377_v48  ;;  %v4379_v63 = vadd.f32 %v4375_v20, %v4369_v12  ;;  %v4527_v12 = vstv %s4981_s25 }
 0x929   :  { %v4388_v7 = vadd.f32 %v4384_v4, %v4378_v17  ;;  %v4380_v15 = vadd.f32 %v4376_v25, %v4370_v46 }
 0x92a   :  { %v4389_v37 = vadd.f32 %v4385_v19, %v4379_v63  ;;  %v4397_v13 = vadd.f32 %v4393_v49, %v4387_v47 }
 0x92b   :  { %v4390_v57 = vadd.f32 %v4386_v51, %v4380_v15  ;;  %v4398_v14 = vadd.f32 %v4394_v42, %v4388_v7  ;;  %v4490_v42 = vpop.permute.xlu0 %4489 }
 0x92c   :  { %v4399_v27 = vadd.f32 %v4395_v28, %v4389_v37 }
 0x92d   :  { %v4400_v35 = vadd.f32 %v4396_v18, %v4390_v57 }
 0x92e   :  { %v4401_v34 = vpack.c.bf16 %v4399_v27, %v4397_v13 }
 0x92f   :  { %v4402_v6 = vpack.c.bf16 %v4400_v35, %v4398_v14 }
 0x931   :  { %4458 = vmatprep.mubr.bf16.mxu0 %v4402_v6 }
 0x932   :  { %4459 = vmatmul.mubr.bf16.vlgmr.msra.gmra.mrb[32].mxu0 %v4401_v34 }
 0xa05   :  { %v5001_v43 = vpop.f32.mrb[32].mxu0 }
 0xa06   :  { %v5002_v23 = vpop.f32.mrb[33].mxu0 }
 0xa07   :  { %v5003_v41 = vadd.f32 %v5002_v23, %v5001_v43  ;;  %v5004_v39 = vpop.f32.mrb[34].mxu0 }
 0xa08   :  { %v5005_v56 = vpop.f32.mrb[35].mxu0 }
 0xa09   :  { %v4461_v16 = vadd.f32 %v5003_v41, %v4979_v33  ;;  %v5006_v44 = vadd.f32 %v5005_v56, %v5004_v39 }
 0xa0b   :  { %v4469_v58 = vmul.f32 0.70710677, %v4461_v16  ;;  %v4464_v62 = vadd.f32 %v5006_v44, %v4979_v33  ;;  %v4467_v60 = vmul.f32 0.5, %v4461_v16 }
 0xa0d   :  { %5689 = verf.f32 %v4469_v58  ;;  %v4470_v61 = vmul.f32 0.70710677, %v4464_v62  ;;  %v4468_v22 = vmul.f32 0.5, %v4464_v62 }
 0xa0f   :  { %5691 = verf.f32 %v4470_v61 }
 0xa17   :  { %v5690_v55 = vpop.eup %5689 }
 0xa18   :  { %v4473_v50 = vadd.f32 1.0, %v5690_v55 }
 0xa19   :  { %v5692_v26 = vpop.eup %5691 }
 0xa1a   :  { %v4475_v21 = vmul.f32 %v4473_v50, %v4467_v60  ;;  %v4474_v49 = vadd.f32 1.0, %v5692_v26 }
 0xa1c   :  { %v4491_v29 = vmul.f32 %v4483_v53, %v4475_v21  ;;  %v4476_v40 = vmul.f32 %v4474_v49, %v4468_v22 }
 0xa1e   :  { %v4494_v54 = vsel %vm4493_vm3, %v4491_v29, 0.0  ;;  %v4492_v8 = vmul.f32 %v4490_v42, %v4476_v40 }
 0xa1f   :  { %v4495_v32 = vrot.slane %v4494_v54, 4 }
 0xa20   :  { %v4501_v30 = vsel %vm4493_vm3, %v4492_v8, 0.0 }
 0xa21   :  { %v4496_v38 = vadd.f32 %v4495_v32, %v4494_v54  ;;  %v4502_v59 = vrot.slane %v4501_v30, 4 }
 0xa23   :  { %v4497_v24 = vrot.slane %v4496_v38, 2  ;;  %v4503_v0 = vadd.f32 %v4502_v59, %v4501_v30 }
 0xa25   :  { %v4498_v36 = vadd.f32 %v4497_v24, %v4496_v38  ;;  %v4504_v9 = vrot.slane %v4503_v0, 2 }
 0xa27   :  { %v4505_v45 = vadd.f32 %v4504_v9, %v4503_v0  ;;  %v4499_v31 = vrot.slane %v4498_v36, 1 }
 0xa29   :  { %v4506_v1 = vrot.slane %v4505_v45, 1  ;;  %v4500_v10 = vadd.f32 %v4499_v31, %v4498_v36 }
 0xa2b   :  { %v4507_v52 = vadd.f32 %v4506_v1, %v4505_v45  ;;  %v4515_v5 = vmul.f32 %v4980_v2, %v4500_v10 }
 0xa2d   :  { %v4516_v11 = vmul.f32 %v4980_v2, %v4507_v52 }
 0xa2f   :  { %v4519_v20 = vrot.slane %v4516_v11, 7 }
 0xa31   :  { %v4520_v48 = vsel %vm3952_vm1, %v4519_v20, %v4515_v5 }
 0xa32   :  { %v4523_v3 = vsel %vm4522_vm4, %v4520_v48, 0.0 }
 0xa33   :  { %4524 = vadd.xlane.f32.xlu1 %v4523_v3 }
 0xac0   :  { %v4525_v25 = vpop.xlane.xlu1 %4524 }
 0xac1   :  { %v4528_v17 = vadd.f32 %v4527_v12, %v4525_v25 }
 0xac3   :  { %v4529_v4 = vmul.f32 0.125, %v4528_v17 }
 0xac5   :  { %4530 = vst [vmem:[#allocation14] sm:$0x3] %v4529_v4 }
 0xac6   :  { %5782 = shalt.err (!%p5779_p5)
}
 0xac7   :  { %s5783_s8 = scalar_lea.hbm %s6499_s16, 32 }
 0xac8   :  { %p5784_p6 = scmp.ne.s32.totalorder %s6499_s16, %s5783_s8  ;;  %p5787_p7 = scmp.lt.u32.totalorder %s5783_s8, %s6499_s16 }
 0xaca   :  { %p5789_p8 = pnand %p5787_p7, %p5784_p6 }
 0xacc   :  { %5792 = shalt.err (!%p5789_p8)
}
 0xacd   :  { %4540 = dma.vmem_to_hbm [thread:$0]  %s4538_s26, 32, %s6499_s16, [#allocation8]  }
 0xace   :  { %5805 = dma.done.wait [#allocation8], 32  }
 0xacf   :  { %5806 = vsyncadd [#allocation8], 4294967264 }
 0xad0   :  { %4544 = vsyncpa [#allocation7], 1 }
 0xad1   :  { %4545 = vsyncpa [#allocation12], 1 }
 0xad2   :  { %4546 = vsyncpa [#allocation8], 1 }
 0xad3   :  { %4547 = vsyncpa [#allocation9], 1 }
 0xad4   :  { %4548 = vsyncmov [#allocation5] }
 0xad7   :  { %s4549_s3 = vpop.sfrf %4548 }
 0xad8   :  { %p4982_p9 = scmp.ne.s32.totalorder %s4549_s3, 0 }
 0xada   :  { %4553 = shalt.err (%p4982_p9)  }
 0xadb   :  { %4555 = vsyncmov [#allocation5 + $0x1] }
 0xade   :  { %s4556_s19 = vpop.sfrf %4555 }
 0xadf   :  { %p4983_p10 = scmp.ne.s32.totalorder %s4556_s19, 0 }
 0xae1   :  { %4560 = shalt.err (%p4983_p10)  }
 0xae2   :  { %4562 = vsyncmov [#allocation5 + $0x2] }
 0xae5   :  { %s4563_s12 = vpop.sfrf %4562 }
 0xae6   :  { %p4984_p11 = scmp.ne.s32.totalorder %s4563_s12, 0 }
 0xae8   :  { %4567 = shalt.err (%p4984_p11)  }

</bundles_post_ra>
